<compile_context>
chip_gen: v6e
topology: v6e:2x2x1
jax: 0.10.0
libtpu: 0.0.40
codegen_flags: <defaults>
</compile_context>

<pallas_src>
import functools
import math

import jax
import jax.numpy as jnp
from jax.experimental import pallas as pl
from jax.experimental.pallas import tpu as pltpu

NEG_SLOPE = 0.01      # nn.LeakyReLU default negative_slope
BN_EPS = 1e-5         # nn.BatchNorm1d default eps
LANE = 128


def _leaky_relu(v):
    return jnp.where(v > 0, v, NEG_SLOPE * v)


def _round_up(n, m):
    return ((n + m - 1) // m) * m


# ---------------------------------------------------------------------------
# Fused kernel: 12 branch MLPs (unrolled, folded) + fc_merge + folded tail.
# ---------------------------------------------------------------------------
def _fused_kernel(x_ref,        # (TB, 12*Dp)          bf16
                  w1_ref,       # (12, Dp, H)          bf16 (fc1 bias folded in row `din`)
                  c_ref,        # (12, H, 12H)         bf16 ((w2*bn_s)@mw1 fold)
                  mw2_ref,      # (12H, 6H)            bf16
                  mw3_ref,      # (6H, 6H)             bf16
                  wt_ref,       # (6H, OUT_PAD)        bf16 ((mw4*bn_s2)@wo fold, lane-padded)
                  bias_ref,     # (1, 12H+6H+6H+OUT_PAD) f32 packed biases
                  o_ref):       # (TB, OUT_PAD)        f32
    n_branch, dp, _ = w1_ref.shape
    merged = c_ref.shape[-1]        # 12H
    hid6 = mw2_ref.shape[-1]        # 6H
    out_pad = wt_ref.shape[-1]
    tb = x_ref.shape[0]

    # Packed-bias static slices (all offsets are multiples of 128 for H % 64 == 0).
    b_merge = bias_ref[:, pl.ds(0, merged)]
    mb2 = bias_ref[:, pl.ds(merged, hid6)]
    mb3 = bias_ref[:, pl.ds(merged + hid6, hid6)]
    b_tail = bias_ref[:, pl.ds(merged + 2 * hid6, out_pad)]

    # 12 "process" branches, unrolled at trace time.  Each branch contributes
    # directly into the first fc_merge activation (concat+Linear == sum of
    # per-branch partial matmuls), so no (B, 12H) concat slab is materialized.
    acc = jnp.zeros((tb, merged), jnp.float32)
    for i in range(n_branch):
        xi = x_ref[:, pl.ds(i * dp, dp)]                       # lane-aligned static slice
        hi = _leaky_relu(jnp.dot(xi, w1_ref[i],
                                 preferred_element_type=jnp.float32))
        acc = acc + jnp.dot(hi.astype(jnp.bfloat16), c_ref[i],
                            preferred_element_type=jnp.float32)

    # fc_merge remainder (Dropout = identity in eval mode).
    h = _leaky_relu(acc + b_merge)
    h = _leaky_relu(jnp.dot(h.astype(jnp.bfloat16), mw2_ref[...],
                            preferred_element_type=jnp.float32) + mb2)
    h = _leaky_relu(jnp.dot(h.astype(jnp.bfloat16), mw3_ref[...],
                            preferred_element_type=jnp.float32) + mb3)

    # Folded tail: fc_merge[3] -> BatchNorm -> fc_output in one matmul.
    o_ref[...] = jnp.dot(h.astype(jnp.bfloat16), wt_ref[...],
                         preferred_element_type=jnp.float32) + b_tail


# ---------------------------------------------------------------------------
# Raw (PyTorch-like) parameters: deterministic uniform init, BN running stats.
# ---------------------------------------------------------------------------
def init_raw_params(key, input_size, hidden_size, output_size, n_branch=12):
    H = hidden_size
    keys = iter(jax.random.split(key, 64))

    def lin(fan_in, shape):
        bound = 1.0 / math.sqrt(fan_in)
        return jax.random.uniform(next(keys), shape, jnp.float32, -bound, bound)

    p = {}
    p["w1"] = lin(input_size, (n_branch, input_size, H))
    p["b1"] = lin(input_size, (n_branch, H))
    p["w2"] = lin(H, (n_branch, H, H))
    p["b2"] = lin(H, (n_branch, H))
    p["bn_gamma"] = jnp.ones((n_branch, H), jnp.float32)
    p["bn_beta"] = jnp.zeros((n_branch, H), jnp.float32)
    p["bn_mean"] = 0.1 * jax.random.normal(next(keys), (n_branch, H), jnp.float32)
    p["bn_var"] = jax.random.uniform(next(keys), (n_branch, H), jnp.float32, 0.5, 1.5)

    M = n_branch * H
    p["mw1"] = lin(M, (M, M));          p["mb1"] = lin(M, (M,))
    p["mw2"] = lin(M, (M, 6 * H));      p["mb2"] = lin(M, (6 * H,))
    p["mw3"] = lin(6 * H, (6 * H, 6 * H)); p["mb3"] = lin(6 * H, (6 * H,))
    p["mw4"] = lin(6 * H, (6 * H, 3 * H)); p["mb4"] = lin(6 * H, (3 * H,))
    p["mbn_gamma"] = jnp.ones((3 * H,), jnp.float32)
    p["mbn_beta"] = jnp.zeros((3 * H,), jnp.float32)
    p["mbn_mean"] = 0.1 * jax.random.normal(next(keys), (3 * H,), jnp.float32)
    p["mbn_var"] = jax.random.uniform(next(keys), (3 * H,), jnp.float32, 0.5, 1.5)

    p["wo"] = lin(3 * H, (3 * H, 6 * output_size))
    p["bo"] = lin(3 * H, (6 * output_size,))
    return p


# ---------------------------------------------------------------------------
# Fold raw params into the kernel's (bf16) parameterization.
# ---------------------------------------------------------------------------
def fold_params(raw, weight_dtype=jnp.bfloat16):
    HI = jax.lax.Precision.HIGHEST
    n_branch, din, H = raw["w1"].shape
    M = n_branch * H
    dp = _round_up(din + 1, LANE)               # +1: ones-column carries the fc1 bias
    out_cols = raw["wo"].shape[-1]
    out_pad = _round_up(out_cols, LANE)

    # fc1: zero-pad Din->Dp and fold the bias into row `din` (x has a 1 there).
    w1 = jnp.pad(raw["w1"], ((0, 0), (0, dp - din), (0, 0)))
    w1 = w1.at[:, din, :].set(raw["b1"])

    # Branch BN (eval) -> affine, fused with fc2 and this branch's mw1 rows.
    s = raw["bn_gamma"] / jnp.sqrt(raw["bn_var"] + BN_EPS)          # (12, H)
    t = raw["bn_beta"] - raw["bn_mean"] * s
    mw1_r = raw["mw1"].reshape(n_branch, H, M)
    c = jnp.einsum("bij,bjk->bik", raw["w2"] * s[:, None, :], mw1_r, precision=HI)
    d = raw["b2"] * s + t                                            # (12, H)
    b_merge = raw["mb1"] + jnp.einsum("bh,bhk->k", d, mw1_r, precision=HI)

    # Tail fold: mw4 -> BN -> wo collapses to one (6H, out) matmul.
    s2 = raw["mbn_gamma"] / jnp.sqrt(raw["mbn_var"] + BN_EPS)        # (3H,)
    t2 = raw["mbn_beta"] - raw["mbn_mean"] * s2
    wt = jnp.dot(raw["mw4"] * s2[None, :], raw["wo"], precision=HI)  # (6H, out_cols)
    b_tail = jnp.dot(raw["mb4"] * s2 + t2, raw["wo"], precision=HI) + raw["bo"]
    wt = jnp.pad(wt, ((0, 0), (0, out_pad - out_cols)))              # lane-dense store
    b_tail = jnp.pad(b_tail, ((0, out_pad - out_cols),))

    bias = jnp.concatenate([b_merge, raw["mb2"], raw["mb3"], b_tail]).reshape(1, -1)

    return {
        "w1": w1.astype(weight_dtype),
        "c": c.astype(weight_dtype),
        "mw2": raw["mw2"].astype(weight_dtype),
        "mw3": raw["mw3"].astype(weight_dtype),
        "wt": wt.astype(weight_dtype),
        "bias": bias.astype(jnp.float32),
    }


def _prep_x(x, dp):
    """Zero-pad Din->Dp, set the ones-column for the folded fc1 bias, flatten."""
    B, n_branch, din = x.shape
    xp = jnp.pad(x, ((0, 0), (0, 0), (0, dp - din)))
    xp = xp.at[:, :, din].set(1.0)
    return xp.reshape(B, n_branch * dp).astype(jnp.bfloat16)


# ---------------------------------------------------------------------------
# Forward: one pallas_call, batch grid, weights VMEM-resident via constant maps.
# ---------------------------------------------------------------------------
def bb_model_forward(x, fp, *, output_size=4, batch_tile=128):
    B, n_branch, din = x.shape
    dp = fp["w1"].shape[1]
    H = fp["w1"].shape[-1]
    merged = fp["c"].shape[-1]
    hid6 = fp["mw2"].shape[-1]
    out_pad = fp["wt"].shape[-1]
    out_cols = 6 * output_size

    x_flat = _prep_x(x, dp)                              # (B, 12*Dp) bf16
    tb = min(_round_up(B, 8), batch_tile)
    bp = _round_up(B, tb)
    x_flat = jnp.pad(x_flat, ((0, bp - B), (0, 0)))

    args = (x_flat, fp["w1"], fp["c"], fp["mw2"], fp["mw3"], fp["wt"], fp["bias"])

    flops = 2 * bp * (n_branch * (dp * H + H * merged)
                      + merged * hid6 + hid6 * hid6 + hid6 * out_pad)
    bytes_accessed = (sum(int(a.size) * a.dtype.itemsize for a in args)
                      + bp * out_pad * 4)

    weight_bytes = sum(int(fp[k].size) * fp[k].dtype.itemsize
                       for k in ("w1", "c", "mw2", "mw3", "wt", "bias"))
    tile_bytes = tb * n_branch * dp * 2 + tb * out_pad * 4
    vmem_limit = int(min(2 * (weight_bytes + tile_bytes) + (4 << 20), 64 << 20))

    const2 = lambda i: (0, 0)
    const3 = lambda i: (0, 0, 0)

    out = pl.pallas_call(
        _fused_kernel,
        out_shape=jax.ShapeDtypeStruct((bp, out_pad), jnp.float32),
        grid=(bp // tb,),
        in_specs=[
            pl.BlockSpec((tb, n_branch * dp), lambda i: (i, 0)),   # x tile
            pl.BlockSpec(fp["w1"].shape, const3),                  # weights: resident
            pl.BlockSpec(fp["c"].shape, const3),
            pl.BlockSpec(fp["mw2"].shape, const2),
            pl.BlockSpec(fp["mw3"].shape, const2),
            pl.BlockSpec(fp["wt"].shape, const2),
            pl.BlockSpec(fp["bias"].shape, const2),
        ],
        out_specs=pl.BlockSpec((tb, out_pad), lambda i: (i, 0)),
        compiler_params=pltpu.CompilerParams(
            dimension_semantics=("parallel",),
            vmem_limit_bytes=vmem_limit),
        cost_estimate=pl.CostEstimate(flops=flops, transcendentals=0,
                                      bytes_accessed=bytes_accessed),
    )(*args)

    return out[:B, :out_cols].reshape(B, 6, output_size)


# ---------------------------------------------------------------------------
# References.
# ---------------------------------------------------------------------------
def reference_folded(x, fp, *, output_size=4):
    """Pure-JAX mirror of the kernel math (same folded bf16 params, same casts)."""
    B, n_branch, _ = x.shape
    dp = fp["w1"].shape[1]
    merged = fp["c"].shape[-1]
    hid6 = fp["mw2"].shape[-1]
    xf = _prep_x(x, dp)
    bias = fp["bias"]
    b_merge = bias[:, :merged]
    mb2 = bias[:, merged:merged + hid6]
    mb3 = bias[:, merged + hid6:merged + 2 * hid6]
    b_tail = bias[:, merged + 2 * hid6:]

    acc = jnp.zeros((B, merged), jnp.float32)
    for i in range(n_branch):
        xi = xf[:, i * dp:(i + 1) * dp]
        hi = _leaky_relu(jnp.dot(xi, fp["w1"][i], preferred_element_type=jnp.float32))
        acc = acc + jnp.dot(hi.astype(jnp.bfloat16), fp["c"][i],
                            preferred_element_type=jnp.float32)
    h = _leaky_relu(acc + b_merge)
    h = _leaky_relu(jnp.dot(h.astype(jnp.bfloat16), fp["mw2"],
                            preferred_element_type=jnp.float32) + mb2)
    h = _leaky_relu(jnp.dot(h.astype(jnp.bfloat16), fp["mw3"],
                            preferred_element_type=jnp.float32) + mb3)
    o = jnp.dot(h.astype(jnp.bfloat16), fp["wt"],
                preferred_element_type=jnp.float32) + b_tail
    return o[:, :6 * output_size].reshape(B, 6, output_size)


def reference_unfolded(x, raw, *, output_size=4):
    """Straight f32 translation of the PyTorch module (eval mode), no folds."""
    HI = jax.lax.Precision.HIGHEST
    B, n_branch, _ = x.shape
    s = raw["bn_gamma"] / jnp.sqrt(raw["bn_var"] + BN_EPS)
    t = raw["bn_beta"] - raw["bn_mean"] * s
    outs = []
    for i in range(n_branch):
        xi = x[:, i, :]
        hi = _leaky_relu(jnp.dot(xi, raw["w1"][i], precision=HI) + raw["b1"][i])
        hi = jnp.dot(hi, raw["w2"][i], precision=HI) + raw["b2"][i]
        outs.append(hi * s[i] + t[i])
    h = jnp.concatenate(outs, axis=-1)
    h = _leaky_relu(jnp.dot(h, raw["mw1"], precision=HI) + raw["mb1"])
    h = _leaky_relu(jnp.dot(h, raw["mw2"], precision=HI) + raw["mb2"])  # Dropout=identity
    h = _leaky_relu(jnp.dot(h, raw["mw3"], precision=HI) + raw["mb3"])
    h = jnp.dot(h, raw["mw4"], precision=HI) + raw["mb4"]
    s2 = raw["mbn_gamma"] / jnp.sqrt(raw["mbn_var"] + BN_EPS)
    t2 = raw["mbn_beta"] - raw["mbn_mean"] * s2
    h = h * s2 + t2
    o = jnp.dot(h, raw["wo"], precision=HI) + raw["bo"]
    return o.reshape(B, 6, output_size)


if __name__ == "__main__":
    # Small shapes consistent with the module: x is (B, 12, input_size).
    B, INPUT_SIZE, HIDDEN_SIZE, OUTPUT_SIZE = 16, 180, 64, 4

    key = jax.random.PRNGKey(0)
    kx, kp = jax.random.split(key)
    x = jax.random.normal(kx, (B, 12, INPUT_SIZE), jnp.float32)
    raw = init_raw_params(kp, INPUT_SIZE, HIDDEN_SIZE, OUTPUT_SIZE)
    fp = fold_params(raw, weight_dtype=jnp.bfloat16)

    fwd = jax.jit(functools.partial(bb_model_forward,
                                    output_size=OUTPUT_SIZE, batch_tile=8))
    out = jax.block_until_ready(fwd(x, fp))
    assert out.shape == (B, 6, OUTPUT_SIZE)

    # 1) Kernel vs an exact pure-JAX mirror of the folded bf16 math (tight).
    ref_bf16 = jax.block_until_ready(
        reference_folded(x, fp, output_size=OUTPUT_SIZE))
    assert jnp.allclose(out, ref_bf16, rtol=1e-3, atol=1e-3), \
        "kernel mismatch vs mirrored bf16 reference"

    # 2) Kernel vs the unfolded f32 module math (loose: absorbs bf16 weights).
    ref_f32 = jax.block_until_ready(
        reference_unfolded(x, raw, output_size=OUTPUT_SIZE))
    assert jnp.allclose(out, ref_f32, rtol=3e-2, atol=3e-2), \
        "kernel mismatch vs unfolded f32 reference"

    print("KERNEL_OK")
</pallas_src>

<mosaic_0001>
module attributes {stable_mosaic.version = 11 : i64} {
  func.func @_fused_kernel(%arg0: i32, %arg1: memref<8x3072xbf16, #tpu.memory_space<vmem>>, %arg2: memref<12x256x64xbf16, #tpu.memory_space<vmem>>, %arg3: memref<12x64x768xbf16, #tpu.memory_space<vmem>>, %arg4: memref<768x384xbf16, #tpu.memory_space<vmem>>, %arg5: memref<384x384xbf16, #tpu.memory_space<vmem>>, %arg6: memref<384x128xbf16, #tpu.memory_space<vmem>>, %arg7: memref<1x1664xf32, #tpu.memory_space<vmem>>, %arg8: memref<8x128xf32, #tpu.memory_space<vmem>>) attributes {dimension_semantics = [#tpu.dimension_semantics<parallel>], iteration_bounds = array<i64: 2>, scalar_prefetch = 0 : i64, scratch_operands = 0 : i64, tpu.core_type = #tpu.core_type<tc>, window_params = [{transform_indices = @transform_0, window_bounds = array<i64: 8, 3072>}, {pipeline_mode = #tpu.pipeline_mode<synchronous>, transform_indices = @transform_1, window_bounds = array<i64: 12, 256, 64>}, {pipeline_mode = #tpu.pipeline_mode<synchronous>, transform_indices = @transform_2, window_bounds = array<i64: 12, 64, 768>}, {pipeline_mode = #tpu.pipeline_mode<synchronous>, transform_indices = @transform_3, window_bounds = array<i64: 768, 384>}, {pipeline_mode = #tpu.pipeline_mode<synchronous>, transform_indices = @transform_4, window_bounds = array<i64: 384, 384>}, {pipeline_mode = #tpu.pipeline_mode<synchronous>, transform_indices = @transform_5, window_bounds = array<i64: 384, 128>}, {pipeline_mode = #tpu.pipeline_mode<synchronous>, transform_indices = @transform_6, window_bounds = array<i64: 1, 1664>}, {transform_indices = @transform_7, window_bounds = array<i64: 8, 128>}]} {
    %c0 = arith.constant 0 : index
    %c0_0 = arith.constant 0 : index
    %0 = vector.load %arg7[%c0, %c0_0] : memref<1x1664xf32, #tpu.memory_space<vmem>>, vector<1x768xf32>
    %c0_1 = arith.constant 0 : index
    %c768 = arith.constant 768 : index
    %1 = vector.load %arg7[%c0_1, %c768] : memref<1x1664xf32, #tpu.memory_space<vmem>>, vector<1x384xf32>
    %c0_2 = arith.constant 0 : index
    %c1152 = arith.constant 1152 : index
    %2 = vector.load %arg7[%c0_2, %c1152] : memref<1x1664xf32, #tpu.memory_space<vmem>>, vector<1x384xf32>
    %c0_3 = arith.constant 0 : index
    %c1536 = arith.constant 1536 : index
    %3 = vector.load %arg7[%c0_3, %c1536] : memref<1x1664xf32, #tpu.memory_space<vmem>>, vector<1x128xf32>
    %cst = arith.constant 0.000000e+00 : f32
    %4 = vector.broadcast %cst : f32 to vector<8x768xf32>
    %c0_4 = arith.constant 0 : index
    %c0_5 = arith.constant 0 : index
    %5 = vector.load %arg1[%c0_4, %c0_5] : memref<8x3072xbf16, #tpu.memory_space<vmem>>, vector<8x256xbf16>
    %c0_6 = arith.constant 0 : index
    %c0_7 = arith.constant 0 : index
    %c0_8 = arith.constant 0 : index
    %6 = vector.load %arg2[%c0_6, %c0_7, %c0_8] : memref<12x256x64xbf16, #tpu.memory_space<vmem>>, vector<1x256x64xbf16>
    %7 = vector.shape_cast %6 : vector<1x256x64xbf16> to vector<256x64xbf16>
    %cst_9 = arith.constant dense<0.000000e+00> : vector<8x64xf32>
    %8 = tpu.matmul %5, %7, %cst_9 {dimension_numbers = #tpu.dot_dimension_numbers<[1], [0], [0], [1], [0, 0, 1, 1], [], []>} : vector<8x256xbf16>, vector<256x64xbf16>, vector<8x64xf32> -> vector<8x64xf32>
    %cst_10 = arith.constant 0.000000e+00 : f32
    %9 = vector.broadcast %cst_10 : f32 to vector<8x64xf32>
    %10 = arith.cmpf ogt, %8, %9 : vector<8x64xf32>
    %cst_11 = arith.constant 0.00999999977 : f32
    %11 = vector.broadcast %cst_11 : f32 to vector<8x64xf32>
    %12 = arith.mulf %11, %8 : vector<8x64xf32>
    %13 = arith.select %10, %8, %12 : vector<8x64xi1>, vector<8x64xf32>
    %14 = arith.truncf %13 : vector<8x64xf32> to vector<8x64xbf16>
    %c0_12 = arith.constant 0 : index
    %c0_13 = arith.constant 0 : index
    %c0_14 = arith.constant 0 : index
    %15 = vector.load %arg3[%c0_12, %c0_13, %c0_14] : memref<12x64x768xbf16, #tpu.memory_space<vmem>>, vector<1x64x768xbf16>
    %16 = vector.shape_cast %15 : vector<1x64x768xbf16> to vector<64x768xbf16>
    %cst_15 = arith.constant dense<0.000000e+00> : vector<8x768xf32>
    %17 = tpu.matmul %14, %16, %cst_15 {dimension_numbers = #tpu.dot_dimension_numbers<[1], [0], [0], [1], [0, 0, 1, 1], [], []>} : vector<8x64xbf16>, vector<64x768xbf16>, vector<8x768xf32> -> vector<8x768xf32>
    %18 = arith.addf %4, %17 : vector<8x768xf32>
    %c0_16 = arith.constant 0 : index
    %c256 = arith.constant 256 : index
    %19 = vector.load %arg1[%c0_16, %c256] : memref<8x3072xbf16, #tpu.memory_space<vmem>>, vector<8x256xbf16>
    %c1 = arith.constant 1 : index
    %c0_17 = arith.constant 0 : index
    %c0_18 = arith.constant 0 : index
    %20 = vector.load %arg2[%c1, %c0_17, %c0_18] : memref<12x256x64xbf16, #tpu.memory_space<vmem>>, vector<1x256x64xbf16>
    %21 = vector.shape_cast %20 : vector<1x256x64xbf16> to vector<256x64xbf16>
    %cst_19 = arith.constant dense<0.000000e+00> : vector<8x64xf32>
    %22 = tpu.matmul %19, %21, %cst_19 {dimension_numbers = #tpu.dot_dimension_numbers<[1], [0], [0], [1], [0, 0, 1, 1], [], []>} : vector<8x256xbf16>, vector<256x64xbf16>, vector<8x64xf32> -> vector<8x64xf32>
    %cst_20 = arith.constant 0.000000e+00 : f32
    %23 = vector.broadcast %cst_20 : f32 to vector<8x64xf32>
    %24 = arith.cmpf ogt, %22, %23 : vector<8x64xf32>
    %cst_21 = arith.constant 0.00999999977 : f32
    %25 = vector.broadcast %cst_21 : f32 to vector<8x64xf32>
    %26 = arith.mulf %25, %22 : vector<8x64xf32>
    %27 = arith.select %24, %22, %26 : vector<8x64xi1>, vector<8x64xf32>
    %28 = arith.truncf %27 : vector<8x64xf32> to vector<8x64xbf16>
    %c1_22 = arith.constant 1 : index
    %c0_23 = arith.constant 0 : index
    %c0_24 = arith.constant 0 : index
    %29 = vector.load %arg3[%c1_22, %c0_23, %c0_24] : memref<12x64x768xbf16, #tpu.memory_space<vmem>>, vector<1x64x768xbf16>
    %30 = vector.shape_cast %29 : vector<1x64x768xbf16> to vector<64x768xbf16>
    %cst_25 = arith.constant dense<0.000000e+00> : vector<8x768xf32>
    %31 = tpu.matmul %28, %30, %cst_25 {dimension_numbers = #tpu.dot_dimension_numbers<[1], [0], [0], [1], [0, 0, 1, 1], [], []>} : vector<8x64xbf16>, vector<64x768xbf16>, vector<8x768xf32> -> vector<8x768xf32>
    %32 = arith.addf %18, %31 : vector<8x768xf32>
    %c0_26 = arith.constant 0 : index
    %c512 = arith.constant 512 : index
    %33 = vector.load %arg1[%c0_26, %c512] : memref<8x3072xbf16, #tpu.memory_space<vmem>>, vector<8x256xbf16>
    %c2 = arith.constant 2 : index
    %c0_27 = arith.constant 0 : index
    %c0_28 = arith.constant 0 : index
    %34 = vector.load %arg2[%c2, %c0_27, %c0_28] : memref<12x256x64xbf16, #tpu.memory_space<vmem>>, vector<1x256x64xbf16>
    %35 = vector.shape_cast %34 : vector<1x256x64xbf16> to vector<256x64xbf16>
    %cst_29 = arith.constant dense<0.000000e+00> : vector<8x64xf32>
    %36 = tpu.matmul %33, %35, %cst_29 {dimension_numbers = #tpu.dot_dimension_numbers<[1], [0], [0], [1], [0, 0, 1, 1], [], []>} : vector<8x256xbf16>, vector<256x64xbf16>, vector<8x64xf32> -> vector<8x64xf32>
    %cst_30 = arith.constant 0.000000e+00 : f32
    %37 = vector.broadcast %cst_30 : f32 to vector<8x64xf32>
    %38 = arith.cmpf ogt, %36, %37 : vector<8x64xf32>
    %cst_31 = arith.constant 0.00999999977 : f32
    %39 = vector.broadcast %cst_31 : f32 to vector<8x64xf32>
    %40 = arith.mulf %39, %36 : vector<8x64xf32>
    %41 = arith.select %38, %36, %40 : vector<8x64xi1>, vector<8x64xf32>
    %42 = arith.truncf %41 : vector<8x64xf32> to vector<8x64xbf16>
    %c2_32 = arith.constant 2 : index
    %c0_33 = arith.constant 0 : index
    %c0_34 = arith.constant 0 : index
    %43 = vector.load %arg3[%c2_32, %c0_33, %c0_34] : memref<12x64x768xbf16, #tpu.memory_space<vmem>>, vector<1x64x768xbf16>
    %44 = vector.shape_cast %43 : vector<1x64x768xbf16> to vector<64x768xbf16>
    %cst_35 = arith.constant dense<0.000000e+00> : vector<8x768xf32>
    %45 = tpu.matmul %42, %44, %cst_35 {dimension_numbers = #tpu.dot_dimension_numbers<[1], [0], [0], [1], [0, 0, 1, 1], [], []>} : vector<8x64xbf16>, vector<64x768xbf16>, vector<8x768xf32> -> vector<8x768xf32>
    %46 = arith.addf %32, %45 : vector<8x768xf32>
    %c0_36 = arith.constant 0 : index
    %c768_37 = arith.constant 768 : index
    %47 = vector.load %arg1[%c0_36, %c768_37] : memref<8x3072xbf16, #tpu.memory_space<vmem>>, vector<8x256xbf16>
    %c3 = arith.constant 3 : index
    %c0_38 = arith.constant 0 : index
    %c0_39 = arith.constant 0 : index
    %48 = vector.load %arg2[%c3, %c0_38, %c0_39] : memref<12x256x64xbf16, #tpu.memory_space<vmem>>, vector<1x256x64xbf16>
    %49 = vector.shape_cast %48 : vector<1x256x64xbf16> to vector<256x64xbf16>
    %cst_40 = arith.constant dense<0.000000e+00> : vector<8x64xf32>
    %50 = tpu.matmul %47, %49, %cst_40 {dimension_numbers = #tpu.dot_dimension_numbers<[1], [0], [0], [1], [0, 0, 1, 1], [], []>} : vector<8x256xbf16>, vector<256x64xbf16>, vector<8x64xf32> -> vector<8x64xf32>
    %cst_41 = arith.constant 0.000000e+00 : f32
    %51 = vector.broadcast %cst_41 : f32 to vector<8x64xf32>
    %52 = arith.cmpf ogt, %50, %51 : vector<8x64xf32>
    %cst_42 = arith.constant 0.00999999977 : f32
    %53 = vector.broadcast %cst_42 : f32 to vector<8x64xf32>
    %54 = arith.mulf %53, %50 : vector<8x64xf32>
    %55 = arith.select %52, %50, %54 : vector<8x64xi1>, vector<8x64xf32>
    %56 = arith.truncf %55 : vector<8x64xf32> to vector<8x64xbf16>
    %c3_43 = arith.constant 3 : index
    %c0_44 = arith.constant 0 : index
    %c0_45 = arith.constant 0 : index
    %57 = vector.load %arg3[%c3_43, %c0_44, %c0_45] : memref<12x64x768xbf16, #tpu.memory_space<vmem>>, vector<1x64x768xbf16>
    %58 = vector.shape_cast %57 : vector<1x64x768xbf16> to vector<64x768xbf16>
    %cst_46 = arith.constant dense<0.000000e+00> : vector<8x768xf32>
    %59 = tpu.matmul %56, %58, %cst_46 {dimension_numbers = #tpu.dot_dimension_numbers<[1], [0], [0], [1], [0, 0, 1, 1], [], []>} : vector<8x64xbf16>, vector<64x768xbf16>, vector<8x768xf32> -> vector<8x768xf32>
    %60 = arith.addf %46, %59 : vector<8x768xf32>
    %c0_47 = arith.constant 0 : index
    %c1024 = arith.constant 1024 : index
    %61 = vector.load %arg1[%c0_47, %c1024] : memref<8x3072xbf16, #tpu.memory_space<vmem>>, vector<8x256xbf16>
    %c4 = arith.constant 4 : index
    %c0_48 = arith.constant 0 : index
    %c0_49 = arith.constant 0 : index
    %62 = vector.load %arg2[%c4, %c0_48, %c0_49] : memref<12x256x64xbf16, #tpu.memory_space<vmem>>, vector<1x256x64xbf16>
    %63 = vector.shape_cast %62 : vector<1x256x64xbf16> to vector<256x64xbf16>
    %cst_50 = arith.constant dense<0.000000e+00> : vector<8x64xf32>
    %64 = tpu.matmul %61, %63, %cst_50 {dimension_numbers = #tpu.dot_dimension_numbers<[1], [0], [0], [1], [0, 0, 1, 1], [], []>} : vector<8x256xbf16>, vector<256x64xbf16>, vector<8x64xf32> -> vector<8x64xf32>
    %cst_51 = arith.constant 0.000000e+00 : f32
    %65 = vector.broadcast %cst_51 : f32 to vector<8x64xf32>
    %66 = arith.cmpf ogt, %64, %65 : vector<8x64xf32>
    %cst_52 = arith.constant 0.00999999977 : f32
    %67 = vector.broadcast %cst_52 : f32 to vector<8x64xf32>
    %68 = arith.mulf %67, %64 : vector<8x64xf32>
    %69 = arith.select %66, %64, %68 : vector<8x64xi1>, vector<8x64xf32>
    %70 = arith.truncf %69 : vector<8x64xf32> to vector<8x64xbf16>
    %c4_53 = arith.constant 4 : index
    %c0_54 = arith.constant 0 : index
    %c0_55 = arith.constant 0 : index
    %71 = vector.load %arg3[%c4_53, %c0_54, %c0_55] : memref<12x64x768xbf16, #tpu.memory_space<vmem>>, vector<1x64x768xbf16>
    %72 = vector.shape_cast %71 : vector<1x64x768xbf16> to vector<64x768xbf16>
    %cst_56 = arith.constant dense<0.000000e+00> : vector<8x768xf32>
    %73 = tpu.matmul %70, %72, %cst_56 {dimension_numbers = #tpu.dot_dimension_numbers<[1], [0], [0], [1], [0, 0, 1, 1], [], []>} : vector<8x64xbf16>, vector<64x768xbf16>, vector<8x768xf32> -> vector<8x768xf32>
    %74 = arith.addf %60, %73 : vector<8x768xf32>
    %c0_57 = arith.constant 0 : index
    %c1280 = arith.constant 1280 : index
    %75 = vector.load %arg1[%c0_57, %c1280] : memref<8x3072xbf16, #tpu.memory_space<vmem>>, vector<8x256xbf16>
    %c5 = arith.constant 5 : index
    %c0_58 = arith.constant 0 : index
    %c0_59 = arith.constant 0 : index
    %76 = vector.load %arg2[%c5, %c0_58, %c0_59] : memref<12x256x64xbf16, #tpu.memory_space<vmem>>, vector<1x256x64xbf16>
    %77 = vector.shape_cast %76 : vector<1x256x64xbf16> to vector<256x64xbf16>
    %cst_60 = arith.constant dense<0.000000e+00> : vector<8x64xf32>
    %78 = tpu.matmul %75, %77, %cst_60 {dimension_numbers = #tpu.dot_dimension_numbers<[1], [0], [0], [1], [0, 0, 1, 1], [], []>} : vector<8x256xbf16>, vector<256x64xbf16>, vector<8x64xf32> -> vector<8x64xf32>
    %cst_61 = arith.constant 0.000000e+00 : f32
    %79 = vector.broadcast %cst_61 : f32 to vector<8x64xf32>
    %80 = arith.cmpf ogt, %78, %79 : vector<8x64xf32>
    %cst_62 = arith.constant 0.00999999977 : f32
    %81 = vector.broadcast %cst_62 : f32 to vector<8x64xf32>
    %82 = arith.mulf %81, %78 : vector<8x64xf32>
    %83 = arith.select %80, %78, %82 : vector<8x64xi1>, vector<8x64xf32>
    %84 = arith.truncf %83 : vector<8x64xf32> to vector<8x64xbf16>
    %c5_63 = arith.constant 5 : index
    %c0_64 = arith.constant 0 : index
    %c0_65 = arith.constant 0 : index
    %85 = vector.load %arg3[%c5_63, %c0_64, %c0_65] : memref<12x64x768xbf16, #tpu.memory_space<vmem>>, vector<1x64x768xbf16>
    %86 = vector.shape_cast %85 : vector<1x64x768xbf16> to vector<64x768xbf16>
    %cst_66 = arith.constant dense<0.000000e+00> : vector<8x768xf32>
    %87 = tpu.matmul %84, %86, %cst_66 {dimension_numbers = #tpu.dot_dimension_numbers<[1], [0], [0], [1], [0, 0, 1, 1], [], []>} : vector<8x64xbf16>, vector<64x768xbf16>, vector<8x768xf32> -> vector<8x768xf32>
    %88 = arith.addf %74, %87 : vector<8x768xf32>
    %c0_67 = arith.constant 0 : index
    %c1536_68 = arith.constant 1536 : index
    %89 = vector.load %arg1[%c0_67, %c1536_68] : memref<8x3072xbf16, #tpu.memory_space<vmem>>, vector<8x256xbf16>
    %c6 = arith.constant 6 : index
    %c0_69 = arith.constant 0 : index
    %c0_70 = arith.constant 0 : index
    %90 = vector.load %arg2[%c6, %c0_69, %c0_70] : memref<12x256x64xbf16, #tpu.memory_space<vmem>>, vector<1x256x64xbf16>
    %91 = vector.shape_cast %90 : vector<1x256x64xbf16> to vector<256x64xbf16>
    %cst_71 = arith.constant dense<0.000000e+00> : vector<8x64xf32>
    %92 = tpu.matmul %89, %91, %cst_71 {dimension_numbers = #tpu.dot_dimension_numbers<[1], [0], [0], [1], [0, 0, 1, 1], [], []>} : vector<8x256xbf16>, vector<256x64xbf16>, vector<8x64xf32> -> vector<8x64xf32>
    %cst_72 = arith.constant 0.000000e+00 : f32
    %93 = vector.broadcast %cst_72 : f32 to vector<8x64xf32>
    %94 = arith.cmpf ogt, %92, %93 : vector<8x64xf32>
    %cst_73 = arith.constant 0.00999999977 : f32
    %95 = vector.broadcast %cst_73 : f32 to vector<8x64xf32>
    %96 = arith.mulf %95, %92 : vector<8x64xf32>
    %97 = arith.select %94, %92, %96 : vector<8x64xi1>, vector<8x64xf32>
    %98 = arith.truncf %97 : vector<8x64xf32> to vector<8x64xbf16>
    %c6_74 = arith.constant 6 : index
    %c0_75 = arith.constant 0 : index
    %c0_76 = arith.constant 0 : index
    %99 = vector.load %arg3[%c6_74, %c0_75, %c0_76] : memref<12x64x768xbf16, #tpu.memory_space<vmem>>, vector<1x64x768xbf16>
    %100 = vector.shape_cast %99 : vector<1x64x768xbf16> to vector<64x768xbf16>
    %cst_77 = arith.constant dense<0.000000e+00> : vector<8x768xf32>
    %101 = tpu.matmul %98, %100, %cst_77 {dimension_numbers = #tpu.dot_dimension_numbers<[1], [0], [0], [1], [0, 0, 1, 1], [], []>} : vector<8x64xbf16>, vector<64x768xbf16>, vector<8x768xf32> -> vector<8x768xf32>
    %102 = arith.addf %88, %101 : vector<8x768xf32>
    %c0_78 = arith.constant 0 : index
    %c1792 = arith.constant 1792 : index
    %103 = vector.load %arg1[%c0_78, %c1792] : memref<8x3072xbf16, #tpu.memory_space<vmem>>, vector<8x256xbf16>
    %c7 = arith.constant 7 : index
    %c0_79 = arith.constant 0 : index
    %c0_80 = arith.constant 0 : index
    %104 = vector.load %arg2[%c7, %c0_79, %c0_80] : memref<12x256x64xbf16, #tpu.memory_space<vmem>>, vector<1x256x64xbf16>
    %105 = vector.shape_cast %104 : vector<1x256x64xbf16> to vector<256x64xbf16>
    %cst_81 = arith.constant dense<0.000000e+00> : vector<8x64xf32>
    %106 = tpu.matmul %103, %105, %cst_81 {dimension_numbers = #tpu.dot_dimension_numbers<[1], [0], [0], [1], [0, 0, 1, 1], [], []>} : vector<8x256xbf16>, vector<256x64xbf16>, vector<8x64xf32> -> vector<8x64xf32>
    %cst_82 = arith.constant 0.000000e+00 : f32
    %107 = vector.broadcast %cst_82 : f32 to vector<8x64xf32>
    %108 = arith.cmpf ogt, %106, %107 : vector<8x64xf32>
    %cst_83 = arith.constant 0.00999999977 : f32
    %109 = vector.broadcast %cst_83 : f32 to vector<8x64xf32>
    %110 = arith.mulf %109, %106 : vector<8x64xf32>
    %111 = arith.select %108, %106, %110 : vector<8x64xi1>, vector<8x64xf32>
    %112 = arith.truncf %111 : vector<8x64xf32> to vector<8x64xbf16>
    %c7_84 = arith.constant 7 : index
    %c0_85 = arith.constant 0 : index
    %c0_86 = arith.constant 0 : index
    %113 = vector.load %arg3[%c7_84, %c0_85, %c0_86] : memref<12x64x768xbf16, #tpu.memory_space<vmem>>, vector<1x64x768xbf16>
    %114 = vector.shape_cast %113 : vector<1x64x768xbf16> to vector<64x768xbf16>
    %cst_87 = arith.constant dense<0.000000e+00> : vector<8x768xf32>
    %115 = tpu.matmul %112, %114, %cst_87 {dimension_numbers = #tpu.dot_dimension_numbers<[1], [0], [0], [1], [0, 0, 1, 1], [], []>} : vector<8x64xbf16>, vector<64x768xbf16>, vector<8x768xf32> -> vector<8x768xf32>
    %116 = arith.addf %102, %115 : vector<8x768xf32>
    %c0_88 = arith.constant 0 : index
    %c2048 = arith.constant 2048 : index
    %117 = vector.load %arg1[%c0_88, %c2048] : memref<8x3072xbf16, #tpu.memory_space<vmem>>, vector<8x256xbf16>
    %c8 = arith.constant 8 : index
    %c0_89 = arith.constant 0 : index
    %c0_90 = arith.constant 0 : index
    %118 = vector.load %arg2[%c8, %c0_89, %c0_90] : memref<12x256x64xbf16, #tpu.memory_space<vmem>>, vector<1x256x64xbf16>
    %119 = vector.shape_cast %118 : vector<1x256x64xbf16> to vector<256x64xbf16>
    %cst_91 = arith.constant dense<0.000000e+00> : vector<8x64xf32>
    %120 = tpu.matmul %117, %119, %cst_91 {dimension_numbers = #tpu.dot_dimension_numbers<[1], [0], [0], [1], [0, 0, 1, 1], [], []>} : vector<8x256xbf16>, vector<256x64xbf16>, vector<8x64xf32> -> vector<8x64xf32>
    %cst_92 = arith.constant 0.000000e+00 : f32
    %121 = vector.broadcast %cst_92 : f32 to vector<8x64xf32>
    %122 = arith.cmpf ogt, %120, %121 : vector<8x64xf32>
    %cst_93 = arith.constant 0.00999999977 : f32
    %123 = vector.broadcast %cst_93 : f32 to vector<8x64xf32>
    %124 = arith.mulf %123, %120 : vector<8x64xf32>
    %125 = arith.select %122, %120, %124 : vector<8x64xi1>, vector<8x64xf32>
    %126 = arith.truncf %125 : vector<8x64xf32> to vector<8x64xbf16>
    %c8_94 = arith.constant 8 : index
    %c0_95 = arith.constant 0 : index
    %c0_96 = arith.constant 0 : index
    %127 = vector.load %arg3[%c8_94, %c0_95, %c0_96] : memref<12x64x768xbf16, #tpu.memory_space<vmem>>, vector<1x64x768xbf16>
    %128 = vector.shape_cast %127 : vector<1x64x768xbf16> to vector<64x768xbf16>
    %cst_97 = arith.constant dense<0.000000e+00> : vector<8x768xf32>
    %129 = tpu.matmul %126, %128, %cst_97 {dimension_numbers = #tpu.dot_dimension_numbers<[1], [0], [0], [1], [0, 0, 1, 1], [], []>} : vector<8x64xbf16>, vector<64x768xbf16>, vector<8x768xf32> -> vector<8x768xf32>
    %130 = arith.addf %116, %129 : vector<8x768xf32>
    %c0_98 = arith.constant 0 : index
    %c2304 = arith.constant 2304 : index
    %131 = vector.load %arg1[%c0_98, %c2304] : memref<8x3072xbf16, #tpu.memory_space<vmem>>, vector<8x256xbf16>
    %c9 = arith.constant 9 : index
    %c0_99 = arith.constant 0 : index
    %c0_100 = arith.constant 0 : index
    %132 = vector.load %arg2[%c9, %c0_99, %c0_100] : memref<12x256x64xbf16, #tpu.memory_space<vmem>>, vector<1x256x64xbf16>
    %133 = vector.shape_cast %132 : vector<1x256x64xbf16> to vector<256x64xbf16>
    %cst_101 = arith.constant dense<0.000000e+00> : vector<8x64xf32>
    %134 = tpu.matmul %131, %133, %cst_101 {dimension_numbers = #tpu.dot_dimension_numbers<[1], [0], [0], [1], [0, 0, 1, 1], [], []>} : vector<8x256xbf16>, vector<256x64xbf16>, vector<8x64xf32> -> vector<8x64xf32>
    %cst_102 = arith.constant 0.000000e+00 : f32
    %135 = vector.broadcast %cst_102 : f32 to vector<8x64xf32>
    %136 = arith.cmpf ogt, %134, %135 : vector<8x64xf32>
    %cst_103 = arith.constant 0.00999999977 : f32
    %137 = vector.broadcast %cst_103 : f32 to vector<8x64xf32>
    %138 = arith.mulf %137, %134 : vector<8x64xf32>
    %139 = arith.select %136, %134, %138 : vector<8x64xi1>, vector<8x64xf32>
    %140 = arith.truncf %139 : vector<8x64xf32> to vector<8x64xbf16>
    %c9_104 = arith.constant 9 : index
    %c0_105 = arith.constant 0 : index
    %c0_106 = arith.constant 0 : index
    %141 = vector.load %arg3[%c9_104, %c0_105, %c0_106] : memref<12x64x768xbf16, #tpu.memory_space<vmem>>, vector<1x64x768xbf16>
    %142 = vector.shape_cast %141 : vector<1x64x768xbf16> to vector<64x768xbf16>
    %cst_107 = arith.constant dense<0.000000e+00> : vector<8x768xf32>
    %143 = tpu.matmul %140, %142, %cst_107 {dimension_numbers = #tpu.dot_dimension_numbers<[1], [0], [0], [1], [0, 0, 1, 1], [], []>} : vector<8x64xbf16>, vector<64x768xbf16>, vector<8x768xf32> -> vector<8x768xf32>
    %144 = arith.addf %130, %143 : vector<8x768xf32>
    %c0_108 = arith.constant 0 : index
    %c2560 = arith.constant 2560 : index
    %145 = vector.load %arg1[%c0_108, %c2560] : memref<8x3072xbf16, #tpu.memory_space<vmem>>, vector<8x256xbf16>
    %c10 = arith.constant 10 : index
    %c0_109 = arith.constant 0 : index
    %c0_110 = arith.constant 0 : index
    %146 = vector.load %arg2[%c10, %c0_109, %c0_110] : memref<12x256x64xbf16, #tpu.memory_space<vmem>>, vector<1x256x64xbf16>
    %147 = vector.shape_cast %146 : vector<1x256x64xbf16> to vector<256x64xbf16>
    %cst_111 = arith.constant dense<0.000000e+00> : vector<8x64xf32>
    %148 = tpu.matmul %145, %147, %cst_111 {dimension_numbers = #tpu.dot_dimension_numbers<[1], [0], [0], [1], [0, 0, 1, 1], [], []>} : vector<8x256xbf16>, vector<256x64xbf16>, vector<8x64xf32> -> vector<8x64xf32>
    %cst_112 = arith.constant 0.000000e+00 : f32
    %149 = vector.broadcast %cst_112 : f32 to vector<8x64xf32>
    %150 = arith.cmpf ogt, %148, %149 : vector<8x64xf32>
    %cst_113 = arith.constant 0.00999999977 : f32
    %151 = vector.broadcast %cst_113 : f32 to vector<8x64xf32>
    %152 = arith.mulf %151, %148 : vector<8x64xf32>
    %153 = arith.select %150, %148, %152 : vector<8x64xi1>, vector<8x64xf32>
    %154 = arith.truncf %153 : vector<8x64xf32> to vector<8x64xbf16>
    %c10_114 = arith.constant 10 : index
    %c0_115 = arith.constant 0 : index
    %c0_116 = arith.constant 0 : index
    %155 = vector.load %arg3[%c10_114, %c0_115, %c0_116] : memref<12x64x768xbf16, #tpu.memory_space<vmem>>, vector<1x64x768xbf16>
    %156 = vector.shape_cast %155 : vector<1x64x768xbf16> to vector<64x768xbf16>
    %cst_117 = arith.constant dense<0.000000e+00> : vector<8x768xf32>
    %157 = tpu.matmul %154, %156, %cst_117 {dimension_numbers = #tpu.dot_dimension_numbers<[1], [0], [0], [1], [0, 0, 1, 1], [], []>} : vector<8x64xbf16>, vector<64x768xbf16>, vector<8x768xf32> -> vector<8x768xf32>
    %158 = arith.addf %144, %157 : vector<8x768xf32>
    %c0_118 = arith.constant 0 : index
    %c2816 = arith.constant 2816 : index
    %159 = vector.load %arg1[%c0_118, %c2816] : memref<8x3072xbf16, #tpu.memory_space<vmem>>, vector<8x256xbf16>
    %c11 = arith.constant 11 : index
    %c0_119 = arith.constant 0 : index
    %c0_120 = arith.constant 0 : index
    %160 = vector.load %arg2[%c11, %c0_119, %c0_120] : memref<12x256x64xbf16, #tpu.memory_space<vmem>>, vector<1x256x64xbf16>
    %161 = vector.shape_cast %160 : vector<1x256x64xbf16> to vector<256x64xbf16>
    %cst_121 = arith.constant dense<0.000000e+00> : vector<8x64xf32>
    %162 = tpu.matmul %159, %161, %cst_121 {dimension_numbers = #tpu.dot_dimension_numbers<[1], [0], [0], [1], [0, 0, 1, 1], [], []>} : vector<8x256xbf16>, vector<256x64xbf16>, vector<8x64xf32> -> vector<8x64xf32>
    %cst_122 = arith.constant 0.000000e+00 : f32
    %163 = vector.broadcast %cst_122 : f32 to vector<8x64xf32>
    %164 = arith.cmpf ogt, %162, %163 : vector<8x64xf32>
    %cst_123 = arith.constant 0.00999999977 : f32
    %165 = vector.broadcast %cst_123 : f32 to vector<8x64xf32>
    %166 = arith.mulf %165, %162 : vector<8x64xf32>
    %167 = arith.select %164, %162, %166 : vector<8x64xi1>, vector<8x64xf32>
    %168 = arith.truncf %167 : vector<8x64xf32> to vector<8x64xbf16>
    %c11_124 = arith.constant 11 : index
    %c0_125 = arith.constant 0 : index
    %c0_126 = arith.constant 0 : index
    %169 = vector.load %arg3[%c11_124, %c0_125, %c0_126] : memref<12x64x768xbf16, #tpu.memory_space<vmem>>, vector<1x64x768xbf16>
    %170 = vector.shape_cast %169 : vector<1x64x768xbf16> to vector<64x768xbf16>
    %cst_127 = arith.constant dense<0.000000e+00> : vector<8x768xf32>
    %171 = tpu.matmul %168, %170, %cst_127 {dimension_numbers = #tpu.dot_dimension_numbers<[1], [0], [0], [1], [0, 0, 1, 1], [], []>} : vector<8x64xbf16>, vector<64x768xbf16>, vector<8x768xf32> -> vector<8x768xf32>
    %172 = arith.addf %158, %171 : vector<8x768xf32>
    %173 = vector.broadcast %0 : vector<1x768xf32> to vector<8x768xf32>
    %174 = arith.addf %172, %173 : vector<8x768xf32>
    %cst_128 = arith.constant 0.000000e+00 : f32
    %175 = vector.broadcast %cst_128 : f32 to vector<8x768xf32>
    %176 = arith.cmpf ogt, %174, %175 : vector<8x768xf32>
    %cst_129 = arith.constant 0.00999999977 : f32
    %177 = vector.broadcast %cst_129 : f32 to vector<8x768xf32>
    %178 = arith.mulf %177, %174 : vector<8x768xf32>
    %179 = arith.select %176, %174, %178 : vector<8x768xi1>, vector<8x768xf32>
    %180 = arith.truncf %179 : vector<8x768xf32> to vector<8x768xbf16>
    %c0_130 = arith.constant 0 : index
    %c0_131 = arith.constant 0 : index
    %181 = vector.load %arg4[%c0_130, %c0_131] : memref<768x384xbf16, #tpu.memory_space<vmem>>, vector<768x384xbf16>
    %cst_132 = arith.constant dense<0.000000e+00> : vector<8x384xf32>
    %182 = tpu.matmul %180, %181, %cst_132 {dimension_numbers = #tpu.dot_dimension_numbers<[1], [0], [0], [1], [0, 0, 1, 1], [], []>} : vector<8x768xbf16>, vector<768x384xbf16>, vector<8x384xf32> -> vector<8x384xf32>
    %183 = vector.broadcast %1 : vector<1x384xf32> to vector<8x384xf32>
    %184 = arith.addf %182, %183 : vector<8x384xf32>
    %cst_133 = arith.constant 0.000000e+00 : f32
    %185 = vector.broadcast %cst_133 : f32 to vector<8x384xf32>
    %186 = arith.cmpf ogt, %184, %185 : vector<8x384xf32>
    %cst_134 = arith.constant 0.00999999977 : f32
    %187 = vector.broadcast %cst_134 : f32 to vector<8x384xf32>
    %188 = arith.mulf %187, %184 : vector<8x384xf32>
    %189 = arith.select %186, %184, %188 : vector<8x384xi1>, vector<8x384xf32>
    %190 = arith.truncf %189 : vector<8x384xf32> to vector<8x384xbf16>
    %c0_135 = arith.constant 0 : index
    %c0_136 = arith.constant 0 : index
    %191 = vector.load %arg5[%c0_135, %c0_136] : memref<384x384xbf16, #tpu.memory_space<vmem>>, vector<384x384xbf16>
    %cst_137 = arith.constant dense<0.000000e+00> : vector<8x384xf32>
    %192 = tpu.matmul %190, %191, %cst_137 {dimension_numbers = #tpu.dot_dimension_numbers<[1], [0], [0], [1], [0, 0, 1, 1], [], []>} : vector<8x384xbf16>, vector<384x384xbf16>, vector<8x384xf32> -> vector<8x384xf32>
    %193 = vector.broadcast %2 : vector<1x384xf32> to vector<8x384xf32>
    %194 = arith.addf %192, %193 : vector<8x384xf32>
    %cst_138 = arith.constant 0.000000e+00 : f32
    %195 = vector.broadcast %cst_138 : f32 to vector<8x384xf32>
    %196 = arith.cmpf ogt, %194, %195 : vector<8x384xf32>
    %cst_139 = arith.constant 0.00999999977 : f32
    %197 = vector.broadcast %cst_139 : f32 to vector<8x384xf32>
    %198 = arith.mulf %197, %194 : vector<8x384xf32>
    %199 = arith.select %196, %194, %198 : vector<8x384xi1>, vector<8x384xf32>
    %200 = arith.truncf %199 : vector<8x384xf32> to vector<8x384xbf16>
    %c0_140 = arith.constant 0 : index
    %c0_141 = arith.constant 0 : index
    %201 = vector.load %arg6[%c0_140, %c0_141] : memref<384x128xbf16, #tpu.memory_space<vmem>>, vector<384x128xbf16>
    %cst_142 = arith.constant dense<0.000000e+00> : vector<8x128xf32>
    %202 = tpu.matmul %200, %201, %cst_142 {dimension_numbers = #tpu.dot_dimension_numbers<[1], [0], [0], [1], [0, 0, 1, 1], [], []>} : vector<8x384xbf16>, vector<384x128xbf16>, vector<8x128xf32> -> vector<8x128xf32>
    %203 = vector.broadcast %3 : vector<1x128xf32> to vector<8x128xf32>
    %204 = arith.addf %202, %203 : vector<8x128xf32>
    %c0_143 = arith.constant 0 : index
    %c0_144 = arith.constant 0 : index
    %205 = vector.load %arg8[%c0_143, %c0_144] : memref<8x128xf32, #tpu.memory_space<vmem>>, vector<8x128xf32>
    tpu.vector_store %arg8[%c0_143, %c0_144], %204 {strides = array<i32>} : memref<8x128xf32, #tpu.memory_space<vmem>>, vector<8x128xf32>,
    return
  }
  func.func @transform_0(%arg0: i32) -> (i32, i32) {
    %c0_i32 = arith.constant 0 : i32
    %c0_i32_0 = arith.constant 0 : i32
    return %arg0, %c0_i32 : i32, i32
  }
  func.func @transform_1(%arg0: i32) -> (i32, i32, i32) {
    %c0_i32 = arith.constant 0 : i32
    %c0_i32_0 = arith.constant 0 : i32
    %c0_i32_1 = arith.constant 0 : i32
    %c0_i32_2 = arith.constant 0 : i32
    return %c0_i32, %c0_i32_0, %c0_i32_1 : i32, i32, i32
  }
  func.func @transform_2(%arg0: i32) -> (i32, i32, i32) {
    %c0_i32 = arith.constant 0 : i32
    %c0_i32_0 = arith.constant 0 : i32
    %c0_i32_1 = arith.constant 0 : i32
    %c0_i32_2 = arith.constant 0 : i32
    return %c0_i32, %c0_i32_0, %c0_i32_1 : i32, i32, i32
  }
  func.func @transform_3(%arg0: i32) -> (i32, i32) {
    %c0_i32 = arith.constant 0 : i32
    %c0_i32_0 = arith.constant 0 : i32
    %c0_i32_1 = arith.constant 0 : i32
    return %c0_i32, %c0_i32_0 : i32, i32
  }
  func.func @transform_4(%arg0: i32) -> (i32, i32) {
    %c0_i32 = arith.constant 0 : i32
    %c0_i32_0 = arith.constant 0 : i32
    %c0_i32_1 = arith.constant 0 : i32
    return %c0_i32, %c0_i32_0 : i32, i32
  }
  func.func @transform_5(%arg0: i32) -> (i32, i32) {
    %c0_i32 = arith.constant 0 : i32
    %c0_i32_0 = arith.constant 0 : i32
    %c0_i32_1 = arith.constant 0 : i32
    return %c0_i32, %c0_i32_0 : i32, i32
  }
  func.func @transform_6(%arg0: i32) -> (i32, i32) {
    %c0_i32 = arith.constant 0 : i32
    %c0_i32_0 = arith.constant 0 : i32
    %c0_i32_1 = arith.constant 0 : i32
    return %c0_i32, %c0_i32_0 : i32, i32
  }
  func.func @transform_7(%arg0: i32) -> (i32, i32) {
    %c0_i32 = arith.constant 0 : i32
    %c0_i32_0 = arith.constant 0 : i32
    return %arg0, %c0_i32 : i32, i32
  }
}

</mosaic_0001>

<bundles_post_ra>
// kernel: bb_model_forward.1
= control target key start
LH: loop header
LB: loop body
LE: loop exit
PB: predicated region body
PF: predicated region fallthrough
CT: control target
= control target key end

     0   :  { %12 = vsyncpa [#allocation3], 0  ;;  %s13364_s0 = inlined_call_operand.vmem [shape: bf16[16,3072], index: 0, kind: input, shape index: {}]   ;;  %s13365_s1 = inlined_call_operand.vmem [shape: bf16[12,256,64], index: 1, kind: input, shape index: {}]   ;;  %s13366_s2 = inlined_call_operand.vmem [shape: bf16[12,64,768], index: 2, kind: input, shape index: {}]   ;;  %s13367_s3 = inlined_call_operand.vmem [shape: bf16[768,384], index: 3, kind: input, shape index: {}]   ;;  %s13368_s4 = inlined_call_operand.hbm [shape: bf16[384,384], index: 4, kind: input, shape index: {}]   ;;  %s13369_s5 = inlined_call_operand.hbm [shape: bf16[384,128], index: 5, kind: input, shape index: {}]   ;;  %s13370_s6 = inlined_call_operand.vmem [shape: f32[1,1664], index: 6, kind: input, shape index: {}]   ;;  %s13371_s7 = inlined_call_operand.vmem [shape: f32[16,128], index: 7, kind: output, shape index: {}]  }
   0x1   :  { %13 = vsyncpa [#allocation5], 0  ;;  %s11067_s24 = smov 0  }
   0x2 LB: > { %s11018_s25 = smov [#allocation2]   ;;  %s11073_s27 = sadd.s32 4294967295, %s11016_s24   ;;  %s11016_s24 = sphi %s11067_s24, %s19_s24  }
   0x3   : > { %s223_s26 = sshll.u32 %s11018_s25, 4  ;;  %p8113_p0 = scmp.ge.s32.totalorder %s11016_s24, 1  ;;  %s224_s26 = int_to_ptr.vmem [resolvable:$true] %s223_s26 }
   0x4   : > { %p202_p1 = scmp.lt.s32.totalorder %s11016_s24, 3  ;;  %p9969_p3 = scmp.eq.s32.totalorder %s11073_s27, 0 }
   0x5   : > { %s11019_s29 = smov [#allocation4]   ;;  %s10961_s9 = scalar_lea.vmem %s224_s26, 9216 }
   0x6   : > { %p11077_p2 = pnand %p8113_p0, %p202_p1  ;;  %s236_s30 = sshll.u32 %s11019_s29, 4  ;;  %s237_s30 = int_to_ptr.vmem [resolvable:$true] %s236_s30 }
   0x7   : > { %p10962_p7 = scmp.ne.s32.totalorder %s224_s26, %s10961_s9  ;;  %p10969_p10 = scmp.lt.s32.totalorder %s224_s26, %s224_s26 }
   0x8   : > { %p9962_p4 = pneg %p11077_p2  ;;  %p10970_p11 = scmp.lt.s32.totalorder %s10961_s9, %s10961_s9 }
   0xa   : > { %p11086_p5 = pnand %p9969_p3, %p9962_p4  ;;  %p10971_p12 = por %p10970_p11, %p10969_p10 }
   0xc   : > { %p10952_p6 = pneg %p11086_p5 }
   0xe   : > { %p10964_p8 = pnand %p10962_p7, %p10952_p6 }
  0x10   : > { %p10965_p9 = pneg %p10964_p8 }
  0x12   : > { %p10972_p13 = pnand %p10971_p12, %p10965_p9 }
  0x14   : > { %10975 = shalt.err (!%p10972_p13)
}
  0x15   : > { %s11020_s10 = smov 192   ;;  %s11021_s11 = smov 12  }
  0x16   : > { %9965 = dma.hbm_to_vmem [thread:$0]  (!%p11086_p5), %s13368_s4, 9216, %s224_s26, [#allocation3], %s11020_s10, %s11020_s10, %s11021_s11  }
  0x17   : > { %s10987_s14 = scalar_lea.vmem %s237_s30, 3072  ;;  %p10995_p7 = scmp.lt.s32.totalorder %s237_s30, %s237_s30 }
  0x18   : > { %p10988_p0 = scmp.ne.s32.totalorder %s237_s30, %s10987_s14  ;;  %p10996_p8 = scmp.lt.s32.totalorder %s10987_s14, %s10987_s14 }
  0x1a   : > { %p10990_p1 = pnand %p10988_p0, %p10952_p6  ;;  %p10997_p10 = por %p10996_p8, %p10995_p7 }
  0x1c   : > { %p10991_p4 = pneg %p10990_p1 }
  0x1e   : > { %p10998_p9 = pnand %p10997_p10, %p10991_p4 }
  0x20   : > { %11001 = shalt.err (!%p10998_p9)
}
  0x21   : > { %s11022_s15 = smov 64   ;;  %s11023_s16 = smov 4  }
  0x22   : > { %9968 = dma.hbm_to_vmem [thread:$0]  (!%p11086_p5), %s13369_s5, 3072, %s237_s30, [#allocation5], %s11022_s15, %s11022_s15, %s11023_s16  }
  0x23   : > { %263 = sbr.rel (%p11077_p2) target bundleno = 3737 (0xe99), region = 48 }
  0x28   : > { %11007 = dma.done.wait (%p9969_p3), [#allocation3], 9216  }
  0x29   : > { %11009 = vsyncadd (%p9969_p3), [#allocation3], 4294958080 }
  0x2a   : > { %11011 = dma.done.wait (%p9969_p3), [#allocation5], 3072  }
  0x2b   : > { %11013 = vsyncadd (%p9969_p3), [#allocation5], 4294964224  ;;  %v9990_v0 = vld [vmem:[%s13365_s1 + $0xf8] sm:$0xff]   ;;  %v9992_v2 = vld [vmem:[%s13365_s1 + $0xf0] sm:$0xff]   ;;  %p298_p2 = scmp.lt.s32.totalorder %s11073_s27, 1  ;;  %v11024_v56 = vmov 0  }
  0x2c   : > { %v9991_v1 = vld [vmem:[%s13365_s1 + $0xb8] sm:$0xff]   ;;  %9543 = vmatprep.subr.bf16.mxu1 %v9990_v0  ;;  %v9993_v3 = vld [vmem:[%s13365_s1 + $0xb0] sm:$0xff]   ;;  %v9994_v4 = vld [vmem:[%s13365_s1 + $0xe8] sm:$0xff]   ;;  %vm842_vm1 = vcmask 523264  }
  0x2d   : > { %9544 = vmatpush3.bf16.msra.mxu1 %v9991_v1  ;;  %v9995_v5 = vld [vmem:[%s13365_s1 + $0xa8] sm:$0xff]   ;;  %v9996_v6 = vld [vmem:[%s13365_s1 + $0xe0] sm:$0xff]   ;;  %v9998_v7 = vld [vmem:[%s13365_s1 + $0x78] sm:$0xff]   ;;  %s13375_s27 = smov (!%p298_p2, %s11073_s27), 1 }
  0x2e   : > { %9545 = vmatprep.subr.bf16.mxu1 %v9992_v2  ;;  %v9999_v8 = vld [vmem:[%s13365_s1 + $0x38] sm:$0xff]   ;;  %v9997_v9 = vld [vmem:[%s13365_s1 + $0xa0] sm:$0xff]   ;;  %9521 = vmatprep.subr.bf16.mxu0 %v9998_v7  ;;  %v10002_v11 = vld [vmem:[%s13365_s1 + $0x70] sm:$0xff]   ;;  %s9953_s13 = smul.u32 96, %s13375_s27  ;;  %s8121_s18 = sshll.u32 %s13375_s27, 3 }
  0x2f   : > { %9522 = vmatpush3.bf16.msra.mxu0 %v9999_v8  ;;  %v10000_v10 = vld [vmem:[%s13365_s1 + $0xd8] sm:$0xff]   ;;  %v10003_v12 = vld [vmem:[%s13365_s1 + $0x30] sm:$0xff]   ;;  %v10006_v15 = vld [vmem:[%s13365_s1 + $0x68] sm:$0xff]   ;;  %s306_s21 = scalar_lea.vmem %s13371_s7, %s8121_s18 }
  0x30   : > { %v10001_v13 = vld [vmem:[%s13365_s1 + $0x98] sm:$0xff]   ;;  %9523 = vmatprep.subr.bf16.mxu0 %v10002_v11  ;;  %v10004_v14 = vld [vmem:[%s13365_s1 + $0xd0] sm:$0xff]   ;;  %v10007_v16 = vld [vmem:[%s13365_s1 + $0x28] sm:$0xff]   ;;  %s11192_s25 = scalar_lea.vmem %s13364_s0, %s9953_s13 }
  0x31   : > { %9546 = vmatpush3.bf16.msra.mxu1 %v9993_v3  ;;  %v10005_v17 = vld [vmem:[%s13365_s1 + $0x90] sm:$0xff]   ;;  %v10008_v18 = vld [vmem:[%s13365_s1 + $0xc8] sm:$0xff]   ;;  %v10010_v19 = vld [vmem:[%s13365_s1 + $0x60] sm:$0xff]  }
  0x32   : > { %9547 = vmatprep.subr.bf16.mxu1 %v9994_v4  ;;  %v10011_v20 = vld [vmem:[%s13365_s1 + $0x20] sm:$0xff]   ;;  %v10009_v21 = vld [vmem:[%s13365_s1 + $0x88] sm:$0xff]   ;;  %v10014_v23 = vld [vmem:[%s13365_s1 + $0x58] sm:$0xff]  }
  0x33   : > { %9524 = vmatpush3.bf16.msra.mxu0 %v10003_v12  ;;  %v10012_v22 = vld [vmem:[%s13365_s1 + $0xc0] sm:$0xff]   ;;  %v516_v25 = vld [vmem:[%s11192_s25 + $0x8] sm:$0xff]  ;;  %v10017_v27 = vld [vmem:[%s13365_s1 + $0x18] sm:$0xff]  }
  0x34   : > { %9525 = vmatprep.subr.bf16.mxu0 %v10006_v15  ;;  %v10013_v24 = vld [vmem:[%s13365_s1 + $0x80] sm:$0xff]   ;;  %v8173_v26 = vcombine.high %v516_v25, %v516_v25  ;;  %v10018_v28 = vld [vmem:[%s13365_s1 + $0x50] sm:$0xff]   ;;  %v8172_v30 = vcombine.low %v516_v25, %v516_v25  ;;  %v10020_v31 = vld [vmem:[%s13365_s1 + $0x48] sm:$0xff]  }
  0x35   : > { %9548 = vmatpush3.bf16.msra.mxu1 %v9995_v5  ;;  %v10019_v29 = vld [vmem:[%s13365_s1 + $0x10] sm:$0xff]   ;;  %v312_v32 = vld [vmem:[%s11192_s25] sm:$0xff]  ;;  %v10021_v33 = vld [vmem:[%s13365_s1 + $0x8] sm:$0xff]  }
  0x36   : > { %9549 = vmatprep.subr.bf16.mxu1 %v9996_v6  ;;  %685 = vmatprep.mubr.bf16.mxu1 %v8173_v26  ;;  %v10022_v34 = vld [vmem:[%s13365_s1 + $0x40] sm:$0xff]   ;;  %v8123_v35 = vcombine.high %v312_v32, %v312_v32  ;;  %v10029_v36 = vld [vmem:[%s13366_s2 + $0x158] ss:$24 sps:$4 sm:$0xff]   ;;  %v10031_v37 = vld [vmem:[%s13366_s2 + $0x15c] ss:$24 sps:$4 sm:$0xff]   ;;  %v8122_v43 = vcombine.low %v312_v32, %v312_v32 }
  0x37   : > { %9526 = vmatpush3.bf16.msra.mxu0 %v10007_v16  ;;  %v10023_v38 = vld [vmem:[%s13365_s1] sm:$0xff]   ;;  %v10028_v39 = vld [vmem:[%s13366_s2 + $0x154] ss:$24 sps:$4 sm:$0xff]   ;;  %v10026_v42 = vld [vmem:[%s13366_s2 + $0x150] ss:$24 sps:$4 sm:$0xff]  }
  0x38   : > { %9527 = vmatprep.subr.bf16.mxu0 %v10010_v19  ;;  %480 = vmatprep.mubr.bf16.mxu0 %v8123_v35  ;;  %v10035_v40 = vld [vmem:[%s13366_s2 + $0x128] ss:$24 sps:$4 sm:$0xff]   ;;  %v10037_v41 = vld [vmem:[%s13366_s2 + $0x12c] ss:$24 sps:$4 sm:$0xff]   ;;  %v10043_v47 = vld [vmem:[%s13366_s2 + $0xfc] ss:$24 sps:$4 sm:$0xff]  }
  0x39   : > { %9550 = vmatpush3.bf16.msra.mxu1 %v9997_v9  ;;  %v10034_v44 = vld [vmem:[%s13366_s2 + $0x124] ss:$24 sps:$4 sm:$0xff]   ;;  %v10032_v45 = vld [vmem:[%s13366_s2 + $0x120] ss:$24 sps:$4 sm:$0xff]   ;;  %v10040_v46 = vld [vmem:[%s13366_s2 + $0xf4] ss:$24 sps:$4 sm:$0xff]  }
  0x3a   : > { %9551 = vmatprep.subr.bf16.mxu1 %v10000_v10  ;;  %v10038_v48 = vld [vmem:[%s13366_s2 + $0xf0] ss:$24 sps:$4 sm:$0xff]   ;;  %v10046_v50 = vld [vmem:[%s13366_s2 + $0xc4] ss:$24 sps:$4 sm:$0xff]   ;;  %v10044_v52 = vld [vmem:[%s13366_s2 + $0xc0] ss:$24 sps:$4 sm:$0xff]  }
  0x3b   : > { %9528 = vmatpush3.bf16.msra.mxu0 %v10011_v20  ;;  %v10041_v49 = vld [vmem:[%s13366_s2 + $0xf8] ss:$24 sps:$4 sm:$0xff]   ;;  %v10049_v51 = vld [vmem:[%s13366_s2 + $0xcc] ss:$24 sps:$4 sm:$0xff]   ;;  %v10047_v53 = vld [vmem:[%s13366_s2 + $0xc8] ss:$24 sps:$4 sm:$0xff]  }
  0x3c   : > { %9529 = vmatprep.subr.bf16.mxu0 %v10014_v23  ;;  %v10052_v54 = vld [vmem:[%s13366_s2 + $0x164] ss:$24 sps:$4 sm:$0xff]   ;;  %v10055_v55 = vld [vmem:[%s13366_s2 + $0x94] ss:$24 sps:$4 sm:$0xff]   ;;  %v10050_v62 = vld [vmem:[%s13366_s2 + $0x160] ss:$24 sps:$4 sm:$0xff]  }
  0x3d   : > { %9552 = vmatpush3.bf16.msra.mxu1 %v10001_v13  ;;  %v10053_v63 = vld [vmem:[%s13366_s2 + $0x90] ss:$24 sps:$4 sm:$0xff]   ;;  %v10058_v1 = vld [vmem:[%s13366_s2 + $0x134] ss:$24 sps:$4 sm:$0xff]   ;;  %v10061_v2 = vld [vmem:[%s13366_s2 + $0x64] ss:$24 sps:$4 sm:$0xff]  }
  0x3e   : > { %9553 = vmatprep.subr.bf16.mxu1 %v10004_v14  ;;  %v10056_v5 = vld [vmem:[%s13366_s2 + $0x130] ss:$24 sps:$4 sm:$0xff]   ;;  %v10059_v6 = vld [vmem:[%s13366_s2 + $0x60] ss:$24 sps:$4 sm:$0xff]   ;;  %v10064_v8 = vld [vmem:[%s13366_s2 + $0x104] ss:$24 sps:$4 sm:$0xff]  }
  0x3f   : > { %9530 = vmatpush3.bf16.msra.mxu0 %v10017_v27  ;;  %v10067_v9 = vld [vmem:[%s13366_s2 + $0x34] ss:$24 sps:$4 sm:$0xff]   ;;  %v10062_v12 = vld [vmem:[%s13366_s2 + $0x100] ss:$24 sps:$4 sm:$0xff]   ;;  %v10065_v13 = vld [vmem:[%s13366_s2 + $0x30] ss:$24 sps:$4 sm:$0xff]  }
  0x40   : > { %9531 = vmatprep.subr.bf16.mxu0 %v10018_v28  ;;  %v10070_v14 = vld [vmem:[%s13366_s2 + $0xd4] ss:$24 sps:$4 sm:$0xff]   ;;  %v10073_v15 = vld [vmem:[%s13366_s2 + $0x4] ss:$24 sps:$4 sm:$0xff]   ;;  %v10068_v19 = vld [vmem:[%s13366_s2 + $0xd0] ss:$24 sps:$4 sm:$0xff]  }
  0x41   : > { %9554 = vmatpush3.bf16.msra.mxu1 %v10005_v17  ;;  %v10071_v20 = vld [vmem:[%s13366_s2] ss:$24 sps:$4 sm:$0xff]   ;;  %v10082_v27 = vld [vmem:[%s13366_s2 + $0x6c] ss:$24 sps:$4 sm:$0xff]  }
  0x42   : > { %9555 = vmatprep.subr.bf16.mxu1 %v10008_v18  ;;  %v10077_v25 = vld [vmem:[%s13366_s2 + $0xa0] ss:$24 sps:$4 sm:$0xff]   ;;  %v10085_v28 = vld [vmem:[%s13366_s2 + $0x74] ss:$24 sps:$4 sm:$0xff]   ;;  %v10091_v32 = vld [vmem:[%s13366_s2 + $0x44] ss:$24 sps:$4 sm:$0xff]  }
  0x43   : > { %9532 = vmatpush3.bf16.msra.mxu0 %v10019_v29  ;;  %v10080_v29 = vld [vmem:[%s13366_s2 + $0x68] ss:$24 sps:$4 sm:$0xff]   ;;  %v10094_v35 = vld [vmem:[%s13366_s2 + $0xc] ss:$24 sps:$4 sm:$0xff]  }
  0x44   : > { %9533 = vmatprep.subr.bf16.mxu0 %v10020_v31  ;;  %v10088_v31 = vld [vmem:[%s13366_s2 + $0x3c] ss:$24 sps:$4 sm:$0xff]  }
  0x45   : > { %9556 = vmatpush3.bf16.msra.mxu1 %v10009_v21  ;;  %v10076_v21 = vld [vmem:[%s13366_s2 + $0x9c] ss:$24 sps:$4 sm:$0xff]  }
  0x46   : > { %9557 = vmatprep.subr.bf16.mxu1 %v10012_v22  ;;  %v10079_v22 = vld [vmem:[%s13366_s2 + $0xa4] ss:$24 sps:$4 sm:$0xff]  }
  0x47   : > { %9534 = vmatpush3.bf16.msra.mxu0 %v10021_v33  ;;  %v10086_v33 = vld [vmem:[%s13366_s2 + $0x38] ss:$24 sps:$4 sm:$0xff]  }
  0x48   : > { %9535 = vmatprep.subr.bf16.mxu0 %v10022_v34  ;;  %v10089_v34 = vld [vmem:[%s13366_s2 + $0x40] ss:$24 sps:$4 sm:$0xff]  }
  0x49   : > { %9558 = vmatpush3.bf16.msra.mxu1 %v10013_v24  ;;  %v10074_v24 = vld [vmem:[%s13366_s2 + $0x98] ss:$24 sps:$4 sm:$0xff]  }
  0x4a   : > { %895 = vmatprep.subr.bf16.mxu1 %v10031_v37  ;;  %v10092_v37 = vld [vmem:[%s13366_s2 + $0x8] ss:$24 sps:$4 sm:$0xff]  }
  0x4b   : > { %9536 = vmatpush3.bf16.msra.mxu0 %v10023_v38  ;;  %v10095_v38 = vld [vmem:[%s13366_s2 + $0x10] ss:$24 sps:$4 sm:$0xff]  }
  0x4c   : > { %686 = vmatmul.mubr.bf16.vlgmr.msra.gmra.mxu1 %v8172_v30  ;;  %854 = vmatprep.subr.bf16.mxu0 %v10028_v39  ;;  %v10083_v30 = vld [vmem:[%s13366_s2 + $0x70] ss:$24 sps:$4 sm:$0xff]   ;;  %v10098_v39 = vld [vmem:[%s13365_s1 + $0x178] sm:$0xff]  }
  0x4d   : > { %896 = vmatpush1.bf16.msra.mxu1 %v10029_v36  ;;  %919 = vmatprep.mubr.bf16.mxu1 %v11024_v56  ;;  %v10097_v36 = vld [vmem:[%s13366_s2 + $0x14] ss:$24 sps:$4 sm:$0xff]  }
  0x4e   : > { %897 = vmatprep.subr.bf16.mxu1 %v10037_v41  ;;  %481 = vmatmul.mubr.bf16.vlgmr.msra.gmra.mxu0 %v8122_v43  ;;  %v10099_v41 = vld [vmem:[%s13365_s1 + $0x138] sm:$0xff]  }
  0x4f   : > { %855 = vmatpush1.bf16.msra.mxu0 %v10026_v42  ;;  %878 = vmatprep.mubr.bf16.mxu0 %v11024_v56  ;;  %v10100_v42 = vld [vmem:[%s13365_s1 + $0x170] sm:$0xff]  }
  0x50   : > { %856 = vmatprep.subr.bf16.mxu0 %v10034_v44  ;;  %v10101_v44 = vld [vmem:[%s13365_s1 + $0x130] sm:$0xff]  }
  0x51   : > { %898 = vmatpush1.bf16.msra.mxu1 %v10035_v40  ;;  %v1215_v40 = vld [vmem:[%s11192_s25 + $0x10] sm:$0xff] }
  0x52   : > { %899 = vmatprep.subr.bf16.mxu1 %v10043_v47  ;;  %v8301_v43 = vcombine.high %v1215_v40, %v1215_v40  ;;  %v10104_v47 = vld [vmem:[%s13365_s1 + $0x160] sm:$0xff]  }
  0x53   : > { %857 = vmatpush1.bf16.msra.mxu0 %v10032_v45  ;;  %v10102_v45 = vld [vmem:[%s13365_s1 + $0x168] sm:$0xff]  }
  0x54   : > { %858 = vmatprep.subr.bf16.mxu0 %v10040_v46  ;;  %v10103_v46 = vld [vmem:[%s13365_s1 + $0x128] sm:$0xff]  }
  0x55   : > { %900 = vmatpush1.bf16.msra.mxu1 %v10041_v49  ;;  %v10106_v49 = vld [vmem:[%s13365_s1 + $0x158] sm:$0xff]  }
  0x56   : > { %901 = vmatprep.subr.bf16.mxu1 %v10049_v51  ;;  %v10108_v51 = vld [vmem:[%s13365_s1 + $0x150] sm:$0xff]  }
  0x57   : > { %859 = vmatpush1.bf16.msra.mxu0 %v10038_v48  ;;  %v10105_v48 = vld [vmem:[%s13365_s1 + $0x120] sm:$0xff]  }
  0x58   : > { %860 = vmatprep.subr.bf16.mxu0 %v10046_v50  ;;  %v10107_v50 = vld [vmem:[%s13365_s1 + $0x118] sm:$0xff]  }
  0x59   : > { %902 = vmatpush1.bf16.msra.mxu1 %v10047_v53  ;;  %v10110_v53 = vld [vmem:[%s13365_s1 + $0x148] sm:$0xff]  }
  0x5a   : > { %1100 = vmatprep.subr.bf16.mxu1 %v10055_v55  ;;  %v10112_v55 = vld [vmem:[%s13365_s1 + $0x140] sm:$0xff]  }
  0x5b   : > { %861 = vmatpush1.bf16.msra.mxu0 %v10044_v52  ;;  %v10109_v52 = vld [vmem:[%s13365_s1 + $0x110] sm:$0xff]  }
  0x5c   : > { %936 = vmatprep.subr.bf16.mxu0 %v10052_v54  ;;  %v10111_v54 = vld [vmem:[%s13365_s1 + $0x108] sm:$0xff]  }
 0x10c   : > { %v9559_v57 = vpop.f32.mrf.mxu1 }
 0x10e   : > { %v9560_v58 = vpop.f32.mrf.mxu1  ;;  %v9537_v7 = vpop.f32.mrf.mxu0 }
 0x10f   : > { %v9561_v59 = vadd.f32 %v9560_v58, %v9559_v57  ;;  %v10113_v57 = vld [vmem:[%s13365_s1 + $0x100] sm:$0xff]   ;;  %v8300_v58 = vcombine.low %v1215_v40, %v1215_v40 }
 0x110   : > { %v9562_v60 = vpop.f32.mrf.mxu1  ;;  %v9538_v10 = vpop.f32.mrf.mxu0 }
 0x111   : > { %vm693_vm0 = vcmp.gt.f32.partialorder %v9561_v59, 0.0  ;;  %v694_v61 = vmul.f32 0.01, %v9561_v59  ;;  %v9539_v11 = vadd.f32 %v9538_v10, %v9537_v7  ;;  %v10118_v60 = vld [vmem:[%s13366_s2 + $0x214] ss:$24 sps:$4 sm:$0xff]  }
 0x112   : > { %v9563_v0 = vpop.f32.mrf.mxu1  ;;  %v9540_v16 = vpop.f32.mrf.mxu0  ;;  %v10136_v7 = vld [vmem:[%s13366_s2 + $0x184] ss:$24 sps:$4 sm:$0xff]   ;;  %v10137_v10 = vld [vmem:[%s13366_s2 + $0x190] ss:$24 sps:$4 sm:$0xff]  }
 0x113   : > { %v695_v3 = vsel %vm693_vm0, %v9561_v59, %v694_v61  ;;  %vm488_vm2 = vcmp.gt.f32.partialorder %v9539_v11, 0.0  ;;  %v489_v17 = vmul.f32 0.01, %v9539_v11  ;;  %v10116_v59 = vld [vmem:[%s13366_s2 + $0x210] ss:$24 sps:$4 sm:$0xff]  }
 0x114   : > { %v696_v4 = vpack.c.bf16 %v695_v3, %v695_v3  ;;  %v9541_v18 = vpop.f32.mrf.mxu0  ;;  %v10119_v61 = vld [vmem:[%s13366_s2 + $0x220] ss:$24 sps:$4 sm:$0xff]   ;;  %v10124_v0 = vld [vmem:[%s13366_s2 + $0x1e4] ss:$24 sps:$4 sm:$0xff]   ;;  %v10130_v3 = vld [vmem:[%s13366_s2 + $0x1b4] ss:$24 sps:$4 sm:$0xff]  }
 0x115   : > { %v490_v23 = vsel %vm488_vm2, %v9539_v11, %v489_v17  ;;  %v10142_v11 = vld [vmem:[%s13366_s2 + $0x21c] ss:$24 sps:$4 sm:$0xff]  }
 0x116   : > { %8238 = vmatmul.mubr.msk.bf16.vlgmr.msra.gmra.mxu0 %vm842_vm1, %v696_v4  ;;  %8239 = vmatmul.mubr.msk.bf16.vlgmr.msra.gmra.mxu1 %vm842_vm1, %v696_v4  ;;  %v491_v26 = vpack.c.bf16 %v490_v23, %v490_v23 }
 0x117   : > { %937 = vmatpush1.bf16.msra.mxu0 %v10050_v62  ;;  %1101 = vmatpush1.bf16.msra.mxu1 %v10053_v63  ;;  %v10121_v62 = vld [vmem:[%s13366_s2 + $0x224] ss:$24 sps:$4 sm:$0xff]   ;;  %v10122_v63 = vld [vmem:[%s13366_s2 + $0x1e0] ss:$24 sps:$4 sm:$0xff]  }
 0x118   : > { %938 = vmatprep.subr.bf16.mxu0 %v10058_v1  ;;  %1102 = vmatprep.subr.bf16.mxu1 %v10061_v2  ;;  %v10125_v1 = vld [vmem:[%s13366_s2 + $0x1f0] ss:$24 sps:$4 sm:$0xff]   ;;  %v10127_v2 = vld [vmem:[%s13366_s2 + $0x1f4] ss:$24 sps:$4 sm:$0xff]  }
 0x119   : > { %960 = vmatprep.mubr.bf16.mxu0 %v11024_v56  ;;  %1124 = vmatprep.mubr.bf16.mxu1 %v11024_v56 }
 0x11b   : > { %939 = vmatpush1.bf16.msra.mxu0 %v10056_v5  ;;  %1103 = vmatpush1.bf16.msra.mxu1 %v10059_v6  ;;  %v10133_v5 = vld [vmem:[%s13366_s2 + $0x1c4] ss:$24 sps:$4 sm:$0xff]   ;;  %v10131_v6 = vld [vmem:[%s13366_s2 + $0x1c0] ss:$24 sps:$4 sm:$0xff]  }
 0x11c   : > { %940 = vmatprep.subr.bf16.mxu0 %v10064_v8  ;;  %1104 = vmatprep.subr.bf16.mxu1 %v10067_v9  ;;  %v10134_v8 = vld [vmem:[%s13366_s2 + $0x180] ss:$24 sps:$4 sm:$0xff]   ;;  %v10139_v9 = vld [vmem:[%s13366_s2 + $0x194] ss:$24 sps:$4 sm:$0xff]  }
 0x11f   : > { %941 = vmatpush1.bf16.msra.mxu0 %v10062_v12  ;;  %1105 = vmatpush1.bf16.msra.mxu1 %v10065_v13 }
 0x120   : > { %942 = vmatprep.subr.bf16.mxu0 %v10070_v14  ;;  %1106 = vmatprep.subr.bf16.mxu1 %v10073_v15 }
 0x123   : > { %943 = vmatpush1.bf16.msra.mxu0 %v10068_v19  ;;  %1107 = vmatpush1.bf16.msra.mxu1 %v10071_v20 }
 0x124   : > { %1141 = vmatprep.subr.bf16.mxu0 %v10076_v21  ;;  %1182 = vmatprep.subr.bf16.mxu1 %v10079_v22 }
 0x126   : > { %8240 = vmatmul.mubr.msk.bf16.vlgmr.msra.gmra.mxu0 %vm842_vm1, %v696_v4  ;;  %8265 = vmatmul.mubr.msk.bf16.vlgmr.msra.gmra.mxu1 %vm842_vm1, %v491_v26  ;;  %v10128_v4 = vld [vmem:[%s13366_s2 + $0x1b0] ss:$24 sps:$4 sm:$0xff]  }
 0x127   : > { %1142 = vmatpush1.bf16.msra.mxu0 %v10074_v24  ;;  %1183 = vmatpush1.bf16.msra.mxu1 %v10077_v25 }
 0x128   : > { %1143 = vmatprep.subr.bf16.mxu0 %v10082_v27  ;;  %1184 = vmatprep.subr.bf16.mxu1 %v10085_v28 }
 0x129   : > { %1165 = vmatprep.mubr.bf16.mxu0 %v11024_v56  ;;  %1206 = vmatprep.mubr.bf16.mxu1 %v11024_v56 }
 0x12b   : > { %1144 = vmatpush1.bf16.msra.mxu0 %v10080_v29  ;;  %1185 = vmatpush1.bf16.msra.mxu1 %v10083_v30 }
 0x12c   : > { %1145 = vmatprep.subr.bf16.mxu0 %v10088_v31  ;;  %1186 = vmatprep.subr.bf16.mxu1 %v10091_v32 }
 0x12f   : > { %1146 = vmatpush1.bf16.msra.mxu0 %v10086_v33  ;;  %1187 = vmatpush1.bf16.msra.mxu1 %v10089_v34 }
 0x130   : > { %1147 = vmatprep.subr.bf16.mxu0 %v10094_v35  ;;  %1188 = vmatprep.subr.bf16.mxu1 %v10097_v36 }
 0x133   : > { %1148 = vmatpush1.bf16.msra.mxu0 %v10092_v37  ;;  %1189 = vmatpush1.bf16.msra.mxu1 %v10095_v38 }
 0x134   : > { %9565 = vmatprep.subr.bf16.mxu0 %v10098_v39  ;;  %1552 = vmatprep.subr.bf16.mxu1 %v10118_v60  ;;  %v10153_v60 = vld [vmem:[%s13365_s1 + $0x1b8] sm:$0xff]  }
 0x136   : > { %8266 = vmatmul.mubr.msk.bf16.vlgmr.msra.gmra.mxu0 %vm842_vm1, %v491_v26  ;;  %8267 = vmatmul.mubr.msk.bf16.vlgmr.msra.gmra.mxu1 %vm842_vm1, %v491_v26 }
 0x137   : > { %9566 = vmatpush3.bf16.msra.mxu0 %v10099_v41  ;;  %1384 = vmatprep.mubr.bf16.mxu0 %v8301_v43 }
 0x138   : > { %9567 = vmatprep.subr.bf16.mxu0 %v10100_v42  ;;  %1576 = vmatprep.mubr.bf16.mxu1 %v11024_v56 }
 0x139   : > { %1553 = vmatpush1.bf16.msra.mxu1 %v10116_v59  ;;  %v1673_v59 = vld [vmem:[%s11192_s25 + $0x18] sm:$0xff] }
 0x13a   : > { %1554 = vmatprep.subr.bf16.mxu1 %v10124_v0  ;;  %v10156_v0 = vld [vmem:[%s13365_s1 + $0x1e8] sm:$0xff]  }
 0x13b   : > { %9568 = vmatpush3.bf16.msra.mxu0 %v10101_v44 }
 0x13c   : > { %9569 = vmatprep.subr.bf16.mxu0 %v10102_v45 }
 0x13d   : > { %1555 = vmatpush1.bf16.msra.mxu1 %v10122_v63  ;;  %v10155_v63 = vld [vmem:[%s13365_s1 + $0x1b0] sm:$0xff]  }
 0x13e   : > { %1556 = vmatprep.subr.bf16.mxu1 %v10130_v3  ;;  %v10159_v3 = vld [vmem:[%s13365_s1 + $0x1a0] sm:$0xff]  }
 0x13f   : > { %9570 = vmatpush3.bf16.msra.mxu0 %v10103_v46 }
 0x140   : > { %9571 = vmatprep.subr.bf16.mxu0 %v10104_v47 }
 0x141   : > { %1557 = vmatpush1.bf16.msra.mxu1 %v10128_v4  ;;  %v10160_v4 = vld [vmem:[%s13365_s1 + $0x1d8] sm:$0xff]  }
 0x142   : > { %1558 = vmatprep.subr.bf16.mxu1 %v10136_v7  ;;  %v10163_v7 = vld [vmem:[%s13365_s1 + $0x190] sm:$0xff]  }
 0x143   : > { %9572 = vmatpush3.bf16.msra.mxu0 %v10105_v48 }
 0x144   : > { %9573 = vmatprep.subr.bf16.mxu0 %v10106_v49  ;;  %v10140_v49 = vld [vmem:[%s13366_s2 + $0x218] ss:$24 sps:$4 sm:$0xff]  }
 0x145   : > { %1559 = vmatpush1.bf16.msra.mxu1 %v10134_v8  ;;  %v10164_v8 = vld [vmem:[%s13365_s1 + $0x1c8] sm:$0xff]  }
 0x146   : > { %1593 = vmatprep.subr.bf16.mxu1 %v10142_v11  ;;  %v10167_v11 = vld [vmem:[%s13365_s1 + $0x180] sm:$0xff]  }
 0x147   : > { %9574 = vmatpush3.bf16.msra.mxu0 %v10107_v50 }
 0x148   : > { %9575 = vmatprep.subr.bf16.mxu0 %v10108_v51  ;;  %v10145_v51 = vld [vmem:[%s13366_s2 + $0x1ec] ss:$24 sps:$4 sm:$0xff]  }
 0x14b   : > { %9576 = vmatpush3.bf16.msra.mxu0 %v10109_v52  ;;  %v10143_v52 = vld [vmem:[%s13366_s2 + $0x1e8] ss:$24 sps:$4 sm:$0xff]  }
 0x14c   : > { %9577 = vmatprep.subr.bf16.mxu0 %v10110_v53  ;;  %v10148_v53 = vld [vmem:[%s13366_s2 + $0x1bc] ss:$24 sps:$4 sm:$0xff]  }
 0x14f   : > { %9578 = vmatpush3.bf16.msra.mxu0 %v10111_v54  ;;  %v10146_v54 = vld [vmem:[%s13366_s2 + $0x1b8] ss:$24 sps:$4 sm:$0xff]  }
 0x150   : > { %9579 = vmatprep.subr.bf16.mxu0 %v10112_v55  ;;  %v10151_v55 = vld [vmem:[%s13366_s2 + $0x18c] ss:$24 sps:$4 sm:$0xff]  }
 0x153   : > { %9580 = vmatpush3.bf16.msra.mxu0 %v10113_v57  ;;  %v10149_v57 = vld [vmem:[%s13366_s2 + $0x188] ss:$24 sps:$4 sm:$0xff]  }
 0x154   : > { %1634 = vmatprep.subr.bf16.mxu0 %v10121_v62  ;;  %v10154_v62 = vld [vmem:[%s13365_s1 + $0x1f0] sm:$0xff]  }
 0x156   : > { %1385 = vmatmul.mubr.bf16.vlgmr.msra.gmra.mxu0 %v8300_v58  ;;  %v10152_v58 = vld [vmem:[%s13365_s1 + $0x1f8] sm:$0xff]  }
 0x157   : > { %1658 = vmatprep.mubr.bf16.mxu0 %v11024_v56  ;;  %1635 = vmatpush1.bf16.msra.mxu0 %v10119_v61  ;;  %v8402_v61 = vcombine.high %v1673_v59, %v1673_v59 }
 0x158   : > { %1636 = vmatprep.subr.bf16.mxu0 %v10127_v2  ;;  %v10158_v2 = vld [vmem:[%s13365_s1 + $0x1e0] sm:$0xff]  }
 0x15b   : > { %1637 = vmatpush1.bf16.msra.mxu0 %v10125_v1  ;;  %v10157_v1 = vld [vmem:[%s13365_s1 + $0x1a8] sm:$0xff]  }
 0x15c   : > { %1638 = vmatprep.subr.bf16.mxu0 %v10133_v5  ;;  %v10161_v5 = vld [vmem:[%s13365_s1 + $0x198] sm:$0xff]  }
 0x15f   : > { %1639 = vmatpush1.bf16.msra.mxu0 %v10131_v6  ;;  %v10162_v6 = vld [vmem:[%s13365_s1 + $0x1d0] sm:$0xff]  }
 0x160   : > { %1640 = vmatprep.subr.bf16.mxu0 %v10139_v9  ;;  %v10165_v9 = vld [vmem:[%s13365_s1 + $0x188] sm:$0xff]  }
 0x163   : > { %1641 = vmatpush1.bf16.msra.mxu0 %v10137_v10  ;;  %v10166_v10 = vld [vmem:[%s13365_s1 + $0x1c0] sm:$0xff]  }
 0x1d6   : > { %v880_v12 = vpop.f32.mrf.mxu0  ;;  %v921_v13 = vpop.f32.mrf.mxu1 }
 0x1d8   : > { %v882_v14 = vpop.f32.mrf.mxu0  ;;  %v923_v15 = vpop.f32.mrf.mxu1 }
 0x1da   : > { %v884_v16 = vpop.f32.mrf.mxu0  ;;  %v925_v17 = vpop.f32.mrf.mxu1 }
 0x1db   : > { %v10175_v16 = vld [vmem:[%s13366_s2 + $0x2e4] ss:$24 sps:$4 sm:$0xff]  }
 0x1dc   : > { %v885_v18 = vpop.f32.mrf.mxu0  ;;  %v926_v19 = vpop.f32.mrf.mxu1  ;;  %v10178_v17 = vld [vmem:[%s13366_s2 + $0x2a4] ss:$24 sps:$4 sm:$0xff]  }
 0x1dd   : > { %v10181_v18 = vld [vmem:[%s13366_s2 + $0x2b4] ss:$24 sps:$4 sm:$0xff]   ;;  %v10176_v19 = vld [vmem:[%s13366_s2 + $0x2a0] ss:$24 sps:$4 sm:$0xff]  }
 0x1e6   : > { %v962_v20 = vpop.f32.mrf.mxu0  ;;  %v1126_v21 = vpop.f32.mrf.mxu1 }
 0x1e7   : > { %v11484_v22 = vadd.f32 %v1126_v21, %v880_v12  ;;  %v8401_v12 = vcombine.low %v1673_v59, %v1673_v59  ;;  %v10184_v21 = vld [vmem:[%s13366_s2 + $0x274] ss:$24 sps:$4 sm:$0xff]   ;;  %v10197_v59 = vld [vmem:[%s13366_s2 + $0x2a8] ss:$24 sps:$4 sm:$0xff]  }
 0x1e8   : > { %v964_v23 = vpop.f32.mrf.mxu0  ;;  %v1128_v24 = vpop.f32.mrf.mxu1 }
 0x1e9   : > { %v11486_v25 = vadd.f32 %v1128_v24, %v882_v14  ;;  %v10172_v14 = vld [vmem:[%s13366_s2 + $0x2d4] ss:$24 sps:$4 sm:$0xff]   ;;  %v10187_v24 = vld [vmem:[%s13366_s2 + $0x284] ss:$24 sps:$4 sm:$0xff]  }
 0x1ea   : > { %v966_v26 = vpop.f32.mrf.mxu0  ;;  %v1130_v27 = vpop.f32.mrf.mxu1  ;;  %2010 = vmatprep.subr.bf16.mxu0 %v10172_v14  ;;  %v10218_v14 = vld [vmem:[%s13365_s1 + $0x248] sm:$0xff]  }
 0x1eb   : > { %v10185_v26 = vld [vmem:[%s13366_s2 + $0x280] ss:$24 sps:$4 sm:$0xff]   ;;  %v10190_v27 = vld [vmem:[%s13366_s2 + $0x244] ss:$24 sps:$4 sm:$0xff]  }
 0x1ec   : > { %v967_v28 = vpop.f32.mrf.mxu0  ;;  %v1131_v29 = vpop.f32.mrf.mxu1 }
 0x1ed   : > { %v10188_v28 = vld [vmem:[%s13366_s2 + $0x240] ss:$24 sps:$4 sm:$0xff]   ;;  %v10193_v29 = vld [vmem:[%s13366_s2 + $0x254] ss:$24 sps:$4 sm:$0xff]  }
 0x1f6   : > { %v1167_v30 = vpop.f32.mrf.mxu0  ;;  %v1208_v31 = vpop.f32.mrf.mxu1 }
 0x1f7   : > { %v11488_v32 = vadd.f32 %v1167_v30, %v921_v13  ;;  %v11490_v33 = vadd.f32 %v1208_v31, %v962_v20  ;;  %v10170_v13 = vld [vmem:[%s13366_s2 + $0x2d0] ss:$24 sps:$4 sm:$0xff]   ;;  %v10196_v31 = vld [vmem:[%s13366_s2 + $0x2dc] ss:$24 sps:$4 sm:$0xff]  }
 0x1f8   : > { %v1169_v34 = vpop.f32.mrf.mxu0  ;;  %v1210_v35 = vpop.f32.mrf.mxu1  ;;  %v10179_v20 = vld [vmem:[%s13366_s2 + $0x2b0] ss:$24 sps:$4 sm:$0xff]  }
 0x1f9   : > { %v11492_v36 = vadd.f32 %v1169_v34, %v923_v15  ;;  %v11494_v37 = vadd.f32 %v1210_v35, %v964_v23  ;;  %v10173_v15 = vld [vmem:[%s13366_s2 + $0x2e0] ss:$24 sps:$4 sm:$0xff]   ;;  %v10182_v23 = vld [vmem:[%s13366_s2 + $0x270] ss:$24 sps:$4 sm:$0xff]  }
 0x1fa   : > { %v1171_v38 = vpop.f32.mrf.mxu0  ;;  %v1212_v39 = vpop.f32.mrf.mxu1  ;;  %v10191_v30 = vld [vmem:[%s13366_s2 + $0x250] ss:$24 sps:$4 sm:$0xff]  }
 0x1fc   : > { %v1172_v40 = vpop.f32.mrf.mxu0  ;;  %v1213_v41 = vpop.f32.mrf.mxu1 }
 0x216   : > { %v9581_v42 = vpop.f32.mrf.mxu0 }
 0x218   : > { %v9582_v43 = vpop.f32.mrf.mxu0 }
 0x219   : > { %v9583_v44 = vadd.f32 %v9582_v43, %v9581_v42 }
 0x21a   : > { %v9584_v45 = vpop.f32.mrf.mxu0 }
 0x21b   : > { %vm1392_vm3 = vcmp.gt.f32.partialorder %v9583_v44, 0.0  ;;  %v1393_v46 = vmul.f32 0.01, %v9583_v44 }
 0x21c   : > { %v9585_v47 = vpop.f32.mrf.mxu0 }
 0x21d   : > { %v1394_v48 = vsel %vm1392_vm3, %v9583_v44, %v1393_v46 }
 0x21e   : > { %v1395_v50 = vpack.c.bf16 %v1394_v48, %v1394_v48 }
 0x220   : > { %8366 = vmatmul.mubr.msk.bf16.vlgmr.msra.gmra.mxu1 %vm842_vm1, %v1395_v50  ;;  %8368 = vmatmul.mubr.msk.bf16.vlgmr.msra.gmra.mxu0 %vm842_vm1, %v1395_v50 }
 0x221   : > { %1594 = vmatpush1.bf16.msra.mxu1 %v10140_v49  ;;  %1617 = vmatprep.mubr.bf16.mxu1 %v11024_v56 }
 0x222   : > { %1595 = vmatprep.subr.bf16.mxu1 %v10145_v51  ;;  %2034 = vmatprep.mubr.bf16.mxu0 %v11024_v56 }
 0x223   : > { %2011 = vmatpush1.bf16.msra.mxu0 %v10170_v13  ;;  %v10217_v13 = vld [vmem:[%s13365_s1 + $0x210] sm:$0xff]  }
 0x224   : > { %2012 = vmatprep.subr.bf16.mxu0 %v10178_v17  ;;  %v10221_v17 = vld [vmem:[%s13365_s1 + $0x200] sm:$0xff]  }
 0x225   : > { %1596 = vmatpush1.bf16.msra.mxu1 %v10143_v52 }
 0x226   : > { %1597 = vmatprep.subr.bf16.mxu1 %v10148_v53 }
 0x227   : > { %2013 = vmatpush1.bf16.msra.mxu0 %v10176_v19  ;;  %v10224_v19 = vld [vmem:[%s13366_s2 + $0x390] ss:$24 sps:$4 sm:$0xff]  }
 0x228   : > { %2014 = vmatprep.subr.bf16.mxu0 %v10184_v21  ;;  %v10227_v21 = vld [vmem:[%s13366_s2 + $0x3a0] ss:$24 sps:$4 sm:$0xff]  }
 0x229   : > { %1598 = vmatpush1.bf16.msra.mxu1 %v10146_v54 }
 0x22a   : > { %1599 = vmatprep.subr.bf16.mxu1 %v10151_v55 }
 0x22b   : > { %2015 = vmatpush1.bf16.msra.mxu0 %v10182_v23  ;;  %v10229_v23 = vld [vmem:[%s13366_s2 + $0x3a4] ss:$24 sps:$4 sm:$0xff]  }
 0x22c   : > { %2016 = vmatprep.subr.bf16.mxu0 %v10190_v27  ;;  %v10230_v27 = vld [vmem:[%s13366_s2 + $0x360] ss:$24 sps:$4 sm:$0xff]  }
 0x22d   : > { %1600 = vmatpush1.bf16.msra.mxu1 %v10149_v57 }
 0x22e   : > { %9587 = vmatprep.subr.bf16.mxu1 %v10152_v58  ;;  %v10194_v58 = vld [vmem:[%s13366_s2 + $0x2d8] ss:$24 sps:$4 sm:$0xff]  }
 0x22f   : > { %2017 = vmatpush1.bf16.msra.mxu0 %v10188_v28  ;;  %v10233_v28 = vld [vmem:[%s13366_s2 + $0x370] ss:$24 sps:$4 sm:$0xff]  }
 0x230   : > { %8367 = vmatmul.mubr.msk.bf16.vlgmr.msra.gmra.mxu1 %vm842_vm1, %v1395_v50  ;;  %2051 = vmatprep.subr.bf16.mxu0 %v10196_v31  ;;  %v10241_v31 = vld [vmem:[%s13366_s2 + $0x344] ss:$24 sps:$4 sm:$0xff]  }
 0x231   : > { %9588 = vmatpush3.bf16.msra.mxu1 %v10153_v60  ;;  %1842 = vmatprep.mubr.bf16.mxu1 %v8402_v61  ;;  %v10202_v60 = vld [vmem:[%s13366_s2 + $0x27c] ss:$24 sps:$4 sm:$0xff]   ;;  %v10200_v61 = vld [vmem:[%s13366_s2 + $0x278] ss:$24 sps:$4 sm:$0xff]  }
 0x232   : > { %9589 = vmatprep.subr.bf16.mxu1 %v10154_v62  ;;  %v10205_v62 = vld [vmem:[%s13366_s2 + $0x24c] ss:$24 sps:$4 sm:$0xff]  }
 0x235   : > { %9590 = vmatpush3.bf16.msra.mxu1 %v10155_v63  ;;  %v10203_v63 = vld [vmem:[%s13366_s2 + $0x248] ss:$24 sps:$4 sm:$0xff]  }
 0x236   : > { %9591 = vmatprep.subr.bf16.mxu1 %v10156_v0  ;;  %v10206_v0 = vld [vmem:[%s13365_s1 + $0x278] sm:$0xff]  }
 0x239   : > { %9592 = vmatpush3.bf16.msra.mxu1 %v10157_v1  ;;  %v2131_v1 = vld [vmem:[%s11192_s25 + $0x20] sm:$0xff] }
 0x23a   : > { %9593 = vmatprep.subr.bf16.mxu1 %v10158_v2  ;;  %v10207_v2 = vld [vmem:[%s13365_s1 + $0x238] sm:$0xff]  }
 0x23d   : > { %9594 = vmatpush3.bf16.msra.mxu1 %v10159_v3  ;;  %v8503_v3 = vcombine.high %v2131_v1, %v2131_v1 }
 0x23e   : > { %9595 = vmatprep.subr.bf16.mxu1 %v10160_v4  ;;  %v10208_v4 = vld [vmem:[%s13365_s1 + $0x270] sm:$0xff]  }
 0x241   : > { %9596 = vmatpush3.bf16.msra.mxu1 %v10161_v5  ;;  %v10209_v5 = vld [vmem:[%s13365_s1 + $0x230] sm:$0xff]  }
 0x242   : > { %9597 = vmatprep.subr.bf16.mxu1 %v10162_v6  ;;  %v10210_v6 = vld [vmem:[%s13365_s1 + $0x268] sm:$0xff]  }
 0x245   : > { %9598 = vmatpush3.bf16.msra.mxu1 %v10163_v7  ;;  %v10211_v7 = vld [vmem:[%s13365_s1 + $0x228] sm:$0xff]  }
 0x246   : > { %9599 = vmatprep.subr.bf16.mxu1 %v10164_v8  ;;  %v10212_v8 = vld [vmem:[%s13365_s1 + $0x260] sm:$0xff]  }
 0x249   : > { %9600 = vmatpush3.bf16.msra.mxu1 %v10165_v9  ;;  %v10213_v9 = vld [vmem:[%s13365_s1 + $0x220] sm:$0xff]  }
 0x24a   : > { %9601 = vmatprep.subr.bf16.mxu1 %v10166_v10  ;;  %v10214_v10 = vld [vmem:[%s13365_s1 + $0x258] sm:$0xff]  }
 0x24d   : > { %9602 = vmatpush3.bf16.msra.mxu1 %v10167_v11  ;;  %v10215_v11 = vld [vmem:[%s13365_s1 + $0x218] sm:$0xff]  }
 0x24e   : > { %2092 = vmatprep.subr.bf16.mxu1 %v10175_v16  ;;  %v10220_v16 = vld [vmem:[%s13365_s1 + $0x240] sm:$0xff]  }
 0x250   : > { %1843 = vmatmul.mubr.bf16.vlgmr.msra.gmra.mxu1 %v8401_v12  ;;  %v10216_v12 = vld [vmem:[%s13365_s1 + $0x250] sm:$0xff]  }
 0x251   : > { %2116 = vmatprep.mubr.bf16.mxu1 %v11024_v56  ;;  %2093 = vmatpush1.bf16.msra.mxu1 %v10173_v15  ;;  %v10219_v15 = vld [vmem:[%s13365_s1 + $0x208] sm:$0xff]  }
 0x252   : > { %2094 = vmatprep.subr.bf16.mxu1 %v10181_v18  ;;  %v8502_v18 = vcombine.low %v2131_v1, %v2131_v1  ;;  %v10251_v1 = vld [vmem:[%s13366_s2 + $0x368] ss:$24 sps:$4 sm:$0xff]  }
 0x255   : > { %2095 = vmatpush1.bf16.msra.mxu1 %v10179_v20  ;;  %v10226_v20 = vld [vmem:[%s13366_s2 + $0x394] ss:$24 sps:$4 sm:$0xff]  }
 0x256   : > { %2096 = vmatprep.subr.bf16.mxu1 %v10187_v24  ;;  %v10232_v24 = vld [vmem:[%s13366_s2 + $0x364] ss:$24 sps:$4 sm:$0xff]  }
 0x259   : > { %2097 = vmatpush1.bf16.msra.mxu1 %v10185_v26  ;;  %v10235_v26 = vld [vmem:[%s13366_s2 + $0x374] ss:$24 sps:$4 sm:$0xff]  }
 0x25a   : > { %2098 = vmatprep.subr.bf16.mxu1 %v10193_v29  ;;  %v10238_v29 = vld [vmem:[%s13366_s2 + $0x334] ss:$24 sps:$4 sm:$0xff]  }
 0x25d   : > { %2099 = vmatpush1.bf16.msra.mxu1 %v10191_v30  ;;  %v10236_v30 = vld [vmem:[%s13366_s2 + $0x330] ss:$24 sps:$4 sm:$0xff]  }
 0x25e   : > { %2468 = vmatprep.subr.bf16.mxu1 %v10226_v20  ;;  %v10272_v20 = vld [vmem:[%s13365_s1 + $0x2c8] sm:$0xff]  }
 0x2e0   : > { %v1578_v34 = vpop.f32.mrf.mxu1  ;;  %v1660_v35 = vpop.f32.mrf.mxu0 }
 0x2e1   : > { %v11624_v38 = vadd.f32 %v1578_v34, %v11484_v22  ;;  %v11627_v39 = vadd.f32 %v1660_v35, %v11490_v33  ;;  %v10239_v34 = vld [vmem:[%s13366_s2 + $0x340] ss:$24 sps:$4 sm:$0xff]   ;;  %v10244_v35 = vld [vmem:[%s13366_s2 + $0x304] ss:$24 sps:$4 sm:$0xff]  }
 0x2e2   : > { %v1580_v40 = vpop.f32.mrf.mxu1  ;;  %v1662_v41 = vpop.f32.mrf.mxu0 }
 0x2e3   : > { %v11630_v42 = vadd.f32 %v1580_v40, %v11486_v25  ;;  %v11633_v43 = vadd.f32 %v1662_v41, %v11494_v37  ;;  %v10242_v40 = vld [vmem:[%s13366_s2 + $0x300] ss:$24 sps:$4 sm:$0xff]   ;;  %v10247_v41 = vld [vmem:[%s13366_s2 + $0x314] ss:$24 sps:$4 sm:$0xff]  }
 0x2e4   : > { %v1582_v44 = vpop.f32.mrf.mxu1  ;;  %v1664_v45 = vpop.f32.mrf.mxu0 }
 0x2e5   : > { %v10245_v44 = vld [vmem:[%s13366_s2 + $0x310] ss:$24 sps:$4 sm:$0xff]   ;;  %v10250_v45 = vld [vmem:[%s13366_s2 + $0x39c] ss:$24 sps:$4 sm:$0xff]  }
 0x2e6   : > { %v1583_v46 = vpop.f32.mrf.mxu1  ;;  %v1665_v47 = vpop.f32.mrf.mxu0 }
 0x2f0   : > { %v1619_v48 = vpop.f32.mrf.mxu1 }
 0x2f1   : > { %v11636_v49 = vadd.f32 %v1619_v48, %v11488_v32 }
 0x2f2   : > { %v1621_v22 = vpop.f32.mrf.mxu1 }
 0x2f3   : > { %v11639_v33 = vadd.f32 %v1621_v22, %v11492_v36  ;;  %v10199_v36 = vld [vmem:[%s13366_s2 + $0x2ac] ss:$24 sps:$4 sm:$0xff]  }
 0x2f4   : > { %v1623_v50 = vpop.f32.mrf.mxu1 }
 0x2f6   : > { %v1624_v51 = vpop.f32.mrf.mxu1 }
 0x310   : > { %v9603_v52 = vpop.f32.mrf.mxu1 }
 0x312   : > { %v9604_v25 = vpop.f32.mrf.mxu1 }
 0x313   : > { %v9605_v53 = vadd.f32 %v9604_v25, %v9603_v52 }
 0x314   : > { %v9606_v54 = vpop.f32.mrf.mxu1 }
 0x315   : > { %vm1850_vm4 = vcmp.gt.f32.partialorder %v9605_v53, 0.0  ;;  %v1851_v37 = vmul.f32 0.01, %v9605_v53 }
 0x316   : > { %v9607_v55 = vpop.f32.mrf.mxu1 }
 0x317   : > { %v1852_v57 = vsel %vm1850_vm4, %v9605_v53, %v1851_v37 }
 0x318   : > { %v1853_v32 = vpack.c.bf16 %v1852_v57, %v1852_v57 }
 0x31a   : > { %8467 = vmatmul.mubr.msk.bf16.vlgmr.msra.gmra.mxu0 %vm842_vm1, %v1853_v32  ;;  %8469 = vmatmul.mubr.msk.bf16.vlgmr.msra.gmra.mxu1 %vm842_vm1, %v1853_v32 }
 0x31b   : > { %2052 = vmatpush1.bf16.msra.mxu0 %v10194_v58  ;;  %2075 = vmatprep.mubr.bf16.mxu0 %v11024_v56 }
 0x31c   : > { %2053 = vmatprep.subr.bf16.mxu0 %v10199_v36  ;;  %2492 = vmatprep.mubr.bf16.mxu1 %v11024_v56 }
 0x31d   : > { %2469 = vmatpush1.bf16.msra.mxu1 %v10224_v19  ;;  %v10271_v19 = vld [vmem:[%s13365_s1 + $0x290] sm:$0xff]  }
 0x31e   : > { %2470 = vmatprep.subr.bf16.mxu1 %v10232_v24  ;;  %v10275_v24 = vld [vmem:[%s13365_s1 + $0x280] sm:$0xff]  }
 0x31f   : > { %2054 = vmatpush1.bf16.msra.mxu0 %v10197_v59 }
 0x320   : > { %2055 = vmatprep.subr.bf16.mxu0 %v10202_v60 }
 0x321   : > { %2471 = vmatpush1.bf16.msra.mxu1 %v10230_v27  ;;  %v10278_v27 = vld [vmem:[%s13366_s2 + $0x450] ss:$24 sps:$4 sm:$0xff]  }
 0x322   : > { %2472 = vmatprep.subr.bf16.mxu1 %v10238_v29  ;;  %v10281_v29 = vld [vmem:[%s13366_s2 + $0x460] ss:$24 sps:$4 sm:$0xff]  }
 0x323   : > { %2056 = vmatpush1.bf16.msra.mxu0 %v10200_v61 }
 0x324   : > { %2057 = vmatprep.subr.bf16.mxu0 %v10205_v62 }
 0x325   : > { %2473 = vmatpush1.bf16.msra.mxu1 %v10236_v30  ;;  %v10283_v30 = vld [vmem:[%s13366_s2 + $0x464] ss:$24 sps:$4 sm:$0xff]  }
 0x326   : > { %2474 = vmatprep.subr.bf16.mxu1 %v10244_v35  ;;  %v10284_v35 = vld [vmem:[%s13366_s2 + $0x420] ss:$24 sps:$4 sm:$0xff]  }
 0x327   : > { %2058 = vmatpush1.bf16.msra.mxu0 %v10203_v63 }
 0x328   : > { %9609 = vmatprep.subr.bf16.mxu0 %v10206_v0  ;;  %v10248_v0 = vld [vmem:[%s13366_s2 + $0x398] ss:$24 sps:$4 sm:$0xff]  }
 0x329   : > { %2475 = vmatpush1.bf16.msra.mxu1 %v10242_v40  ;;  %v10287_v40 = vld [vmem:[%s13366_s2 + $0x430] ss:$24 sps:$4 sm:$0xff]  }
 0x32a   : > { %8468 = vmatmul.mubr.msk.bf16.vlgmr.msra.gmra.mxu0 %vm842_vm1, %v1853_v32  ;;  %2509 = vmatprep.subr.bf16.mxu1 %v10250_v45  ;;  %v10295_v45 = vld [vmem:[%s13366_s2 + $0x404] ss:$24 sps:$4 sm:$0xff]  }
 0x32b   : > { %9610 = vmatpush3.bf16.msra.mxu0 %v10207_v2  ;;  %2300 = vmatprep.mubr.bf16.mxu0 %v8503_v3  ;;  %v10256_v2 = vld [vmem:[%s13366_s2 + $0x33c] ss:$24 sps:$4 sm:$0xff]   ;;  %v10254_v3 = vld [vmem:[%s13366_s2 + $0x338] ss:$24 sps:$4 sm:$0xff]  }
 0x32c   : > { %9611 = vmatprep.subr.bf16.mxu0 %v10208_v4  ;;  %v10259_v4 = vld [vmem:[%s13366_s2 + $0x30c] ss:$24 sps:$4 sm:$0xff]  }
 0x32f   : > { %9612 = vmatpush3.bf16.msra.mxu0 %v10209_v5  ;;  %v10257_v5 = vld [vmem:[%s13366_s2 + $0x308] ss:$24 sps:$4 sm:$0xff]  }
 0x330   : > { %9613 = vmatprep.subr.bf16.mxu0 %v10210_v6  ;;  %v10260_v6 = vld [vmem:[%s13365_s1 + $0x2f8] sm:$0xff]  }
 0x333   : > { %9614 = vmatpush3.bf16.msra.mxu0 %v10211_v7  ;;  %v2589_v7 = vld [vmem:[%s11192_s25 + $0x28] sm:$0xff] }
 0x334   : > { %9615 = vmatprep.subr.bf16.mxu0 %v10212_v8  ;;  %v10261_v8 = vld [vmem:[%s13365_s1 + $0x2b8] sm:$0xff]  }
 0x337   : > { %9616 = vmatpush3.bf16.msra.mxu0 %v10213_v9  ;;  %v8604_v9 = vcombine.high %v2589_v7, %v2589_v7 }
 0x338   : > { %9617 = vmatprep.subr.bf16.mxu0 %v10214_v10  ;;  %v10262_v10 = vld [vmem:[%s13365_s1 + $0x2f0] sm:$0xff]  }
 0x33b   : > { %9618 = vmatpush3.bf16.msra.mxu0 %v10215_v11  ;;  %v10263_v11 = vld [vmem:[%s13365_s1 + $0x2b0] sm:$0xff]  }
 0x33c   : > { %9619 = vmatprep.subr.bf16.mxu0 %v10216_v12  ;;  %v10264_v12 = vld [vmem:[%s13365_s1 + $0x2e8] sm:$0xff]  }
 0x33f   : > { %9620 = vmatpush3.bf16.msra.mxu0 %v10217_v13  ;;  %v10265_v13 = vld [vmem:[%s13365_s1 + $0x2a8] sm:$0xff]  }
 0x340   : > { %9621 = vmatprep.subr.bf16.mxu0 %v10218_v14  ;;  %v10266_v14 = vld [vmem:[%s13365_s1 + $0x2e0] sm:$0xff]  }
 0x343   : > { %9622 = vmatpush3.bf16.msra.mxu0 %v10219_v15  ;;  %v10267_v15 = vld [vmem:[%s13365_s1 + $0x2a0] sm:$0xff]  }
 0x344   : > { %9623 = vmatprep.subr.bf16.mxu0 %v10220_v16  ;;  %v10268_v16 = vld [vmem:[%s13365_s1 + $0x2d8] sm:$0xff]  }
 0x347   : > { %9624 = vmatpush3.bf16.msra.mxu0 %v10221_v17  ;;  %v10269_v17 = vld [vmem:[%s13365_s1 + $0x298] sm:$0xff]  }
 0x348   : > { %2550 = vmatprep.subr.bf16.mxu0 %v10229_v23  ;;  %v10274_v23 = vld [vmem:[%s13365_s1 + $0x2c0] sm:$0xff]  }
 0x34a   : > { %2301 = vmatmul.mubr.bf16.vlgmr.msra.gmra.mxu0 %v8502_v18  ;;  %v10270_v18 = vld [vmem:[%s13365_s1 + $0x2d0] sm:$0xff]  }
 0x34b   : > { %2574 = vmatprep.mubr.bf16.mxu0 %v11024_v56  ;;  %2551 = vmatpush1.bf16.msra.mxu0 %v10227_v21  ;;  %v10273_v21 = vld [vmem:[%s13365_s1 + $0x288] sm:$0xff]  }
 0x34c   : > { %2552 = vmatprep.subr.bf16.mxu0 %v10235_v26  ;;  %v8603_v26 = vcombine.low %v2589_v7, %v2589_v7  ;;  %v10305_v7 = vld [vmem:[%s13366_s2 + $0x428] ss:$24 sps:$4 sm:$0xff]  }
 0x34f   : > { %2553 = vmatpush1.bf16.msra.mxu0 %v10233_v28  ;;  %v10280_v28 = vld [vmem:[%s13366_s2 + $0x454] ss:$24 sps:$4 sm:$0xff]  }
 0x350   : > { %2554 = vmatprep.subr.bf16.mxu0 %v10241_v31  ;;  %v10286_v31 = vld [vmem:[%s13366_s2 + $0x424] ss:$24 sps:$4 sm:$0xff]  }
 0x353   : > { %2555 = vmatpush1.bf16.msra.mxu0 %v10239_v34  ;;  %v10289_v34 = vld [vmem:[%s13366_s2 + $0x434] ss:$24 sps:$4 sm:$0xff]  }
 0x354   : > { %2556 = vmatprep.subr.bf16.mxu0 %v10247_v41  ;;  %v10292_v41 = vld [vmem:[%s13366_s2 + $0x3f4] ss:$24 sps:$4 sm:$0xff]  }
 0x357   : > { %2557 = vmatpush1.bf16.msra.mxu0 %v10245_v44  ;;  %v10290_v44 = vld [vmem:[%s13366_s2 + $0x3f0] ss:$24 sps:$4 sm:$0xff]  }
 0x358   : > { %2926 = vmatprep.subr.bf16.mxu0 %v10280_v28  ;;  %v10326_v28 = vld [vmem:[%s13365_s1 + $0x348] sm:$0xff]  }
 0x3da   : > { %v2036_v46 = vpop.f32.mrf.mxu0  ;;  %v2118_v47 = vpop.f32.mrf.mxu1 }
 0x3db   : > { %v11769_v48 = vadd.f32 %v2036_v46, %v11624_v38  ;;  %v11772_v22 = vadd.f32 %v2118_v47, %v11627_v39  ;;  %v10293_v46 = vld [vmem:[%s13366_s2 + $0x400] ss:$24 sps:$4 sm:$0xff]   ;;  %v10298_v47 = vld [vmem:[%s13366_s2 + $0x3c4] ss:$24 sps:$4 sm:$0xff]  }
 0x3dc   : > { %v2038_v50 = vpop.f32.mrf.mxu0  ;;  %v2120_v51 = vpop.f32.mrf.mxu1 }
 0x3dd   : > { %v11775_v52 = vadd.f32 %v2038_v50, %v11630_v42  ;;  %v11778_v25 = vadd.f32 %v2120_v51, %v11633_v43  ;;  %v10296_v50 = vld [vmem:[%s13366_s2 + $0x3c0] ss:$24 sps:$4 sm:$0xff]   ;;  %v10301_v51 = vld [vmem:[%s13366_s2 + $0x3d4] ss:$24 sps:$4 sm:$0xff]  }
 0x3de   : > { %v2040_v53 = vpop.f32.mrf.mxu0  ;;  %v2122_v54 = vpop.f32.mrf.mxu1 }
 0x3df   : > { %v10299_v53 = vld [vmem:[%s13366_s2 + $0x3d0] ss:$24 sps:$4 sm:$0xff]   ;;  %v10304_v54 = vld [vmem:[%s13366_s2 + $0x45c] ss:$24 sps:$4 sm:$0xff]  }
 0x3e0   : > { %v2041_v37 = vpop.f32.mrf.mxu0  ;;  %v2123_v55 = vpop.f32.mrf.mxu1 }
 0x3ea   : > { %v2077_v57 = vpop.f32.mrf.mxu0 }
 0x3eb   : > { %v11781_v58 = vadd.f32 %v2077_v57, %v11636_v49 }
 0x3ec   : > { %v2079_v38 = vpop.f32.mrf.mxu0 }
 0x3ed   : > { %v11784_v39 = vadd.f32 %v2079_v38, %v11639_v33  ;;  %v10253_v33 = vld [vmem:[%s13366_s2 + $0x36c] ss:$24 sps:$4 sm:$0xff]  }
 0x3ee   : > { %v2081_v32 = vpop.f32.mrf.mxu0 }
 0x3f0   : > { %v2082_v36 = vpop.f32.mrf.mxu0 }
 0x40a   : > { %v9625_v59 = vpop.f32.mrf.mxu0 }
 0x40c   : > { %v9626_v42 = vpop.f32.mrf.mxu0 }
 0x40d   : > { %v9627_v60 = vadd.f32 %v9626_v42, %v9625_v59 }
 0x40e   : > { %v9628_v61 = vpop.f32.mrf.mxu0 }
 0x40f   : > { %vm2308_vm5 = vcmp.gt.f32.partialorder %v9627_v60, 0.0  ;;  %v2309_v43 = vmul.f32 0.01, %v9627_v60 }
 0x410   : > { %v9629_v62 = vpop.f32.mrf.mxu0 }
 0x411   : > { %v2310_v63 = vsel %vm2308_vm5, %v9627_v60, %v2309_v43  ;;  %vm11026_vm5 = vmmov 0  }
 0x412   : > { %v2311_v49 = vpack.c.bf16 %v2310_v63, %v2310_v63 }
 0x414   : > { %8568 = vmatmul.mubr.msk.bf16.vlgmr.msra.gmra.mxu1 %vm842_vm1, %v2311_v49  ;;  %8570 = vmatmul.mubr.msk.bf16.vlgmr.msra.gmra.mxu0 %vm842_vm1, %v2311_v49 }
 0x415   : > { %2510 = vmatpush1.bf16.msra.mxu1 %v10248_v0  ;;  %2533 = vmatprep.mubr.bf16.mxu1 %v11024_v56 }
 0x416   : > { %2511 = vmatprep.subr.bf16.mxu1 %v10253_v33  ;;  %2950 = vmatprep.mubr.bf16.mxu0 %v11024_v56 }
 0x417   : > { %2927 = vmatpush1.bf16.msra.mxu0 %v10278_v27  ;;  %v10325_v27 = vld [vmem:[%s13365_s1 + $0x310] sm:$0xff]  }
 0x418   : > { %2928 = vmatprep.subr.bf16.mxu0 %v10286_v31  ;;  %v10329_v31 = vld [vmem:[%s13365_s1 + $0x300] sm:$0xff]  }
 0x419   : > { %2512 = vmatpush1.bf16.msra.mxu1 %v10251_v1 }
 0x41a   : > { %2513 = vmatprep.subr.bf16.mxu1 %v10256_v2 }
 0x41b   : > { %2929 = vmatpush1.bf16.msra.mxu0 %v10284_v35  ;;  %v10332_v35 = vld [vmem:[%s13366_s2 + $0x510] ss:$24 sps:$4 sm:$0xff]  }
 0x41c   : > { %2930 = vmatprep.subr.bf16.mxu0 %v10292_v41  ;;  %v10335_v41 = vld [vmem:[%s13366_s2 + $0x520] ss:$24 sps:$4 sm:$0xff]  }
 0x41d   : > { %2514 = vmatpush1.bf16.msra.mxu1 %v10254_v3 }
 0x41e   : > { %2515 = vmatprep.subr.bf16.mxu1 %v10259_v4 }
 0x41f   : > { %2931 = vmatpush1.bf16.msra.mxu0 %v10290_v44  ;;  %v10337_v44 = vld [vmem:[%s13366_s2 + $0x524] ss:$24 sps:$4 sm:$0xff]  }
 0x420   : > { %2932 = vmatprep.subr.bf16.mxu0 %v10298_v47  ;;  %v10338_v47 = vld [vmem:[%s13366_s2 + $0x4e0] ss:$24 sps:$4 sm:$0xff]  }
 0x421   : > { %2516 = vmatpush1.bf16.msra.mxu1 %v10257_v5 }
 0x422   : > { %9631 = vmatprep.subr.bf16.mxu1 %v10260_v6  ;;  %v10302_v6 = vld [vmem:[%s13366_s2 + $0x458] ss:$24 sps:$4 sm:$0xff]  }
 0x423   : > { %2933 = vmatpush1.bf16.msra.mxu0 %v10296_v50  ;;  %v10341_v50 = vld [vmem:[%s13366_s2 + $0x4f0] ss:$24 sps:$4 sm:$0xff]  }
 0x424   : > { %8569 = vmatmul.mubr.msk.bf16.vlgmr.msra.gmra.mxu1 %vm842_vm1, %v2311_v49  ;;  %2967 = vmatprep.subr.bf16.mxu0 %v10304_v54  ;;  %v10349_v54 = vld [vmem:[%s13366_s2 + $0x4c4] ss:$24 sps:$4 sm:$0xff]  }
 0x425   : > { %9632 = vmatpush3.bf16.msra.mxu1 %v10261_v8  ;;  %2758 = vmatprep.mubr.bf16.mxu1 %v8604_v9  ;;  %v10310_v8 = vld [vmem:[%s13366_s2 + $0x3fc] ss:$24 sps:$4 sm:$0xff]   ;;  %v10308_v9 = vld [vmem:[%s13366_s2 + $0x3f8] ss:$24 sps:$4 sm:$0xff]  }
 0x426   : > { %9633 = vmatprep.subr.bf16.mxu1 %v10262_v10  ;;  %v10313_v10 = vld [vmem:[%s13366_s2 + $0x3cc] ss:$24 sps:$4 sm:$0xff]  }
 0x429   : > { %9634 = vmatpush3.bf16.msra.mxu1 %v10263_v11  ;;  %v10311_v11 = vld [vmem:[%s13366_s2 + $0x3c8] ss:$24 sps:$4 sm:$0xff]  }
 0x42a   : > { %9635 = vmatprep.subr.bf16.mxu1 %v10264_v12  ;;  %v10314_v12 = vld [vmem:[%s13365_s1 + $0x378] sm:$0xff]  }
 0x42d   : > { %9636 = vmatpush3.bf16.msra.mxu1 %v10265_v13  ;;  %v3047_v13 = vld [vmem:[%s11192_s25 + $0x30] sm:$0xff] }
 0x42e   : > { %9637 = vmatprep.subr.bf16.mxu1 %v10266_v14  ;;  %v10315_v14 = vld [vmem:[%s13365_s1 + $0x338] sm:$0xff]  }
 0x431   : > { %9638 = vmatpush3.bf16.msra.mxu1 %v10267_v15  ;;  %v8705_v15 = vcombine.high %v3047_v13, %v3047_v13 }
 0x432   : > { %9639 = vmatprep.subr.bf16.mxu1 %v10268_v16  ;;  %v10316_v16 = vld [vmem:[%s13365_s1 + $0x370] sm:$0xff]  }
 0x435   : > { %9640 = vmatpush3.bf16.msra.mxu1 %v10269_v17  ;;  %v10317_v17 = vld [vmem:[%s13365_s1 + $0x330] sm:$0xff]  }
 0x436   : > { %9641 = vmatprep.subr.bf16.mxu1 %v10270_v18  ;;  %v10318_v18 = vld [vmem:[%s13365_s1 + $0x368] sm:$0xff]  }
 0x439   : > { %9642 = vmatpush3.bf16.msra.mxu1 %v10271_v19  ;;  %v10319_v19 = vld [vmem:[%s13365_s1 + $0x328] sm:$0xff]  }
 0x43a   : > { %9643 = vmatprep.subr.bf16.mxu1 %v10272_v20  ;;  %v10320_v20 = vld [vmem:[%s13365_s1 + $0x360] sm:$0xff]  }
 0x43d   : > { %9644 = vmatpush3.bf16.msra.mxu1 %v10273_v21  ;;  %v10321_v21 = vld [vmem:[%s13365_s1 + $0x320] sm:$0xff]  }
 0x43e   : > { %9645 = vmatprep.subr.bf16.mxu1 %v10274_v23  ;;  %v10322_v23 = vld [vmem:[%s13365_s1 + $0x358] sm:$0xff]  }
 0x441   : > { %9646 = vmatpush3.bf16.msra.mxu1 %v10275_v24  ;;  %v10323_v24 = vld [vmem:[%s13365_s1 + $0x318] sm:$0xff]  }
 0x442   : > { %3008 = vmatprep.subr.bf16.mxu1 %v10283_v30  ;;  %v10328_v30 = vld [vmem:[%s13365_s1 + $0x340] sm:$0xff]  }
 0x444   : > { %2759 = vmatmul.mubr.bf16.vlgmr.msra.gmra.mxu1 %v8603_v26  ;;  %v10324_v26 = vld [vmem:[%s13365_s1 + $0x350] sm:$0xff]  }
 0x445   : > { %3032 = vmatprep.mubr.bf16.mxu1 %v11024_v56  ;;  %3009 = vmatpush1.bf16.msra.mxu1 %v10281_v29  ;;  %v10327_v29 = vld [vmem:[%s13365_s1 + $0x308] sm:$0xff]  }
 0x446   : > { %3010 = vmatprep.subr.bf16.mxu1 %v10289_v34  ;;  %v8704_v34 = vcombine.low %v3047_v13, %v3047_v13  ;;  %v10359_v13 = vld [vmem:[%s13366_s2 + $0x4e8] ss:$24 sps:$4 sm:$0xff]  }
 0x449   : > { %3011 = vmatpush1.bf16.msra.mxu1 %v10287_v40  ;;  %v10334_v40 = vld [vmem:[%s13366_s2 + $0x514] ss:$24 sps:$4 sm:$0xff]  }
 0x44a   : > { %3012 = vmatprep.subr.bf16.mxu1 %v10295_v45  ;;  %v10340_v45 = vld [vmem:[%s13366_s2 + $0x4e4] ss:$24 sps:$4 sm:$0xff]  }
 0x44d   : > { %3013 = vmatpush1.bf16.msra.mxu1 %v10293_v46  ;;  %v10343_v46 = vld [vmem:[%s13366_s2 + $0x4f4] ss:$24 sps:$4 sm:$0xff]  }
 0x44e   : > { %3014 = vmatprep.subr.bf16.mxu1 %v10301_v51  ;;  %v10346_v51 = vld [vmem:[%s13366_s2 + $0x4b4] ss:$24 sps:$4 sm:$0xff]  }
 0x451   : > { %3015 = vmatpush1.bf16.msra.mxu1 %v10299_v53  ;;  %v10344_v53 = vld [vmem:[%s13366_s2 + $0x4b0] ss:$24 sps:$4 sm:$0xff]  }
 0x452   : > { %3384 = vmatprep.subr.bf16.mxu1 %v10334_v40  ;;  %v10380_v40 = vld [vmem:[%s13365_s1 + $0x3c8] sm:$0xff]  }
 0x4d4   : > { %v2494_v37 = vpop.f32.mrf.mxu1  ;;  %v2576_v55 = vpop.f32.mrf.mxu0 }
 0x4d5   : > { %v11914_v57 = vadd.f32 %v2494_v37, %v11769_v48  ;;  %v11917_v38 = vadd.f32 %v2576_v55, %v11772_v22  ;;  %v10347_v37 = vld [vmem:[%s13366_s2 + $0x4c0] ss:$24 sps:$4 sm:$0xff]   ;;  %v10352_v55 = vld [vmem:[%s13366_s2 + $0x484] ss:$24 sps:$4 sm:$0xff]  }
 0x4d6   : > { %v2496_v32 = vpop.f32.mrf.mxu1  ;;  %v2578_v36 = vpop.f32.mrf.mxu0 }
 0x4d7   : > { %v11920_v59 = vadd.f32 %v2496_v32, %v11775_v52  ;;  %v11923_v42 = vadd.f32 %v2578_v36, %v11778_v25  ;;  %v10350_v32 = vld [vmem:[%s13366_s2 + $0x480] ss:$24 sps:$4 sm:$0xff]   ;;  %v10355_v36 = vld [vmem:[%s13366_s2 + $0x494] ss:$24 sps:$4 sm:$0xff]  }
 0x4d8   : > { %v2498_v60 = vpop.f32.mrf.mxu1  ;;  %v2580_v61 = vpop.f32.mrf.mxu0 }
 0x4d9   : > { %v10353_v60 = vld [vmem:[%s13366_s2 + $0x490] ss:$24 sps:$4 sm:$0xff]   ;;  %v10358_v61 = vld [vmem:[%s13366_s2 + $0x51c] ss:$24 sps:$4 sm:$0xff]  }
 0x4da   : > { %v2499_v43 = vpop.f32.mrf.mxu1  ;;  %v2581_v62 = vpop.f32.mrf.mxu0 }
 0x4e4   : > { %v2535_v63 = vpop.f32.mrf.mxu1 }
 0x4e5   : > { %v11926_v0 = vadd.f32 %v2535_v63, %v11781_v58 }
 0x4e6   : > { %v2537_v48 = vpop.f32.mrf.mxu1 }
 0x4e7   : > { %v11929_v22 = vadd.f32 %v2537_v48, %v11784_v39  ;;  %v10307_v39 = vld [vmem:[%s13366_s2 + $0x42c] ss:$24 sps:$4 sm:$0xff]  }
 0x4e8   : > { %v2539_v49 = vpop.f32.mrf.mxu1 }
 0x4ea   : > { %v2540_v33 = vpop.f32.mrf.mxu1 }
 0x504   : > { %v9647_v1 = vpop.f32.mrf.mxu1 }
 0x506   : > { %v9648_v52 = vpop.f32.mrf.mxu1 }
 0x507   : > { %v9649_v2 = vadd.f32 %v9648_v52, %v9647_v1 }
 0x508   : > { %v9650_v3 = vpop.f32.mrf.mxu1 }
 0x509   : > { %vm2766_vm6 = vcmp.gt.f32.partialorder %v9649_v2, 0.0  ;;  %v2767_v25 = vmul.f32 0.01, %v9649_v2 }
 0x50a   : > { %v9651_v4 = vpop.f32.mrf.mxu1 }
 0x50b   : > { %v2768_v5 = vsel %vm2766_vm6, %v9649_v2, %v2767_v25 }
 0x50c   : > { %v2769_v58 = vpack.c.bf16 %v2768_v5, %v2768_v5 }
 0x50e   : > { %8669 = vmatmul.mubr.msk.bf16.vlgmr.msra.gmra.mxu0 %vm842_vm1, %v2769_v58  ;;  %8671 = vmatmul.mubr.msk.bf16.vlgmr.msra.gmra.mxu1 %vm842_vm1, %v2769_v58 }
 0x50f   : > { %2968 = vmatpush1.bf16.msra.mxu0 %v10302_v6  ;;  %2991 = vmatprep.mubr.bf16.mxu0 %v11024_v56 }
 0x510   : > { %2969 = vmatprep.subr.bf16.mxu0 %v10307_v39  ;;  %3408 = vmatprep.mubr.bf16.mxu1 %v11024_v56 }
 0x511   : > { %3385 = vmatpush1.bf16.msra.mxu1 %v10332_v35  ;;  %v10379_v35 = vld [vmem:[%s13365_s1 + $0x390] sm:$0xff]  }
 0x512   : > { %3386 = vmatprep.subr.bf16.mxu1 %v10340_v45  ;;  %v10383_v45 = vld [vmem:[%s13365_s1 + $0x380] sm:$0xff]  }
 0x513   : > { %2970 = vmatpush1.bf16.msra.mxu0 %v10305_v7 }
 0x514   : > { %2971 = vmatprep.subr.bf16.mxu0 %v10310_v8 }
 0x515   : > { %3387 = vmatpush1.bf16.msra.mxu1 %v10338_v47  ;;  %v10386_v47 = vld [vmem:[%s13366_s2 + $0x5d0] ss:$24 sps:$4 sm:$0xff]  }
 0x516   : > { %3388 = vmatprep.subr.bf16.mxu1 %v10346_v51  ;;  %v10389_v51 = vld [vmem:[%s13366_s2 + $0x5e0] ss:$24 sps:$4 sm:$0xff]  }
 0x517   : > { %2972 = vmatpush1.bf16.msra.mxu0 %v10308_v9 }
 0x518   : > { %2973 = vmatprep.subr.bf16.mxu0 %v10313_v10 }
 0x519   : > { %3389 = vmatpush1.bf16.msra.mxu1 %v10344_v53  ;;  %v10391_v53 = vld [vmem:[%s13366_s2 + $0x5e4] ss:$24 sps:$4 sm:$0xff]  }
 0x51a   : > { %3390 = vmatprep.subr.bf16.mxu1 %v10352_v55  ;;  %v10392_v55 = vld [vmem:[%s13366_s2 + $0x5a0] ss:$24 sps:$4 sm:$0xff]  }
 0x51b   : > { %2974 = vmatpush1.bf16.msra.mxu0 %v10311_v11 }
 0x51c   : > { %9653 = vmatprep.subr.bf16.mxu0 %v10314_v12  ;;  %v10356_v12 = vld [vmem:[%s13366_s2 + $0x518] ss:$24 sps:$4 sm:$0xff]  }
 0x51d   : > { %3391 = vmatpush1.bf16.msra.mxu1 %v10350_v32  ;;  %v10395_v32 = vld [vmem:[%s13366_s2 + $0x5b0] ss:$24 sps:$4 sm:$0xff]  }
 0x51e   : > { %8670 = vmatmul.mubr.msk.bf16.vlgmr.msra.gmra.mxu0 %vm842_vm1, %v2769_v58  ;;  %3425 = vmatprep.subr.bf16.mxu1 %v10358_v61  ;;  %v10403_v61 = vld [vmem:[%s13366_s2 + $0x584] ss:$24 sps:$4 sm:$0xff]  }
 0x51f   : > { %9654 = vmatpush3.bf16.msra.mxu0 %v10315_v14  ;;  %3216 = vmatprep.mubr.bf16.mxu0 %v8705_v15  ;;  %v10364_v14 = vld [vmem:[%s13366_s2 + $0x4bc] ss:$24 sps:$4 sm:$0xff]   ;;  %v10362_v15 = vld [vmem:[%s13366_s2 + $0x4b8] ss:$24 sps:$4 sm:$0xff]  }
 0x520   : > { %9655 = vmatprep.subr.bf16.mxu0 %v10316_v16  ;;  %v10367_v16 = vld [vmem:[%s13366_s2 + $0x48c] ss:$24 sps:$4 sm:$0xff]  }
 0x523   : > { %9656 = vmatpush3.bf16.msra.mxu0 %v10317_v17  ;;  %v10365_v17 = vld [vmem:[%s13366_s2 + $0x488] ss:$24 sps:$4 sm:$0xff]  }
 0x524   : > { %9657 = vmatprep.subr.bf16.mxu0 %v10318_v18  ;;  %v10368_v18 = vld [vmem:[%s13365_s1 + $0x3f8] sm:$0xff]  }
 0x527   : > { %9658 = vmatpush3.bf16.msra.mxu0 %v10319_v19  ;;  %v3505_v19 = vld [vmem:[%s11192_s25 + $0x38] sm:$0xff] }
 0x528   : > { %9659 = vmatprep.subr.bf16.mxu0 %v10320_v20  ;;  %v10369_v20 = vld [vmem:[%s13365_s1 + $0x3b8] sm:$0xff]  }
 0x52b   : > { %9660 = vmatpush3.bf16.msra.mxu0 %v10321_v21  ;;  %v8806_v21 = vcombine.high %v3505_v19, %v3505_v19 }
 0x52c   : > { %9661 = vmatprep.subr.bf16.mxu0 %v10322_v23  ;;  %v10370_v23 = vld [vmem:[%s13365_s1 + $0x3f0] sm:$0xff]  }
 0x52f   : > { %9662 = vmatpush3.bf16.msra.mxu0 %v10323_v24  ;;  %v10371_v24 = vld [vmem:[%s13365_s1 + $0x3b0] sm:$0xff]  }
 0x530   : > { %9663 = vmatprep.subr.bf16.mxu0 %v10324_v26  ;;  %v10372_v26 = vld [vmem:[%s13365_s1 + $0x3e8] sm:$0xff]  }
 0x533   : > { %9664 = vmatpush3.bf16.msra.mxu0 %v10325_v27  ;;  %v10373_v27 = vld [vmem:[%s13365_s1 + $0x3a8] sm:$0xff]  }
 0x534   : > { %9665 = vmatprep.subr.bf16.mxu0 %v10326_v28  ;;  %v10374_v28 = vld [vmem:[%s13365_s1 + $0x3e0] sm:$0xff]  }
 0x537   : > { %9666 = vmatpush3.bf16.msra.mxu0 %v10327_v29  ;;  %v10375_v29 = vld [vmem:[%s13365_s1 + $0x3a0] sm:$0xff]  }
 0x538   : > { %9667 = vmatprep.subr.bf16.mxu0 %v10328_v30  ;;  %v10376_v30 = vld [vmem:[%s13365_s1 + $0x3d8] sm:$0xff]  }
 0x53b   : > { %9668 = vmatpush3.bf16.msra.mxu0 %v10329_v31  ;;  %v10377_v31 = vld [vmem:[%s13365_s1 + $0x398] sm:$0xff]  }
 0x53c   : > { %3466 = vmatprep.subr.bf16.mxu0 %v10337_v44  ;;  %v10382_v44 = vld [vmem:[%s13365_s1 + $0x3c0] sm:$0xff]  }
 0x53e   : > { %3217 = vmatmul.mubr.bf16.vlgmr.msra.gmra.mxu0 %v8704_v34  ;;  %v10378_v34 = vld [vmem:[%s13365_s1 + $0x3d0] sm:$0xff]  }
 0x53f   : > { %3490 = vmatprep.mubr.bf16.mxu0 %v11024_v56  ;;  %3467 = vmatpush1.bf16.msra.mxu0 %v10335_v41  ;;  %v10381_v41 = vld [vmem:[%s13365_s1 + $0x388] sm:$0xff]  }
 0x540   : > { %3468 = vmatprep.subr.bf16.mxu0 %v10343_v46  ;;  %v8805_v46 = vcombine.low %v3505_v19, %v3505_v19  ;;  %v10413_v19 = vld [vmem:[%s13366_s2 + $0x5a8] ss:$24 sps:$4 sm:$0xff]  }
 0x543   : > { %3469 = vmatpush1.bf16.msra.mxu0 %v10341_v50  ;;  %v10388_v50 = vld [vmem:[%s13366_s2 + $0x5d4] ss:$24 sps:$4 sm:$0xff]  }
 0x544   : > { %3470 = vmatprep.subr.bf16.mxu0 %v10349_v54  ;;  %v10394_v54 = vld [vmem:[%s13366_s2 + $0x5a4] ss:$24 sps:$4 sm:$0xff]  }
 0x547   : > { %3471 = vmatpush1.bf16.msra.mxu0 %v10347_v37  ;;  %v10397_v37 = vld [vmem:[%s13366_s2 + $0x5b4] ss:$24 sps:$4 sm:$0xff]  }
 0x548   : > { %3472 = vmatprep.subr.bf16.mxu0 %v10355_v36  ;;  %v10400_v36 = vld [vmem:[%s13366_s2 + $0x574] ss:$24 sps:$4 sm:$0xff]  }
 0x54b   : > { %3473 = vmatpush1.bf16.msra.mxu0 %v10353_v60  ;;  %v10398_v60 = vld [vmem:[%s13366_s2 + $0x570] ss:$24 sps:$4 sm:$0xff]  }
 0x54c   : > { %3842 = vmatprep.subr.bf16.mxu0 %v10388_v50  ;;  %v10434_v50 = vld [vmem:[%s13365_s1 + $0x448] sm:$0xff]  }
 0x5ce   : > { %v2952_v43 = vpop.f32.mrf.mxu0  ;;  %v3034_v62 = vpop.f32.mrf.mxu1 }
 0x5cf   : > { %v12059_v63 = vadd.f32 %v2952_v43, %v11914_v57  ;;  %v12062_v48 = vadd.f32 %v3034_v62, %v11917_v38  ;;  %v10401_v43 = vld [vmem:[%s13366_s2 + $0x580] ss:$24 sps:$4 sm:$0xff]   ;;  %v10406_v62 = vld [vmem:[%s13366_s2 + $0x544] ss:$24 sps:$4 sm:$0xff]  }
 0x5d0   : > { %v2954_v49 = vpop.f32.mrf.mxu0  ;;  %v3036_v33 = vpop.f32.mrf.mxu1 }
 0x5d1   : > { %v12065_v1 = vadd.f32 %v2954_v49, %v11920_v59  ;;  %v12068_v52 = vadd.f32 %v3036_v33, %v11923_v42  ;;  %v10404_v49 = vld [vmem:[%s13366_s2 + $0x540] ss:$24 sps:$4 sm:$0xff]   ;;  %v10409_v33 = vld [vmem:[%s13366_s2 + $0x554] ss:$24 sps:$4 sm:$0xff]  }
 0x5d2   : > { %v2956_v2 = vpop.f32.mrf.mxu0  ;;  %v3038_v3 = vpop.f32.mrf.mxu1 }
 0x5d3   : > { %v10407_v2 = vld [vmem:[%s13366_s2 + $0x550] ss:$24 sps:$4 sm:$0xff]   ;;  %v10412_v3 = vld [vmem:[%s13366_s2 + $0x5dc] ss:$24 sps:$4 sm:$0xff]  }
 0x5d4   : > { %v2957_v25 = vpop.f32.mrf.mxu0  ;;  %v3039_v4 = vpop.f32.mrf.mxu1 }
 0x5de   : > { %v2993_v5 = vpop.f32.mrf.mxu0 }
 0x5df   : > { %v12071_v6 = vadd.f32 %v2993_v5, %v11926_v0 }
 0x5e0   : > { %v2995_v57 = vpop.f32.mrf.mxu0 }
 0x5e1   : > { %v12074_v38 = vadd.f32 %v2995_v57, %v11929_v22  ;;  %v10361_v22 = vld [vmem:[%s13366_s2 + $0x4ec] ss:$24 sps:$4 sm:$0xff]  }
 0x5e2   : > { %v2997_v58 = vpop.f32.mrf.mxu0 }
 0x5e4   : > { %v2998_v39 = vpop.f32.mrf.mxu0 }
 0x5fe   : > { %v9669_v7 = vpop.f32.mrf.mxu0 }
 0x600   : > { %v9670_v59 = vpop.f32.mrf.mxu0 }
 0x601   : > { %v9671_v8 = vadd.f32 %v9670_v59, %v9669_v7 }
 0x602   : > { %v9672_v9 = vpop.f32.mrf.mxu0 }
 0x603   : > { %vm3224_vm7 = vcmp.gt.f32.partialorder %v9671_v8, 0.0  ;;  %v3225_v42 = vmul.f32 0.01, %v9671_v8 }
 0x604   : > { %v9673_v10 = vpop.f32.mrf.mxu0 }
 0x605   : > { %v3226_v11 = vsel %vm3224_vm7, %v9671_v8, %v3225_v42 }
 0x606   : > { %v3227_v0 = vpack.c.bf16 %v3226_v11, %v3226_v11 }
 0x608   : > { %8770 = vmatmul.mubr.msk.bf16.vlgmr.msra.gmra.mxu1 %vm842_vm1, %v3227_v0  ;;  %8772 = vmatmul.mubr.msk.bf16.vlgmr.msra.gmra.mxu0 %vm842_vm1, %v3227_v0 }
 0x609   : > { %3426 = vmatpush1.bf16.msra.mxu1 %v10356_v12  ;;  %3449 = vmatprep.mubr.bf16.mxu1 %v11024_v56 }
 0x60a   : > { %3427 = vmatprep.subr.bf16.mxu1 %v10361_v22  ;;  %3866 = vmatprep.mubr.bf16.mxu0 %v11024_v56 }
 0x60b   : > { %3843 = vmatpush1.bf16.msra.mxu0 %v10386_v47  ;;  %v10433_v47 = vld [vmem:[%s13365_s1 + $0x410] sm:$0xff]  }
 0x60c   : > { %3844 = vmatprep.subr.bf16.mxu0 %v10394_v54  ;;  %v10437_v54 = vld [vmem:[%s13365_s1 + $0x400] sm:$0xff]  }
 0x60d   : > { %3428 = vmatpush1.bf16.msra.mxu1 %v10359_v13 }
 0x60e   : > { %3429 = vmatprep.subr.bf16.mxu1 %v10364_v14 }
 0x60f   : > { %3845 = vmatpush1.bf16.msra.mxu0 %v10392_v55  ;;  %v10440_v55 = vld [vmem:[%s13366_s2 + $0x690] ss:$24 sps:$4 sm:$0xff]  }
 0x610   : > { %3846 = vmatprep.subr.bf16.mxu0 %v10400_v36  ;;  %v10443_v36 = vld [vmem:[%s13366_s2 + $0x6a0] ss:$24 sps:$4 sm:$0xff]  }
 0x611   : > { %3430 = vmatpush1.bf16.msra.mxu1 %v10362_v15 }
 0x612   : > { %3431 = vmatprep.subr.bf16.mxu1 %v10367_v16 }
 0x613   : > { %3847 = vmatpush1.bf16.msra.mxu0 %v10398_v60  ;;  %v10445_v60 = vld [vmem:[%s13366_s2 + $0x6a4] ss:$24 sps:$4 sm:$0xff]  }
 0x614   : > { %3848 = vmatprep.subr.bf16.mxu0 %v10406_v62  ;;  %v10446_v62 = vld [vmem:[%s13366_s2 + $0x660] ss:$24 sps:$4 sm:$0xff]  }
 0x615   : > { %3432 = vmatpush1.bf16.msra.mxu1 %v10365_v17 }
 0x616   : > { %9675 = vmatprep.subr.bf16.mxu1 %v10368_v18  ;;  %v10410_v18 = vld [vmem:[%s13366_s2 + $0x5d8] ss:$24 sps:$4 sm:$0xff]  }
 0x617   : > { %3849 = vmatpush1.bf16.msra.mxu0 %v10404_v49  ;;  %v10449_v49 = vld [vmem:[%s13366_s2 + $0x670] ss:$24 sps:$4 sm:$0xff]  }
 0x618   : > { %8771 = vmatmul.mubr.msk.bf16.vlgmr.msra.gmra.mxu1 %vm842_vm1, %v3227_v0  ;;  %3883 = vmatprep.subr.bf16.mxu0 %v10412_v3  ;;  %v10457_v3 = vld [vmem:[%s13366_s2 + $0x644] ss:$24 sps:$4 sm:$0xff]  }
 0x619   : > { %9676 = vmatpush3.bf16.msra.mxu1 %v10369_v20  ;;  %3674 = vmatprep.mubr.bf16.mxu1 %v8806_v21  ;;  %v10418_v20 = vld [vmem:[%s13366_s2 + $0x57c] ss:$24 sps:$4 sm:$0xff]   ;;  %v10416_v21 = vld [vmem:[%s13366_s2 + $0x578] ss:$24 sps:$4 sm:$0xff]  }
 0x61a   : > { %9677 = vmatprep.subr.bf16.mxu1 %v10370_v23  ;;  %v10421_v23 = vld [vmem:[%s13366_s2 + $0x54c] ss:$24 sps:$4 sm:$0xff]  }
 0x61d   : > { %9678 = vmatpush3.bf16.msra.mxu1 %v10371_v24  ;;  %v10419_v24 = vld [vmem:[%s13366_s2 + $0x548] ss:$24 sps:$4 sm:$0xff]  }
 0x61e   : > { %9679 = vmatprep.subr.bf16.mxu1 %v10372_v26  ;;  %v10422_v26 = vld [vmem:[%s13365_s1 + $0x478] sm:$0xff]  }
 0x621   : > { %9680 = vmatpush3.bf16.msra.mxu1 %v10373_v27  ;;  %v3963_v27 = vld [vmem:[%s11192_s25 + $0x40] sm:$0xff] }
 0x622   : > { %9681 = vmatprep.subr.bf16.mxu1 %v10374_v28  ;;  %v10423_v28 = vld [vmem:[%s13365_s1 + $0x438] sm:$0xff]  }
 0x625   : > { %9682 = vmatpush3.bf16.msra.mxu1 %v10375_v29  ;;  %v8907_v29 = vcombine.high %v3963_v27, %v3963_v27 }
 0x626   : > { %9683 = vmatprep.subr.bf16.mxu1 %v10376_v30  ;;  %v10424_v30 = vld [vmem:[%s13365_s1 + $0x470] sm:$0xff]  }
 0x629   : > { %9684 = vmatpush3.bf16.msra.mxu1 %v10377_v31  ;;  %v10425_v31 = vld [vmem:[%s13365_s1 + $0x430] sm:$0xff]  }
 0x62a   : > { %9685 = vmatprep.subr.bf16.mxu1 %v10378_v34  ;;  %v10426_v34 = vld [vmem:[%s13365_s1 + $0x468] sm:$0xff]  }
 0x62d   : > { %9686 = vmatpush3.bf16.msra.mxu1 %v10379_v35  ;;  %v10427_v35 = vld [vmem:[%s13365_s1 + $0x428] sm:$0xff]  }
 0x62e   : > { %9687 = vmatprep.subr.bf16.mxu1 %v10380_v40  ;;  %v10428_v40 = vld [vmem:[%s13365_s1 + $0x460] sm:$0xff]  }
 0x631   : > { %9688 = vmatpush3.bf16.msra.mxu1 %v10381_v41  ;;  %v10429_v41 = vld [vmem:[%s13365_s1 + $0x420] sm:$0xff]  }
 0x632   : > { %9689 = vmatprep.subr.bf16.mxu1 %v10382_v44  ;;  %v10430_v44 = vld [vmem:[%s13365_s1 + $0x458] sm:$0xff]  }
 0x635   : > { %9690 = vmatpush3.bf16.msra.mxu1 %v10383_v45  ;;  %v10431_v45 = vld [vmem:[%s13365_s1 + $0x418] sm:$0xff]  }
 0x636   : > { %3924 = vmatprep.subr.bf16.mxu1 %v10391_v53  ;;  %v10436_v53 = vld [vmem:[%s13365_s1 + $0x440] sm:$0xff]  }
 0x638   : > { %3675 = vmatmul.mubr.bf16.vlgmr.msra.gmra.mxu1 %v8805_v46  ;;  %v10432_v46 = vld [vmem:[%s13365_s1 + $0x450] sm:$0xff]  }
 0x639   : > { %3948 = vmatprep.mubr.bf16.mxu1 %v11024_v56  ;;  %3925 = vmatpush1.bf16.msra.mxu1 %v10389_v51  ;;  %v10435_v51 = vld [vmem:[%s13365_s1 + $0x408] sm:$0xff]  }
 0x63a   : > { %3926 = vmatprep.subr.bf16.mxu1 %v10397_v37  ;;  %v8906_v37 = vcombine.low %v3963_v27, %v3963_v27  ;;  %v10467_v27 = vld [vmem:[%s13366_s2 + $0x668] ss:$24 sps:$4 sm:$0xff]  }
 0x63d   : > { %3927 = vmatpush1.bf16.msra.mxu1 %v10395_v32  ;;  %v10442_v32 = vld [vmem:[%s13366_s2 + $0x694] ss:$24 sps:$4 sm:$0xff]  }
 0x63e   : > { %3928 = vmatprep.subr.bf16.mxu1 %v10403_v61  ;;  %v10448_v61 = vld [vmem:[%s13366_s2 + $0x664] ss:$24 sps:$4 sm:$0xff]  }
 0x641   : > { %3929 = vmatpush1.bf16.msra.mxu1 %v10401_v43  ;;  %v10451_v43 = vld [vmem:[%s13366_s2 + $0x674] ss:$24 sps:$4 sm:$0xff]  }
 0x642   : > { %3930 = vmatprep.subr.bf16.mxu1 %v10409_v33  ;;  %v10454_v33 = vld [vmem:[%s13366_s2 + $0x634] ss:$24 sps:$4 sm:$0xff]  }
 0x645   : > { %3931 = vmatpush1.bf16.msra.mxu1 %v10407_v2  ;;  %v10452_v2 = vld [vmem:[%s13366_s2 + $0x630] ss:$24 sps:$4 sm:$0xff]  }
 0x646   : > { %4300 = vmatprep.subr.bf16.mxu1 %v10442_v32  ;;  %v10488_v32 = vld [vmem:[%s13365_s1 + $0x4c8] sm:$0xff]  }
 0x6c8   : > { %v3410_v25 = vpop.f32.mrf.mxu1  ;;  %v3492_v4 = vpop.f32.mrf.mxu0 }
 0x6c9   : > { %v12204_v5 = vadd.f32 %v3410_v25, %v12059_v63  ;;  %v12207_v57 = vadd.f32 %v3492_v4, %v12062_v48  ;;  %v10455_v25 = vld [vmem:[%s13366_s2 + $0x640] ss:$24 sps:$4 sm:$0xff]   ;;  %v10460_v4 = vld [vmem:[%s13366_s2 + $0x604] ss:$24 sps:$4 sm:$0xff]  }
 0x6ca   : > { %v3412_v58 = vpop.f32.mrf.mxu1  ;;  %v3494_v39 = vpop.f32.mrf.mxu0 }
 0x6cb   : > { %v12210_v7 = vadd.f32 %v3412_v58, %v12065_v1  ;;  %v12213_v59 = vadd.f32 %v3494_v39, %v12068_v52  ;;  %v10458_v58 = vld [vmem:[%s13366_s2 + $0x600] ss:$24 sps:$4 sm:$0xff]   ;;  %v10463_v39 = vld [vmem:[%s13366_s2 + $0x614] ss:$24 sps:$4 sm:$0xff]  }
 0x6cc   : > { %v3414_v8 = vpop.f32.mrf.mxu1  ;;  %v3496_v9 = vpop.f32.mrf.mxu0 }
 0x6cd   : > { %v10461_v8 = vld [vmem:[%s13366_s2 + $0x610] ss:$24 sps:$4 sm:$0xff]   ;;  %v10466_v9 = vld [vmem:[%s13366_s2 + $0x69c] ss:$24 sps:$4 sm:$0xff]  }
 0x6ce   : > { %v3415_v42 = vpop.f32.mrf.mxu1  ;;  %v3497_v10 = vpop.f32.mrf.mxu0 }
 0x6d8   : > { %v3451_v11 = vpop.f32.mrf.mxu1 }
 0x6d9   : > { %v12216_v12 = vadd.f32 %v3451_v11, %v12071_v6 }
 0x6da   : > { %v3453_v63 = vpop.f32.mrf.mxu1 }
 0x6db   : > { %v12219_v48 = vadd.f32 %v3453_v63, %v12074_v38  ;;  %v10415_v38 = vld [vmem:[%s13366_s2 + $0x5ac] ss:$24 sps:$4 sm:$0xff]  }
 0x6dc   : > { %v3455_v0 = vpop.f32.mrf.mxu1 }
 0x6de   : > { %v3456_v22 = vpop.f32.mrf.mxu1 }
 0x6f8   : > { %v9691_v13 = vpop.f32.mrf.mxu1 }
 0x6fa   : > { %v9692_v1 = vpop.f32.mrf.mxu1 }
 0x6fb   : > { %v9693_v14 = vadd.f32 %v9692_v1, %v9691_v13 }
 0x6fc   : > { %v9694_v15 = vpop.f32.mrf.mxu1 }
 0x6fd   : > { %vm3682_vm8 = vcmp.gt.f32.partialorder %v9693_v14, 0.0  ;;  %v3683_v52 = vmul.f32 0.01, %v9693_v14 }
 0x6fe   : > { %v9695_v16 = vpop.f32.mrf.mxu1 }
 0x6ff   : > { %v3684_v17 = vsel %vm3682_vm8, %v9693_v14, %v3683_v52 }
 0x700   : > { %v3685_v6 = vpack.c.bf16 %v3684_v17, %v3684_v17 }
 0x702   : > { %8871 = vmatmul.mubr.msk.bf16.vlgmr.msra.gmra.mxu0 %vm842_vm1, %v3685_v6  ;;  %8873 = vmatmul.mubr.msk.bf16.vlgmr.msra.gmra.mxu1 %vm842_vm1, %v3685_v6 }
 0x703   : > { %3884 = vmatpush1.bf16.msra.mxu0 %v10410_v18  ;;  %3907 = vmatprep.mubr.bf16.mxu0 %v11024_v56 }
 0x704   : > { %3885 = vmatprep.subr.bf16.mxu0 %v10415_v38  ;;  %4324 = vmatprep.mubr.bf16.mxu1 %v11024_v56 }
 0x705   : > { %4301 = vmatpush1.bf16.msra.mxu1 %v10440_v55  ;;  %v10487_v55 = vld [vmem:[%s13365_s1 + $0x490] sm:$0xff]  }
 0x706   : > { %4302 = vmatprep.subr.bf16.mxu1 %v10448_v61  ;;  %v10491_v61 = vld [vmem:[%s13365_s1 + $0x480] sm:$0xff]  }
 0x707   : > { %3886 = vmatpush1.bf16.msra.mxu0 %v10413_v19 }
 0x708   : > { %3887 = vmatprep.subr.bf16.mxu0 %v10418_v20 }
 0x709   : > { %4303 = vmatpush1.bf16.msra.mxu1 %v10446_v62  ;;  %v10494_v62 = vld [vmem:[%s13366_s2 + $0x750] ss:$24 sps:$4 sm:$0xff]  }
 0x70a   : > { %4304 = vmatprep.subr.bf16.mxu1 %v10454_v33  ;;  %v10497_v33 = vld [vmem:[%s13366_s2 + $0x760] ss:$24 sps:$4 sm:$0xff]  }
 0x70b   : > { %3888 = vmatpush1.bf16.msra.mxu0 %v10416_v21 }
 0x70c   : > { %3889 = vmatprep.subr.bf16.mxu0 %v10421_v23 }
 0x70d   : > { %4305 = vmatpush1.bf16.msra.mxu1 %v10452_v2  ;;  %v10499_v2 = vld [vmem:[%s13366_s2 + $0x764] ss:$24 sps:$4 sm:$0xff]  }
 0x70e   : > { %4306 = vmatprep.subr.bf16.mxu1 %v10460_v4  ;;  %v10500_v4 = vld [vmem:[%s13366_s2 + $0x720] ss:$24 sps:$4 sm:$0xff]  }
 0x70f   : > { %3890 = vmatpush1.bf16.msra.mxu0 %v10419_v24 }
 0x710   : > { %9697 = vmatprep.subr.bf16.mxu0 %v10422_v26  ;;  %v10464_v26 = vld [vmem:[%s13366_s2 + $0x698] ss:$24 sps:$4 sm:$0xff]  }
 0x711   : > { %4307 = vmatpush1.bf16.msra.mxu1 %v10458_v58  ;;  %v10503_v58 = vld [vmem:[%s13366_s2 + $0x730] ss:$24 sps:$4 sm:$0xff]  }
 0x712   : > { %8872 = vmatmul.mubr.msk.bf16.vlgmr.msra.gmra.mxu0 %vm842_vm1, %v3685_v6  ;;  %4341 = vmatprep.subr.bf16.mxu1 %v10466_v9  ;;  %v10511_v9 = vld [vmem:[%s13366_s2 + $0x704] ss:$24 sps:$4 sm:$0xff]  }
 0x713   : > { %9698 = vmatpush3.bf16.msra.mxu0 %v10423_v28  ;;  %4132 = vmatprep.mubr.bf16.mxu0 %v8907_v29  ;;  %v10472_v28 = vld [vmem:[%s13366_s2 + $0x63c] ss:$24 sps:$4 sm:$0xff]   ;;  %v10470_v29 = vld [vmem:[%s13366_s2 + $0x638] ss:$24 sps:$4 sm:$0xff]  }
 0x714   : > { %9699 = vmatprep.subr.bf16.mxu0 %v10424_v30  ;;  %v10475_v30 = vld [vmem:[%s13366_s2 + $0x60c] ss:$24 sps:$4 sm:$0xff]  }
 0x717   : > { %9700 = vmatpush3.bf16.msra.mxu0 %v10425_v31  ;;  %v10473_v31 = vld [vmem:[%s13366_s2 + $0x608] ss:$24 sps:$4 sm:$0xff]  }
 0x718   : > { %9701 = vmatprep.subr.bf16.mxu0 %v10426_v34  ;;  %v10476_v34 = vld [vmem:[%s13365_s1 + $0x4f8] sm:$0xff]  }
 0x71b   : > { %9702 = vmatpush3.bf16.msra.mxu0 %v10427_v35  ;;  %v4421_v35 = vld [vmem:[%s11192_s25 + $0x48] sm:$0xff] }
 0x71c   : > { %9703 = vmatprep.subr.bf16.mxu0 %v10428_v40  ;;  %v10477_v40 = vld [vmem:[%s13365_s1 + $0x4b8] sm:$0xff]  }
 0x71f   : > { %9704 = vmatpush3.bf16.msra.mxu0 %v10429_v41  ;;  %v9008_v41 = vcombine.high %v4421_v35, %v4421_v35 }
 0x720   : > { %9705 = vmatprep.subr.bf16.mxu0 %v10430_v44  ;;  %v10478_v44 = vld [vmem:[%s13365_s1 + $0x4f0] sm:$0xff]  }
 0x723   : > { %9706 = vmatpush3.bf16.msra.mxu0 %v10431_v45  ;;  %v10479_v45 = vld [vmem:[%s13365_s1 + $0x4b0] sm:$0xff]  }
 0x724   : > { %9707 = vmatprep.subr.bf16.mxu0 %v10432_v46  ;;  %v10480_v46 = vld [vmem:[%s13365_s1 + $0x4e8] sm:$0xff]  }
 0x727   : > { %9708 = vmatpush3.bf16.msra.mxu0 %v10433_v47  ;;  %v10481_v47 = vld [vmem:[%s13365_s1 + $0x4a8] sm:$0xff]  }
 0x728   : > { %9709 = vmatprep.subr.bf16.mxu0 %v10434_v50  ;;  %v10482_v50 = vld [vmem:[%s13365_s1 + $0x4e0] sm:$0xff]  }
 0x72b   : > { %9710 = vmatpush3.bf16.msra.mxu0 %v10435_v51  ;;  %v10483_v51 = vld [vmem:[%s13365_s1 + $0x4a0] sm:$0xff]  }
 0x72c   : > { %9711 = vmatprep.subr.bf16.mxu0 %v10436_v53  ;;  %v10484_v53 = vld [vmem:[%s13365_s1 + $0x4d8] sm:$0xff]  }
 0x72f   : > { %9712 = vmatpush3.bf16.msra.mxu0 %v10437_v54  ;;  %v10485_v54 = vld [vmem:[%s13365_s1 + $0x498] sm:$0xff]  }
 0x730   : > { %4382 = vmatprep.subr.bf16.mxu0 %v10445_v60  ;;  %v10490_v60 = vld [vmem:[%s13365_s1 + $0x4c0] sm:$0xff]  }
 0x732   : > { %4133 = vmatmul.mubr.bf16.vlgmr.msra.gmra.mxu0 %v8906_v37  ;;  %v10486_v37 = vld [vmem:[%s13365_s1 + $0x4d0] sm:$0xff]  }
 0x733   : > { %4406 = vmatprep.mubr.bf16.mxu0 %v11024_v56  ;;  %4383 = vmatpush1.bf16.msra.mxu0 %v10443_v36  ;;  %v10489_v36 = vld [vmem:[%s13365_s1 + $0x488] sm:$0xff]  }
 0x734   : > { %4384 = vmatprep.subr.bf16.mxu0 %v10451_v43  ;;  %v9007_v43 = vcombine.low %v4421_v35, %v4421_v35  ;;  %v10521_v35 = vld [vmem:[%s13366_s2 + $0x728] ss:$24 sps:$4 sm:$0xff]  }
 0x737   : > { %4385 = vmatpush1.bf16.msra.mxu0 %v10449_v49  ;;  %v10496_v49 = vld [vmem:[%s13366_s2 + $0x754] ss:$24 sps:$4 sm:$0xff]  }
 0x738   : > { %4386 = vmatprep.subr.bf16.mxu0 %v10457_v3  ;;  %v10502_v3 = vld [vmem:[%s13366_s2 + $0x724] ss:$24 sps:$4 sm:$0xff]  }
 0x73b   : > { %4387 = vmatpush1.bf16.msra.mxu0 %v10455_v25  ;;  %v10505_v25 = vld [vmem:[%s13366_s2 + $0x734] ss:$24 sps:$4 sm:$0xff]  }
 0x73c   : > { %4388 = vmatprep.subr.bf16.mxu0 %v10463_v39  ;;  %v10508_v39 = vld [vmem:[%s13366_s2 + $0x6f4] ss:$24 sps:$4 sm:$0xff]  }
 0x73f   : > { %4389 = vmatpush1.bf16.msra.mxu0 %v10461_v8  ;;  %v10506_v8 = vld [vmem:[%s13366_s2 + $0x6f0] ss:$24 sps:$4 sm:$0xff]  }
 0x740   : > { %4758 = vmatprep.subr.bf16.mxu0 %v10496_v49  ;;  %v10542_v49 = vld [vmem:[%s13365_s1 + $0x548] sm:$0xff]  }
 0x7c2   : > { %v3868_v42 = vpop.f32.mrf.mxu0  ;;  %v3950_v10 = vpop.f32.mrf.mxu1 }
 0x7c3   : > { %v12349_v11 = vadd.f32 %v3868_v42, %v12204_v5  ;;  %v12352_v63 = vadd.f32 %v3950_v10, %v12207_v57  ;;  %v10509_v42 = vld [vmem:[%s13366_s2 + $0x700] ss:$24 sps:$4 sm:$0xff]   ;;  %v10514_v10 = vld [vmem:[%s13366_s2 + $0x6c4] ss:$24 sps:$4 sm:$0xff]  }
 0x7c4   : > { %v3870_v0 = vpop.f32.mrf.mxu0  ;;  %v3952_v22 = vpop.f32.mrf.mxu1 }
 0x7c5   : > { %v12355_v13 = vadd.f32 %v3870_v0, %v12210_v7  ;;  %v12358_v1 = vadd.f32 %v3952_v22, %v12213_v59  ;;  %v10512_v0 = vld [vmem:[%s13366_s2 + $0x6c0] ss:$24 sps:$4 sm:$0xff]   ;;  %v10517_v22 = vld [vmem:[%s13366_s2 + $0x6d4] ss:$24 sps:$4 sm:$0xff]  }
 0x7c6   : > { %v3872_v14 = vpop.f32.mrf.mxu0  ;;  %v3954_v15 = vpop.f32.mrf.mxu1 }
 0x7c7   : > { %v10515_v14 = vld [vmem:[%s13366_s2 + $0x6d0] ss:$24 sps:$4 sm:$0xff]   ;;  %v10520_v15 = vld [vmem:[%s13366_s2 + $0x75c] ss:$24 sps:$4 sm:$0xff]  }
 0x7c8   : > { %v3873_v52 = vpop.f32.mrf.mxu0  ;;  %v3955_v16 = vpop.f32.mrf.mxu1 }
 0x7d2   : > { %v3909_v17 = vpop.f32.mrf.mxu0 }
 0x7d3   : > { %v12361_v18 = vadd.f32 %v3909_v17, %v12216_v12 }
 0x7d4   : > { %v3911_v5 = vpop.f32.mrf.mxu0 }
 0x7d5   : > { %v12364_v57 = vadd.f32 %v3911_v5, %v12219_v48  ;;  %v10469_v48 = vld [vmem:[%s13366_s2 + $0x66c] ss:$24 sps:$4 sm:$0xff]  }
 0x7d6   : > { %v3913_v6 = vpop.f32.mrf.mxu0 }
 0x7d8   : > { %v3914_v38 = vpop.f32.mrf.mxu0 }
 0x7f2   : > { %v9713_v19 = vpop.f32.mrf.mxu0 }
 0x7f4   : > { %v9714_v7 = vpop.f32.mrf.mxu0 }
 0x7f5   : > { %v9715_v20 = vadd.f32 %v9714_v7, %v9713_v19 }
 0x7f6   : > { %v9716_v21 = vpop.f32.mrf.mxu0 }
 0x7f7   : > { %vm4140_vm9 = vcmp.gt.f32.partialorder %v9715_v20, 0.0  ;;  %v4141_v59 = vmul.f32 0.01, %v9715_v20 }
 0x7f8   : > { %v9717_v23 = vpop.f32.mrf.mxu0 }
 0x7f9   : > { %v4142_v24 = vsel %vm4140_vm9, %v9715_v20, %v4141_v59 }
 0x7fa   : > { %v4143_v12 = vpack.c.bf16 %v4142_v24, %v4142_v24 }
 0x7fc   : > { %8972 = vmatmul.mubr.msk.bf16.vlgmr.msra.gmra.mxu1 %vm842_vm1, %v4143_v12  ;;  %8974 = vmatmul.mubr.msk.bf16.vlgmr.msra.gmra.mxu0 %vm842_vm1, %v4143_v12 }
 0x7fd   : > { %4342 = vmatpush1.bf16.msra.mxu1 %v10464_v26  ;;  %4365 = vmatprep.mubr.bf16.mxu1 %v11024_v56 }
 0x7fe   : > { %4343 = vmatprep.subr.bf16.mxu1 %v10469_v48  ;;  %4782 = vmatprep.mubr.bf16.mxu0 %v11024_v56 }
 0x7ff   : > { %4759 = vmatpush1.bf16.msra.mxu0 %v10494_v62  ;;  %v10541_v62 = vld [vmem:[%s13365_s1 + $0x510] sm:$0xff]  }
 0x800   : > { %4760 = vmatprep.subr.bf16.mxu0 %v10502_v3  ;;  %v10545_v3 = vld [vmem:[%s13365_s1 + $0x500] sm:$0xff]  }
 0x801   : > { %4344 = vmatpush1.bf16.msra.mxu1 %v10467_v27 }
 0x802   : > { %4345 = vmatprep.subr.bf16.mxu1 %v10472_v28 }
 0x803   : > { %4761 = vmatpush1.bf16.msra.mxu0 %v10500_v4  ;;  %v10548_v4 = vld [vmem:[%s13366_s2 + $0x810] ss:$24 sps:$4 sm:$0xff]  }
 0x804   : > { %4762 = vmatprep.subr.bf16.mxu0 %v10508_v39  ;;  %v10551_v39 = vld [vmem:[%s13366_s2 + $0x820] ss:$24 sps:$4 sm:$0xff]  }
 0x805   : > { %4346 = vmatpush1.bf16.msra.mxu1 %v10470_v29 }
 0x806   : > { %4347 = vmatprep.subr.bf16.mxu1 %v10475_v30 }
 0x807   : > { %4763 = vmatpush1.bf16.msra.mxu0 %v10506_v8  ;;  %v10553_v8 = vld [vmem:[%s13366_s2 + $0x824] ss:$24 sps:$4 sm:$0xff]  }
 0x808   : > { %4764 = vmatprep.subr.bf16.mxu0 %v10514_v10  ;;  %v10554_v10 = vld [vmem:[%s13366_s2 + $0x7e0] ss:$24 sps:$4 sm:$0xff]  }
 0x809   : > { %4348 = vmatpush1.bf16.msra.mxu1 %v10473_v31 }
 0x80a   : > { %9719 = vmatprep.subr.bf16.mxu1 %v10476_v34  ;;  %v10518_v34 = vld [vmem:[%s13366_s2 + $0x758] ss:$24 sps:$4 sm:$0xff]  }
 0x80b   : > { %4765 = vmatpush1.bf16.msra.mxu0 %v10512_v0  ;;  %v10557_v0 = vld [vmem:[%s13366_s2 + $0x7f0] ss:$24 sps:$4 sm:$0xff]  }
 0x80c   : > { %8973 = vmatmul.mubr.msk.bf16.vlgmr.msra.gmra.mxu1 %vm842_vm1, %v4143_v12  ;;  %4799 = vmatprep.subr.bf16.mxu0 %v10520_v15  ;;  %v10565_v15 = vld [vmem:[%s13366_s2 + $0x7c4] ss:$24 sps:$4 sm:$0xff]  }
 0x80d   : > { %9720 = vmatpush3.bf16.msra.mxu1 %v10477_v40  ;;  %4590 = vmatprep.mubr.bf16.mxu1 %v9008_v41  ;;  %v10526_v40 = vld [vmem:[%s13366_s2 + $0x6fc] ss:$24 sps:$4 sm:$0xff]   ;;  %v10524_v41 = vld [vmem:[%s13366_s2 + $0x6f8] ss:$24 sps:$4 sm:$0xff]  }
 0x80e   : > { %9721 = vmatprep.subr.bf16.mxu1 %v10478_v44  ;;  %v10529_v44 = vld [vmem:[%s13366_s2 + $0x6cc] ss:$24 sps:$4 sm:$0xff]  }
 0x811   : > { %9722 = vmatpush3.bf16.msra.mxu1 %v10479_v45  ;;  %v10527_v45 = vld [vmem:[%s13366_s2 + $0x6c8] ss:$24 sps:$4 sm:$0xff]  }
 0x812   : > { %9723 = vmatprep.subr.bf16.mxu1 %v10480_v46  ;;  %v10530_v46 = vld [vmem:[%s13365_s1 + $0x578] sm:$0xff]  }
 0x815   : > { %9724 = vmatpush3.bf16.msra.mxu1 %v10481_v47  ;;  %v4879_v47 = vld [vmem:[%s11192_s25 + $0x50] sm:$0xff] }
 0x816   : > { %9725 = vmatprep.subr.bf16.mxu1 %v10482_v50  ;;  %v10531_v50 = vld [vmem:[%s13365_s1 + $0x538] sm:$0xff]  }
 0x819   : > { %9726 = vmatpush3.bf16.msra.mxu1 %v10483_v51  ;;  %v9109_v51 = vcombine.high %v4879_v47, %v4879_v47 }
 0x81a   : > { %9727 = vmatprep.subr.bf16.mxu1 %v10484_v53  ;;  %v10532_v53 = vld [vmem:[%s13365_s1 + $0x570] sm:$0xff]  }
 0x81d   : > { %9728 = vmatpush3.bf16.msra.mxu1 %v10485_v54  ;;  %v10533_v54 = vld [vmem:[%s13365_s1 + $0x530] sm:$0xff]  }
 0x81e   : > { %9729 = vmatprep.subr.bf16.mxu1 %v10486_v37  ;;  %v10534_v37 = vld [vmem:[%s13365_s1 + $0x568] sm:$0xff]  }
 0x821   : > { %9730 = vmatpush3.bf16.msra.mxu1 %v10487_v55  ;;  %v10535_v55 = vld [vmem:[%s13365_s1 + $0x528] sm:$0xff]  }
 0x822   : > { %9731 = vmatprep.subr.bf16.mxu1 %v10488_v32  ;;  %v10536_v32 = vld [vmem:[%s13365_s1 + $0x560] sm:$0xff]  }
 0x825   : > { %9732 = vmatpush3.bf16.msra.mxu1 %v10489_v36  ;;  %v10537_v36 = vld [vmem:[%s13365_s1 + $0x520] sm:$0xff]  }
 0x826   : > { %9733 = vmatprep.subr.bf16.mxu1 %v10490_v60  ;;  %v10538_v60 = vld [vmem:[%s13365_s1 + $0x558] sm:$0xff]  }
 0x829   : > { %9734 = vmatpush3.bf16.msra.mxu1 %v10491_v61  ;;  %v10539_v61 = vld [vmem:[%s13365_s1 + $0x518] sm:$0xff]  }
 0x82a   : > { %4840 = vmatprep.subr.bf16.mxu1 %v10499_v2  ;;  %v10544_v2 = vld [vmem:[%s13365_s1 + $0x540] sm:$0xff]  }
 0x82c   : > { %4591 = vmatmul.mubr.bf16.vlgmr.msra.gmra.mxu1 %v9007_v43  ;;  %v10540_v43 = vld [vmem:[%s13365_s1 + $0x550] sm:$0xff]  }
 0x82d   : > { %4864 = vmatprep.mubr.bf16.mxu1 %v11024_v56  ;;  %4841 = vmatpush1.bf16.msra.mxu1 %v10497_v33  ;;  %v10543_v33 = vld [vmem:[%s13365_s1 + $0x508] sm:$0xff]  }
 0x82e   : > { %4842 = vmatprep.subr.bf16.mxu1 %v10505_v25  ;;  %v9108_v25 = vcombine.low %v4879_v47, %v4879_v47  ;;  %v10575_v47 = vld [vmem:[%s13366_s2 + $0x7e8] ss:$24 sps:$4 sm:$0xff]  }
 0x831   : > { %4843 = vmatpush1.bf16.msra.mxu1 %v10503_v58  ;;  %v10550_v58 = vld [vmem:[%s13366_s2 + $0x814] ss:$24 sps:$4 sm:$0xff]  }
 0x832   : > { %4844 = vmatprep.subr.bf16.mxu1 %v10511_v9  ;;  %v10556_v9 = vld [vmem:[%s13366_s2 + $0x7e4] ss:$24 sps:$4 sm:$0xff]  }
 0x835   : > { %4845 = vmatpush1.bf16.msra.mxu1 %v10509_v42  ;;  %v10559_v42 = vld [vmem:[%s13366_s2 + $0x7f4] ss:$24 sps:$4 sm:$0xff]  }
 0x836   : > { %4846 = vmatprep.subr.bf16.mxu1 %v10517_v22  ;;  %v10562_v22 = vld [vmem:[%s13366_s2 + $0x7b4] ss:$24 sps:$4 sm:$0xff]  }
 0x839   : > { %4847 = vmatpush1.bf16.msra.mxu1 %v10515_v14  ;;  %v10560_v14 = vld [vmem:[%s13366_s2 + $0x7b0] ss:$24 sps:$4 sm:$0xff]  }
 0x83a   : > { %5216 = vmatprep.subr.bf16.mxu1 %v10550_v58  ;;  %v10596_v58 = vld [vmem:[%s13365_s1 + $0x5c8] sm:$0xff]  }
 0x8bc   : > { %v4326_v52 = vpop.f32.mrf.mxu1  ;;  %v4408_v16 = vpop.f32.mrf.mxu0 }
 0x8bd   : > { %v12494_v17 = vadd.f32 %v4326_v52, %v12349_v11  ;;  %v12497_v5 = vadd.f32 %v4408_v16, %v12352_v63  ;;  %v10563_v52 = vld [vmem:[%s13366_s2 + $0x7c0] ss:$24 sps:$4 sm:$0xff]   ;;  %v10568_v16 = vld [vmem:[%s13366_s2 + $0x784] ss:$24 sps:$4 sm:$0xff]  }
 0x8be   : > { %v4328_v6 = vpop.f32.mrf.mxu1  ;;  %v4410_v38 = vpop.f32.mrf.mxu0 }
 0x8bf   : > { %v12500_v19 = vadd.f32 %v4328_v6, %v12355_v13  ;;  %v12503_v7 = vadd.f32 %v4410_v38, %v12358_v1  ;;  %v10566_v6 = vld [vmem:[%s13366_s2 + $0x780] ss:$24 sps:$4 sm:$0xff]   ;;  %v10571_v38 = vld [vmem:[%s13366_s2 + $0x794] ss:$24 sps:$4 sm:$0xff]  }
 0x8c0   : > { %v4330_v20 = vpop.f32.mrf.mxu1  ;;  %v4412_v21 = vpop.f32.mrf.mxu0 }
 0x8c1   : > { %v10569_v20 = vld [vmem:[%s13366_s2 + $0x790] ss:$24 sps:$4 sm:$0xff]   ;;  %v10574_v21 = vld [vmem:[%s13366_s2 + $0x81c] ss:$24 sps:$4 sm:$0xff]  }
 0x8c2   : > { %v4331_v59 = vpop.f32.mrf.mxu1  ;;  %v4413_v23 = vpop.f32.mrf.mxu0 }
 0x8cc   : > { %v4367_v24 = vpop.f32.mrf.mxu1 }
 0x8cd   : > { %v12506_v26 = vadd.f32 %v4367_v24, %v12361_v18 }
 0x8ce   : > { %v4369_v11 = vpop.f32.mrf.mxu1 }
 0x8cf   : > { %v12509_v63 = vadd.f32 %v4369_v11, %v12364_v57  ;;  %v10523_v57 = vld [vmem:[%s13366_s2 + $0x72c] ss:$24 sps:$4 sm:$0xff]  }
 0x8d0   : > { %v4371_v12 = vpop.f32.mrf.mxu1 }
 0x8d2   : > { %v4372_v48 = vpop.f32.mrf.mxu1 }
 0x8ec   : > { %v9735_v27 = vpop.f32.mrf.mxu1 }
 0x8ee   : > { %v9736_v13 = vpop.f32.mrf.mxu1 }
 0x8ef   : > { %v9737_v28 = vadd.f32 %v9736_v13, %v9735_v27 }
 0x8f0   : > { %v9738_v29 = vpop.f32.mrf.mxu1 }
 0x8f1   : > { %vm4598_vm10 = vcmp.gt.f32.partialorder %v9737_v28, 0.0  ;;  %v4599_v1 = vmul.f32 0.01, %v9737_v28 }
 0x8f2   : > { %v9739_v30 = vpop.f32.mrf.mxu1 }
 0x8f3   : > { %v4600_v31 = vsel %vm4598_vm10, %v9737_v28, %v4599_v1 }
 0x8f4   : > { %v4601_v18 = vpack.c.bf16 %v4600_v31, %v4600_v31 }
 0x8f6   : > { %9073 = vmatmul.mubr.msk.bf16.vlgmr.msra.gmra.mxu0 %vm842_vm1, %v4601_v18  ;;  %9075 = vmatmul.mubr.msk.bf16.vlgmr.msra.gmra.mxu1 %vm842_vm1, %v4601_v18 }
 0x8f7   : > { %4800 = vmatpush1.bf16.msra.mxu0 %v10518_v34  ;;  %4823 = vmatprep.mubr.bf16.mxu0 %v11024_v56 }
 0x8f8   : > { %4801 = vmatprep.subr.bf16.mxu0 %v10523_v57  ;;  %5240 = vmatprep.mubr.bf16.mxu1 %v11024_v56 }
 0x8f9   : > { %5217 = vmatpush1.bf16.msra.mxu1 %v10548_v4  ;;  %v10595_v4 = vld [vmem:[%s13365_s1 + $0x590] sm:$0xff]  }
 0x8fa   : > { %5218 = vmatprep.subr.bf16.mxu1 %v10556_v9  ;;  %v10599_v9 = vld [vmem:[%s13365_s1 + $0x580] sm:$0xff]  }
 0x8fb   : > { %4802 = vmatpush1.bf16.msra.mxu0 %v10521_v35 }
 0x8fc   : > { %4803 = vmatprep.subr.bf16.mxu0 %v10526_v40 }
 0x8fd   : > { %5219 = vmatpush1.bf16.msra.mxu1 %v10554_v10  ;;  %v10602_v10 = vld [vmem:[%s13366_s2 + $0x8d0] ss:$24 sps:$4 sm:$0xff]  }
 0x8fe   : > { %5220 = vmatprep.subr.bf16.mxu1 %v10562_v22  ;;  %v10605_v22 = vld [vmem:[%s13366_s2 + $0x8e0] ss:$24 sps:$4 sm:$0xff]  }
 0x8ff   : > { %4804 = vmatpush1.bf16.msra.mxu0 %v10524_v41 }
 0x900   : > { %4805 = vmatprep.subr.bf16.mxu0 %v10529_v44 }
 0x901   : > { %5221 = vmatpush1.bf16.msra.mxu1 %v10560_v14  ;;  %v10607_v14 = vld [vmem:[%s13366_s2 + $0x8e4] ss:$24 sps:$4 sm:$0xff]  }
 0x902   : > { %5222 = vmatprep.subr.bf16.mxu1 %v10568_v16  ;;  %v10608_v16 = vld [vmem:[%s13366_s2 + $0x8a0] ss:$24 sps:$4 sm:$0xff]  }
 0x903   : > { %4806 = vmatpush1.bf16.msra.mxu0 %v10527_v45 }
 0x904   : > { %9741 = vmatprep.subr.bf16.mxu0 %v10530_v46  ;;  %v10572_v46 = vld [vmem:[%s13366_s2 + $0x818] ss:$24 sps:$4 sm:$0xff]  }
 0x905   : > { %5223 = vmatpush1.bf16.msra.mxu1 %v10566_v6  ;;  %v10611_v6 = vld [vmem:[%s13366_s2 + $0x8b0] ss:$24 sps:$4 sm:$0xff]  }
 0x906   : > { %9074 = vmatmul.mubr.msk.bf16.vlgmr.msra.gmra.mxu0 %vm842_vm1, %v4601_v18  ;;  %5257 = vmatprep.subr.bf16.mxu1 %v10574_v21  ;;  %v10619_v21 = vld [vmem:[%s13366_s2 + $0x884] ss:$24 sps:$4 sm:$0xff]  }
 0x907   : > { %9742 = vmatpush3.bf16.msra.mxu0 %v10531_v50  ;;  %5048 = vmatprep.mubr.bf16.mxu0 %v9109_v51  ;;  %v10580_v50 = vld [vmem:[%s13366_s2 + $0x7bc] ss:$24 sps:$4 sm:$0xff]   ;;  %v10578_v51 = vld [vmem:[%s13366_s2 + $0x7b8] ss:$24 sps:$4 sm:$0xff]  }
 0x908   : > { %9743 = vmatprep.subr.bf16.mxu0 %v10532_v53  ;;  %v10583_v53 = vld [vmem:[%s13366_s2 + $0x78c] ss:$24 sps:$4 sm:$0xff]  }
 0x90b   : > { %9744 = vmatpush3.bf16.msra.mxu0 %v10533_v54  ;;  %v10581_v54 = vld [vmem:[%s13366_s2 + $0x788] ss:$24 sps:$4 sm:$0xff]  }
 0x90c   : > { %9745 = vmatprep.subr.bf16.mxu0 %v10534_v37  ;;  %v10584_v37 = vld [vmem:[%s13365_s1 + $0x5f8] sm:$0xff]  }
 0x90f   : > { %9746 = vmatpush3.bf16.msra.mxu0 %v10535_v55  ;;  %v5337_v55 = vld [vmem:[%s11192_s25 + $0x58] sm:$0xff] }
 0x910   : > { %9747 = vmatprep.subr.bf16.mxu0 %v10536_v32  ;;  %v10585_v32 = vld [vmem:[%s13365_s1 + $0x5b8] sm:$0xff]  }
 0x913   : > { %9748 = vmatpush3.bf16.msra.mxu0 %v10537_v36  ;;  %v9210_v36 = vcombine.high %v5337_v55, %v5337_v55 }
 0x914   : > { %9749 = vmatprep.subr.bf16.mxu0 %v10538_v60  ;;  %v10586_v60 = vld [vmem:[%s13365_s1 + $0x5f0] sm:$0xff]  }
 0x917   : > { %9750 = vmatpush3.bf16.msra.mxu0 %v10539_v61  ;;  %v10587_v61 = vld [vmem:[%s13365_s1 + $0x5b0] sm:$0xff]  }
 0x918   : > { %9751 = vmatprep.subr.bf16.mxu0 %v10540_v43  ;;  %v10588_v43 = vld [vmem:[%s13365_s1 + $0x5e8] sm:$0xff]  }
 0x91b   : > { %9752 = vmatpush3.bf16.msra.mxu0 %v10541_v62  ;;  %v10589_v62 = vld [vmem:[%s13365_s1 + $0x5a8] sm:$0xff]  }
 0x91c   : > { %9753 = vmatprep.subr.bf16.mxu0 %v10542_v49  ;;  %v10590_v49 = vld [vmem:[%s13365_s1 + $0x5e0] sm:$0xff]  }
 0x91f   : > { %9754 = vmatpush3.bf16.msra.mxu0 %v10543_v33  ;;  %v10591_v33 = vld [vmem:[%s13365_s1 + $0x5a0] sm:$0xff]  }
 0x920   : > { %9755 = vmatprep.subr.bf16.mxu0 %v10544_v2  ;;  %v10592_v2 = vld [vmem:[%s13365_s1 + $0x5d8] sm:$0xff]  }
 0x923   : > { %9756 = vmatpush3.bf16.msra.mxu0 %v10545_v3  ;;  %v10593_v3 = vld [vmem:[%s13365_s1 + $0x598] sm:$0xff]  }
 0x924   : > { %5298 = vmatprep.subr.bf16.mxu0 %v10553_v8  ;;  %v10598_v8 = vld [vmem:[%s13365_s1 + $0x5c0] sm:$0xff]  }
 0x926   : > { %5049 = vmatmul.mubr.bf16.vlgmr.msra.gmra.mxu0 %v9108_v25  ;;  %v10594_v25 = vld [vmem:[%s13365_s1 + $0x5d0] sm:$0xff]  }
 0x927   : > { %5322 = vmatprep.mubr.bf16.mxu0 %v11024_v56  ;;  %5299 = vmatpush1.bf16.msra.mxu0 %v10551_v39  ;;  %v10597_v39 = vld [vmem:[%s13365_s1 + $0x588] sm:$0xff]  }
 0x928   : > { %5300 = vmatprep.subr.bf16.mxu0 %v10559_v42  ;;  %v9209_v42 = vcombine.low %v5337_v55, %v5337_v55  ;;  %v10626_v55 = vld [vmem:[%s13366_s2 + $0x8d8] ss:$24 sps:$4 sm:$0xff]  }
 0x92b   : > { %5301 = vmatpush1.bf16.msra.mxu0 %v10557_v0  ;;  %v10604_v0 = vld [vmem:[%s13366_s2 + $0x8d4] ss:$24 sps:$4 sm:$0xff]  }
 0x92c   : > { %5302 = vmatprep.subr.bf16.mxu0 %v10565_v15  ;;  %v10610_v15 = vld [vmem:[%s13366_s2 + $0x8a4] ss:$24 sps:$4 sm:$0xff]  }
 0x92f   : > { %5303 = vmatpush1.bf16.msra.mxu0 %v10563_v52  ;;  %v10613_v52 = vld [vmem:[%s13366_s2 + $0x8b4] ss:$24 sps:$4 sm:$0xff]  }
 0x930   : > { %5304 = vmatprep.subr.bf16.mxu0 %v10571_v38  ;;  %v10616_v38 = vld [vmem:[%s13366_s2 + $0x874] ss:$24 sps:$4 sm:$0xff]  }
 0x933   : > { %5305 = vmatpush1.bf16.msra.mxu0 %v10569_v20  ;;  %v10614_v20 = vld [vmem:[%s13366_s2 + $0x870] ss:$24 sps:$4 sm:$0xff]  }
 0x934   : > { %5674 = vmatprep.subr.bf16.mxu0 %v10604_v0  ;;  %v10641_v0 = vld [vmem:[%s13367_s3 + $0x90] ss:$12 sps:$4 sm:$0xff]  }
 0x9b6   : > { %v4784_v59 = vpop.f32.mrf.mxu0  ;;  %v4866_v23 = vpop.f32.mrf.mxu1 }
 0x9b7   : > { %v12639_v24 = vadd.f32 %v4784_v59, %v12494_v17  ;;  %v12642_v11 = vadd.f32 %v4866_v23, %v12497_v5  ;;  %v10617_v59 = vld [vmem:[%s13366_s2 + $0x880] ss:$24 sps:$4 sm:$0xff]   ;;  %v10622_v23 = vld [vmem:[%s13366_s2 + $0x844] ss:$24 sps:$4 sm:$0xff]  }
 0x9b8   : > { %v4786_v12 = vpop.f32.mrf.mxu0  ;;  %v4868_v48 = vpop.f32.mrf.mxu1 }
 0x9b9   : > { %v12645_v27 = vadd.f32 %v4786_v12, %v12500_v19  ;;  %v12648_v13 = vadd.f32 %v4868_v48, %v12503_v7  ;;  %v10620_v12 = vld [vmem:[%s13366_s2 + $0x840] ss:$24 sps:$4 sm:$0xff]   ;;  %v10625_v48 = vld [vmem:[%s13366_s2 + $0x854] ss:$24 sps:$4 sm:$0xff]  }
 0x9ba   : > { %v4788_v28 = vpop.f32.mrf.mxu0  ;;  %v4870_v29 = vpop.f32.mrf.mxu1 }
 0x9bb   : > { %v10623_v28 = vld [vmem:[%s13366_s2 + $0x850] ss:$24 sps:$4 sm:$0xff]   ;;  %v10628_v29 = vld [vmem:[%s13366_s2 + $0x8dc] ss:$24 sps:$4 sm:$0xff]  }
 0x9bc   : > { %v4789_v1 = vpop.f32.mrf.mxu0  ;;  %v4871_v30 = vpop.f32.mrf.mxu1 }
 0x9bd   : > { %v10652_v1 = vld [vmem:[%s13367_s3 + $0x22c] ss:$12 sps:$4 sm:$0xff]  }
 0x9c6   : > { %v4825_v31 = vpop.f32.mrf.mxu0 }
 0x9c7   : > { %v12651_v34 = vadd.f32 %v4825_v31, %v12506_v26 }
 0x9c8   : > { %v4827_v17 = vpop.f32.mrf.mxu0 }
 0x9c9   : > { %v12654_v5 = vadd.f32 %v4827_v17, %v12509_v63  ;;  %v10577_v63 = vld [vmem:[%s13366_s2 + $0x7ec] ss:$24 sps:$4 sm:$0xff]  }
 0x9ca   : > { %v4829_v18 = vpop.f32.mrf.mxu0 }
 0x9cc   : > { %v4830_v57 = vpop.f32.mrf.mxu0 }
 0x9e6   : > { %v9757_v35 = vpop.f32.mrf.mxu0 }
 0x9e8   : > { %v9758_v19 = vpop.f32.mrf.mxu0 }
 0x9e9   : > { %v9759_v40 = vadd.f32 %v9758_v19, %v9757_v35 }
 0x9ea   : > { %v9760_v41 = vpop.f32.mrf.mxu0 }
 0x9eb   : > { %vm5056_vm11 = vcmp.gt.f32.partialorder %v9759_v40, 0.0  ;;  %v5057_v7 = vmul.f32 0.01, %v9759_v40 }
 0x9ec   : > { %v9761_v44 = vpop.f32.mrf.mxu0 }
 0x9ed   : > { %v5058_v45 = vsel %vm5056_vm11, %v9759_v40, %v5057_v7 }
 0x9ee   : > { %v5059_v26 = vpack.c.bf16 %v5058_v45, %v5058_v45 }
 0x9f0   : > { %9174 = vmatmul.mubr.msk.bf16.vlgmr.msra.gmra.mxu1 %vm842_vm1, %v5059_v26  ;;  %9176 = vmatmul.mubr.msk.bf16.vlgmr.msra.gmra.mxu0 %vm842_vm1, %v5059_v26 }
 0x9f1   : > { %5258 = vmatpush1.bf16.msra.mxu1 %v10572_v46  ;;  %5281 = vmatprep.mubr.bf16.mxu1 %v11024_v56 }
 0x9f2   : > { %5259 = vmatprep.subr.bf16.mxu1 %v10577_v63  ;;  %5698 = vmatprep.mubr.bf16.mxu0 %v11024_v56 }
 0x9f3   : > { %5675 = vmatpush1.bf16.msra.mxu0 %v10602_v10  ;;  %v10682_v10 = vld [vmem:[%s13367_s3 + $0x1b4] ss:$12 sps:$4 sm:$0xff]  }
 0x9f4   : > { %5676 = vmatprep.subr.bf16.mxu0 %v10610_v15  ;;  %v10688_v15 = vld [vmem:[%s13367_s3 + $0x19c] ss:$12 sps:$4 sm:$0xff]  }
 0x9f5   : > { %5260 = vmatpush1.bf16.msra.mxu1 %v10575_v47 }
 0x9f6   : > { %5261 = vmatprep.subr.bf16.mxu1 %v10580_v50 }
 0x9f7   : > { %5677 = vmatpush1.bf16.msra.mxu0 %v10608_v16  ;;  %v10649_v16 = vld [vmem:[%s13367_s3 + $0x64] ss:$12 sps:$4 sm:$0xff]  }
 0x9f8   : > { %5678 = vmatprep.subr.bf16.mxu0 %v10616_v38  ;;  %v10694_v38 = vld [vmem:[%s13367_s3 + $0x184] ss:$12 sps:$4 sm:$0xff]  }
 0x9f9   : > { %5262 = vmatpush1.bf16.msra.mxu1 %v10578_v51 }
 0x9fa   : > { %5263 = vmatprep.subr.bf16.mxu1 %v10583_v53 }
 0x9fb   : > { %5679 = vmatpush1.bf16.msra.mxu0 %v10614_v20  ;;  %v10647_v20 = vld [vmem:[%s13367_s3 + $0x60] ss:$12 sps:$4 sm:$0xff]  }
 0x9fc   : > { %5680 = vmatprep.subr.bf16.mxu0 %v10622_v23  ;;  %v10700_v23 = vld [vmem:[%s13367_s3 + $0x2ec] ss:$12 sps:$4 sm:$0xff]  }
 0x9fd   : > { %5264 = vmatpush1.bf16.msra.mxu1 %v10581_v54 }
 0x9fe   : > { %9763 = vmatprep.subr.bf16.mxu1 %v10584_v37 }
 0x9ff   : > { %5681 = vmatpush1.bf16.msra.mxu0 %v10620_v12  ;;  %v10653_v12 = vld [vmem:[%s13367_s3 + $0x48] ss:$12 sps:$4 sm:$0xff]  }
 0xa00   : > { %9175 = vmatmul.mubr.msk.bf16.vlgmr.msra.gmra.mxu1 %vm842_vm1, %v5059_v26  ;;  %5715 = vmatprep.subr.bf16.mxu0 %v10628_v29  ;;  %v10706_v29 = vld [vmem:[%s13367_s3 + $0x2d4] ss:$12 sps:$4 sm:$0xff]  }
 0xa01   : > { %9764 = vmatpush3.bf16.msra.mxu1 %v10585_v32  ;;  %5506 = vmatprep.mubr.bf16.mxu1 %v9210_v36  ;;  %v10650_v32 = vld [vmem:[%s13367_s3 + $0x228] ss:$12 sps:$4 sm:$0xff]  }
 0xa02   : > { %9765 = vmatprep.subr.bf16.mxu1 %v10586_v60  ;;  %v10658_v36 = vld [vmem:[%s13367_s3 + $0x214] ss:$12 sps:$4 sm:$0xff]  }
 0xa03   : > { %v10629_v60 = vld [vmem:[%s13366_s2 + $0x8a8] ss:$24 sps:$4 sm:$0xff]  }
 0xa05   : > { %9766 = vmatpush3.bf16.msra.mxu1 %v10587_v61  ;;  %v10634_v61 = vld [vmem:[%s13366_s2 + $0x87c] ss:$24 sps:$4 sm:$0xff]  }
 0xa06   : > { %9767 = vmatprep.subr.bf16.mxu1 %v10588_v43  ;;  %v10656_v43 = vld [vmem:[%s13367_s3 + $0x210] ss:$12 sps:$4 sm:$0xff]  }
 0xa09   : > { %9768 = vmatpush3.bf16.msra.mxu1 %v10589_v62  ;;  %v10664_v62 = vld [vmem:[%s13367_s3 + $0x1fc] ss:$12 sps:$4 sm:$0xff]  }
 0xa0a   : > { %9769 = vmatprep.subr.bf16.mxu1 %v10590_v49  ;;  %v10632_v49 = vld [vmem:[%s13366_s2 + $0x878] ss:$24 sps:$4 sm:$0xff]  }
 0xa0d   : > { %9770 = vmatpush3.bf16.msra.mxu1 %v10591_v33  ;;  %v10637_v33 = vld [vmem:[%s13366_s2 + $0x84c] ss:$24 sps:$4 sm:$0xff]  }
 0xa0e   : > { %9771 = vmatprep.subr.bf16.mxu1 %v10592_v2  ;;  %v10662_v2 = vld [vmem:[%s13367_s3 + $0x1f8] ss:$12 sps:$4 sm:$0xff]  }
 0xa11   : > { %9772 = vmatpush3.bf16.msra.mxu1 %v10593_v3  ;;  %v10670_v3 = vld [vmem:[%s13367_s3 + $0x1e4] ss:$12 sps:$4 sm:$0xff]  }
 0xa12   : > { %9773 = vmatprep.subr.bf16.mxu1 %v10594_v25  ;;  %v10635_v25 = vld [vmem:[%s13366_s2 + $0x848] ss:$24 sps:$4 sm:$0xff]  }
 0xa15   : > { %9774 = vmatpush3.bf16.msra.mxu1 %v10595_v4  ;;  %v10640_v4 = vld [vmem:[%s13367_s3 + $0xac] ss:$12 sps:$4 sm:$0xff]  }
 0xa16   : > { %9775 = vmatprep.subr.bf16.mxu1 %v10596_v58  ;;  %v10668_v58 = vld [vmem:[%s13367_s3 + $0x1e0] ss:$12 sps:$4 sm:$0xff]  }
 0xa19   : > { %9776 = vmatpush3.bf16.msra.mxu1 %v10597_v39  ;;  %v10676_v39 = vld [vmem:[%s13367_s3 + $0x1cc] ss:$12 sps:$4 sm:$0xff]  }
 0xa1a   : > { %9777 = vmatprep.subr.bf16.mxu1 %v10598_v8  ;;  %v10638_v8 = vld [vmem:[%s13367_s3 + $0xa8] ss:$12 sps:$4 sm:$0xff]  }
 0xa1d   : > { %9778 = vmatpush3.bf16.msra.mxu1 %v10599_v9  ;;  %v10643_v9 = vld [vmem:[%s13367_s3 + $0x94] ss:$12 sps:$4 sm:$0xff]  }
 0xa1e   : > { %5756 = vmatprep.subr.bf16.mxu1 %v10607_v14  ;;  %v10680_v14 = vld [vmem:[%s13367_s3 + $0x1b0] ss:$12 sps:$4 sm:$0xff]  }
 0xa20   : > { %5507 = vmatmul.mubr.bf16.vlgmr.msra.gmra.mxu1 %v9209_v42  ;;  %v10674_v42 = vld [vmem:[%s13367_s3 + $0x1c8] ss:$12 sps:$4 sm:$0xff]  }
 0xa21   : > { %5780 = vmatprep.mubr.bf16.mxu1 %v11024_v56  ;;  %5757 = vmatpush1.bf16.msra.mxu1 %v10605_v22  ;;  %v10646_v22 = vld [vmem:[%s13367_s3 + $0x7c] ss:$12 sps:$4 sm:$0xff]  }
 0xa22   : > { %5758 = vmatprep.subr.bf16.mxu1 %v10613_v52  ;;  %v10644_v52 = vld [vmem:[%s13367_s3 + $0x78] ss:$12 sps:$4 sm:$0xff]  }
 0xa25   : > { %5759 = vmatpush1.bf16.msra.mxu1 %v10611_v6  ;;  %v10686_v6 = vld [vmem:[%s13367_s3 + $0x198] ss:$12 sps:$4 sm:$0xff]  }
 0xa26   : > { %5760 = vmatprep.subr.bf16.mxu1 %v10619_v21  ;;  %v10655_v21 = vld [vmem:[%s13367_s3 + $0x4c] ss:$12 sps:$4 sm:$0xff]  }
 0xa29   : > { %5761 = vmatpush1.bf16.msra.mxu1 %v10617_v59  ;;  %v10692_v59 = vld [vmem:[%s13367_s3 + $0x180] ss:$12 sps:$4 sm:$0xff]  }
 0xa2a   : > { %5762 = vmatprep.subr.bf16.mxu1 %v10625_v48  ;;  %v10661_v48 = vld [vmem:[%s13367_s3 + $0x34] ss:$12 sps:$4 sm:$0xff]  }
 0xa2d   : > { %5763 = vmatpush1.bf16.msra.mxu1 %v10623_v28  ;;  %v10698_v28 = vld [vmem:[%s13367_s3 + $0x2e8] ss:$12 sps:$4 sm:$0xff]  }
 0xa2e   : > { %6873 = vmatprep.subr.bf16.mxu1 %v10652_v1  ;;  %v10659_v1 = vld [vmem:[%s13367_s3 + $0x30] ss:$12 sps:$4 sm:$0xff]  }
 0xab0   : > { %v5242_v30 = vpop.f32.mrf.mxu1  ;;  %v5324_v31 = vpop.f32.mrf.mxu0 }
 0xab1   : > { %v12787_v17 = vadd.f32 %v5242_v30, %v12639_v24  ;;  %v12790_v18 = vadd.f32 %v5324_v31, %v12642_v11  ;;  %v10667_v30 = vld [vmem:[%s13367_s3 + $0x1c] ss:$12 sps:$4 sm:$0xff]  }
 0xab2   : > { %v5244_v57 = vpop.f32.mrf.mxu1  ;;  %v5326_v35 = vpop.f32.mrf.mxu0  ;;  %v10704_v31 = vld [vmem:[%s13367_s3 + $0x2d0] ss:$12 sps:$4 sm:$0xff]  }
 0xab3   : > { %v12793_v19 = vadd.f32 %v5244_v57, %v12645_v27  ;;  %v12796_v40 = vadd.f32 %v5326_v35, %v12648_v13  ;;  %v10665_v57 = vld [vmem:[%s13367_s3 + $0x18] ss:$12 sps:$4 sm:$0xff]  }
 0xab4   : > { %v5246_v41 = vpop.f32.mrf.mxu1  ;;  %v5328_v7 = vpop.f32.mrf.mxu0  ;;  %v10673_v35 = vld [vmem:[%s13367_s3 + $0x4] ss:$12 sps:$4 sm:$0xff]  }
 0xab5   : > { %v10671_v41 = vld [vmem:[%s13367_s3] ss:$12 sps:$4 sm:$0xff]  }
 0xab6   : > { %v5247_v44 = vpop.f32.mrf.mxu1  ;;  %v5329_v45 = vpop.f32.mrf.mxu0  ;;  %v10679_v7 = vld [vmem:[%s13367_s3 + $0x16c] ss:$12 sps:$4 sm:$0xff]  }
 0xab7   : > { %v10677_v44 = vld [vmem:[%s13367_s3 + $0x168] ss:$12 sps:$4 sm:$0xff]  }
 0xab8   : > { %v10685_v45 = vld [vmem:[%s13367_s3 + $0x154] ss:$12 sps:$4 sm:$0xff]  }
 0xac0   : > { %v5283_v46 = vpop.f32.mrf.mxu1 }
 0xac1   : > { %v12799_v26 = vadd.f32 %v5283_v46, %v12651_v34  ;;  %v10683_v46 = vld [vmem:[%s13367_s3 + $0x150] ss:$12 sps:$4 sm:$0xff]  }
 0xac2   : > { %v5285_v24 = vpop.f32.mrf.mxu1 }
 0xac3   : > { %v12802_v11 = vadd.f32 %v5285_v24, %v12654_v5  ;;  %v10631_v5 = vld [vmem:[%s13366_s2 + $0x8ac] ss:$24 sps:$4 sm:$0xff]   ;;  %v10691_v24 = vld [vmem:[%s13367_s3 + $0x13c] ss:$12 sps:$4 sm:$0xff]  }
 0xac4   : > { %v5287_v63 = vpop.f32.mrf.mxu1 }
 0xac5   : > { %v10689_v63 = vld [vmem:[%s13367_s3 + $0x138] ss:$12 sps:$4 sm:$0xff]  }
 0xac6   : > { %v5288_v47 = vpop.f32.mrf.mxu1 }
 0xac7   : > { %v10697_v47 = vld [vmem:[%s13367_s3 + $0x124] ss:$12 sps:$4 sm:$0xff]  }
 0xae0   : > { %v9779_v50 = vpop.f32.mrf.mxu1 }
 0xae2   : > { %v9780_v27 = vpop.f32.mrf.mxu1 }
 0xae3   : > { %v9781_v51 = vadd.f32 %v9780_v27, %v9779_v50  ;;  %v10695_v50 = vld [vmem:[%s13367_s3 + $0x120] ss:$12 sps:$4 sm:$0xff]  }
 0xae4   : > { %v9782_v53 = vpop.f32.mrf.mxu1  ;;  %v10703_v27 = vld [vmem:[%s13367_s3 + $0x10c] ss:$12 sps:$4 sm:$0xff]  }
 0xae5   : > { %vm5514_vm12 = vcmp.gt.f32.partialorder %v9781_v51, 0.0  ;;  %v5515_v13 = vmul.f32 0.01, %v9781_v51  ;;  %v10701_v53 = vld [vmem:[%s13367_s3 + $0x108] ss:$12 sps:$4 sm:$0xff]  }
 0xae6   : > { %v9783_v54 = vpop.f32.mrf.mxu1 }
 0xae7   : > { %v5516_v37 = vsel %vm5514_vm12, %v9781_v51, %v5515_v13  ;;  %v5796_v51 = vlaneseq  ;;  %v12969_v54 = vld [vmem:[%s13370_s6] sm:$0x3f] }
 0xae8   : > { %v5517_v34 = vpack.c.bf16 %v5516_v37, %v5516_v37  ;;  %v10709_v37 = vld [vmem:[%s13367_s3 + $0xf4] ss:$12 sps:$4 sm:$0xff]  }
 0xae9   : > { %v12964_v13 = vshrl.u32 %v5796_v51, 7 }
 0xaea   : > { %9275 = vmatmul.mubr.msk.bf16.vlgmr.msra.gmra.mxu0 %vm842_vm1, %v5517_v34  ;;  %9277 = vmatmul.mubr.msk.bf16.vlgmr.msra.gmra.mxu1 %vm842_vm1, %v5517_v34 }
 0xaeb   : > { %5716 = vmatpush1.bf16.msra.mxu0 %v10626_v55  ;;  %5739 = vmatprep.mubr.bf16.mxu0 %v11024_v56  ;;  %v5814_v55 = vsub.s32 4, %v12964_v13 }
 0xaec   : > { %5717 = vmatprep.subr.bf16.mxu0 %v10631_v5  ;;  %6874 = vmatpush1.bf16.msra.mxu1 %v10650_v32  ;;  %v10712_v32 = vld [vmem:[%s13367_s3 + $0x2bc] ss:$12 sps:$4 sm:$0xff]  }
 0xaed   : > { %6875 = vmatprep.subr.bf16.mxu1 %v10658_v36  ;;  %v5815_v5 = vrot.slane %v12969_v54, %v5814_v55  ;;  %v10710_v36 = vld [vmem:[%s13367_s3 + $0x2b8] ss:$12 sps:$4 sm:$0xff]   ;;  %v10739_v55 = vld [vmem:[%s13367_s3 + $0x37c] ss:$12 sps:$4 sm:$0xff]  }
 0xaef   : > { %5718 = vmatpush1.bf16.msra.mxu0 %v10629_v60  ;;  %v10715_v60 = vld [vmem:[%s13367_s3 + $0xdc] ss:$12 sps:$4 sm:$0xff]  }
 0xaf0   : > { %5719 = vmatprep.subr.bf16.mxu0 %v10634_v61  ;;  %6876 = vmatpush1.bf16.msra.mxu1 %v10656_v43  ;;  %v10713_v61 = vld [vmem:[%s13367_s3 + $0xd8] ss:$12 sps:$4 sm:$0xff]  }
 0xaf1   : > { %6877 = vmatprep.subr.bf16.mxu1 %v10664_v62  ;;  %v10718_v43 = vld [vmem:[%s13367_s3 + $0x2a4] ss:$12 sps:$4 sm:$0xff]   ;;  %v10716_v62 = vld [vmem:[%s13367_s3 + $0x2a0] ss:$12 sps:$4 sm:$0xff]  }
 0xaf3   : > { %5720 = vmatpush1.bf16.msra.mxu0 %v10632_v49  ;;  %v10721_v49 = vld [vmem:[%s13367_s3 + $0xc4] ss:$12 sps:$4 sm:$0xff]  }
 0xaf4   : > { %5721 = vmatprep.subr.bf16.mxu0 %v10637_v33  ;;  %6878 = vmatpush1.bf16.msra.mxu1 %v10662_v2  ;;  %v10724_v33 = vld [vmem:[%s13367_s3 + $0x28c] ss:$12 sps:$4 sm:$0xff]  }
 0xaf5   : > { %6879 = vmatprep.subr.bf16.mxu1 %v10670_v3  ;;  %v10719_v2 = vld [vmem:[%s13367_s3 + $0xc0] ss:$12 sps:$4 sm:$0xff]   ;;  %v10722_v3 = vld [vmem:[%s13367_s3 + $0x288] ss:$12 sps:$4 sm:$0xff]  }
 0xaf7   : > { %5722 = vmatpush1.bf16.msra.mxu0 %v10635_v25  ;;  %v10727_v25 = vld [vmem:[%s13367_s3 + $0x3ac] ss:$12 sps:$4 sm:$0xff]  }
 0xaf8   : > { %6832 = vmatprep.subr.bf16.mxu0 %v10640_v4  ;;  %6880 = vmatpush1.bf16.msra.mxu1 %v10668_v58  ;;  %v10730_v4 = vld [vmem:[%s13367_s3 + $0x274] ss:$12 sps:$4 sm:$0xff]   ;;  %v10728_v58 = vld [vmem:[%s13367_s3 + $0x270] ss:$12 sps:$4 sm:$0xff]  }
 0xaf9   : > { %6881 = vmatprep.subr.bf16.mxu1 %v10676_v39  ;;  %v10736_v39 = vld [vmem:[%s13367_s3 + $0x25c] ss:$12 sps:$4 sm:$0xff]  }
 0xafa   : > { %9276 = vmatmul.mubr.msk.bf16.vlgmr.msra.gmra.mxu0 %vm842_vm1, %v5517_v34  ;;  %v10707_v34 = vld [vmem:[%s13367_s3 + $0xf0] ss:$12 sps:$4 sm:$0xff]  }
 0xafb   : > { %6833 = vmatpush1.bf16.msra.mxu0 %v10638_v8  ;;  %v10734_v8 = vld [vmem:[%s13367_s3 + $0x258] ss:$12 sps:$4 sm:$0xff]  }
 0xafc   : > { %6834 = vmatprep.subr.bf16.mxu0 %v10643_v9  ;;  %6882 = vmatpush1.bf16.msra.mxu1 %v10674_v42  ;;  %v10742_v9 = vld [vmem:[%s13367_s3 + $0x244] ss:$12 sps:$4 sm:$0xff]   ;;  %v10740_v42 = vld [vmem:[%s13367_s3 + $0x240] ss:$12 sps:$4 sm:$0xff]  }
 0xafd   : > { %6883 = vmatprep.subr.bf16.mxu1 %v10682_v10  ;;  %v10746_v10 = vld [vmem:[%s13367_s3 + $0x170] ss:$12 sps:$4 sm:$0xff]  }
 0xaff   : > { %6835 = vmatpush1.bf16.msra.mxu0 %v10641_v0  ;;  %v13034_v0 = vsub.s32 0, %v12964_v13 }
 0xb00   : > { %6836 = vmatprep.subr.bf16.mxu0 %v10646_v22  ;;  %6884 = vmatpush1.bf16.msra.mxu1 %v10680_v14  ;;  %v13037_v22 = vsub.s32 1, %v12964_v13  ;;  %v5818_v14 = vsub.s32 5, %v12964_v13 }
 0xb01   : > { %6885 = vmatprep.subr.bf16.mxu1 %v10688_v15  ;;  %v5799_v15 = vrot.slane %v12969_v54, %v13034_v0 }
 0xb03   : > { %6837 = vmatpush1.bf16.msra.mxu0 %v10644_v52 }
 0xb04   : > { %6838 = vmatprep.subr.bf16.mxu0 %v10649_v16  ;;  %6886 = vmatpush1.bf16.msra.mxu1 %v10686_v6 }
 0xb05   : > { %6887 = vmatprep.subr.bf16.mxu1 %v10694_v38 }
 0xb07   : > { %6839 = vmatpush1.bf16.msra.mxu0 %v10647_v20 }
 0xb08   : > { %6840 = vmatprep.subr.bf16.mxu0 %v10655_v21  ;;  %6888 = vmatpush1.bf16.msra.mxu1 %v10692_v59  ;;  %v5803_v21 = vrot.slane %v12969_v54, %v13037_v22 }
 0xb09   : > { %6889 = vmatprep.subr.bf16.mxu1 %v10700_v23  ;;  %v5819_v23 = vrot.slane %v12969_v54, %v5818_v14  ;;  %v10756_v14 = vld [vmem:[%s13367_s3 + $0x140] ss:$12 sps:$4 sm:$0xff]  }
 0xb0b   : > { %6841 = vmatpush1.bf16.msra.mxu0 %v10653_v12 }
 0xb0c   : > { %6842 = vmatprep.subr.bf16.mxu0 %v10661_v48  ;;  %6890 = vmatpush2.bf16.msra.mxu1 %v10698_v28 }
 0xb0d   : > { %6891 = vmatprep.subr.bf16.mxu1 %v10706_v29 }
 0xb0f   : > { %6843 = vmatpush1.bf16.msra.mxu0 %v10659_v1 }
 0xb10   : > { %6844 = vmatprep.subr.bf16.mxu0 %v10667_v30  ;;  %6892 = vmatpush2.bf16.msra.mxu1 %v10704_v31 }
 0xb11   : > { %6893 = vmatprep.subr.bf16.mxu1 %v10712_v32 }
 0xb13   : > { %6845 = vmatpush1.bf16.msra.mxu0 %v10665_v57 }
 0xb14   : > { %6846 = vmatprep.subr.bf16.mxu0 %v10673_v35  ;;  %6894 = vmatpush2.bf16.msra.mxu1 %v10710_v36 }
 0xb15   : > { %6895 = vmatprep.subr.bf16.mxu1 %v10718_v43  ;;  %v10745_v43 = vld [vmem:[%s13367_s3 + $0x364] ss:$12 sps:$4 sm:$0xff]  }
 0xb17   : > { %6847 = vmatpush1.bf16.msra.mxu0 %v10671_v41 }
 0xb18   : > { %6848 = vmatprep.subr.bf16.mxu0 %v10679_v7  ;;  %6896 = vmatpush2.bf16.msra.mxu1 %v10716_v62 }
 0xb19   : > { %6897 = vmatprep.subr.bf16.mxu1 %v10724_v33 }
 0xb1b   : > { %6849 = vmatpush2.bf16.msra.mxu0 %v10677_v44 }
 0xb1c   : > { %6850 = vmatprep.subr.bf16.mxu0 %v10685_v45  ;;  %6898 = vmatpush2.bf16.msra.mxu1 %v10722_v3 }
 0xb1d   : > { %6899 = vmatprep.subr.bf16.mxu1 %v10730_v4  ;;  %v10750_v4 = vld [vmem:[%s13367_s3 + $0xb0] ss:$12 sps:$4 sm:$0xff]  }
 0xb1f   : > { %6851 = vmatpush2.bf16.msra.mxu0 %v10683_v46 }
 0xb20   : > { %6852 = vmatprep.subr.bf16.mxu0 %v10691_v24  ;;  %6900 = vmatpush2.bf16.msra.mxu1 %v10728_v58 }
 0xb21   : > { %6901 = vmatprep.subr.bf16.mxu1 %v10736_v39  ;;  %v10747_v39 = vld [vmem:[%s13367_s3 + $0x348] ss:$12 sps:$4 sm:$0xff]  }
 0xb23   : > { %6853 = vmatpush2.bf16.msra.mxu0 %v10689_v63 }
 0xb24   : > { %6854 = vmatprep.subr.bf16.mxu0 %v10697_v47  ;;  %6902 = vmatpush2.bf16.msra.mxu1 %v10734_v8  ;;  %v10733_v47 = vld [vmem:[%s13367_s3 + $0x394] ss:$12 sps:$4 sm:$0xff]   ;;  %v10751_v8 = vld [vmem:[%s13367_s3 + $0x158] ss:$12 sps:$4 sm:$0xff]  }
 0xb25   : > { %6903 = vmatprep.subr.bf16.mxu1 %v10742_v9  ;;  %v10754_v9 = vld [vmem:[%s13367_s3 + $0x334] ss:$12 sps:$4 sm:$0xff]  }
 0xb27   : > { %6855 = vmatpush2.bf16.msra.mxu0 %v10695_v50 }
 0xb28   : > { %6856 = vmatprep.subr.bf16.mxu0 %v10703_v27  ;;  %6904 = vmatpush2.bf16.msra.mxu1 %v10740_v42  ;;  %v5810_v27 = vsub.s32 3, %v12964_v13  ;;  %v10755_v42 = vld [vmem:[%s13367_s3 + $0x98] ss:$12 sps:$4 sm:$0xff]  }
 0xb29   : > { %9785 = vmatprep.subr.bf16.mxu1 %v10746_v10  ;;  %v10752_v10 = vld [vmem:[%s13367_s3 + $0x330] ss:$12 sps:$4 sm:$0xff]  }
 0xb2b   : > { %6857 = vmatpush2.bf16.msra.mxu0 %v10701_v53  ;;  %v10731_v53 = vld [vmem:[%s13367_s3 + $0x390] ss:$12 sps:$4 sm:$0xff]  }
 0xb2c   : > { %6858 = vmatprep.subr.bf16.mxu0 %v10709_v37 }
 0xb2f   : > { %6859 = vmatpush2.bf16.msra.mxu0 %v10707_v34  ;;  %v5811_v34 = vrot.slane %v12969_v54, %v5810_v27  ;;  %v10791_v27 = vld [vmem:[%s13367_s3 + $0x2d8] ss:$12 sps:$4 sm:$0xff]  }
 0xb30   : > { %6860 = vmatprep.subr.bf16.mxu0 %v10715_v60  ;;  %v10737_v60 = vld [vmem:[%s13367_s3 + $0x378] ss:$12 sps:$4 sm:$0xff]  }
 0xb33   : > { %6861 = vmatpush2.bf16.msra.mxu0 %v10713_v61 }
 0xb34   : > { %6862 = vmatprep.subr.bf16.mxu0 %v10721_v49 }
 0xb37   : > { %6863 = vmatpush2.bf16.msra.mxu0 %v10719_v2  ;;  %v10749_v2 = vld [vmem:[%s13367_s3 + $0x34c] ss:$12 sps:$4 sm:$0xff]  }
 0xb38   : > { %6914 = vmatprep.subr.bf16.mxu0 %v10727_v25 }
 0xbaa   : > { %v5700_v52 = vpop.f32.mrf.mxu0  ;;  %v5782_v16 = vpop.f32.mrf.mxu1 }
 0xbab   : > { %v5789_v6 = vadd.f32 %v5700_v52, %v12787_v17  ;;  %v5793_v38 = vadd.f32 %v5782_v16, %v12790_v18  ;;  %v10760_v52 = vld [vmem:[%s13367_s3 + $0x80] ss:$12 sps:$4 sm:$0xff]   ;;  %v10757_v16 = vld [vmem:[%s13367_s3 + $0x318] ss:$12 sps:$4 sm:$0xff]  }
 0xbac   : > { %v5702_v20 = vpop.f32.mrf.mxu0  ;;  %v5784_v59 = vpop.f32.mrf.mxu1 }
 0xbad   : > { %v5826_v12 = vadd.f32 %v5799_v15, %v5789_v6  ;;  %v13047_v48 = vadd.f32 %v5815_v5, %v5793_v38  ;;  %v5790_v28 = vadd.f32 %v5702_v20, %v12793_v19  ;;  %v5794_v29 = vadd.f32 %v5784_v59, %v12796_v40  ;;  %v10725_v19 = vld [vmem:[%s13367_s3 + $0x3a8] ss:$12 sps:$4 sm:$0xff]   ;;  %v10764_v38 = vld [vmem:[%s13367_s3 + $0x304] ss:$12 sps:$4 sm:$0xff]  }
 0xbae   : > { %v5704_v1 = vpop.f32.mrf.mxu0  ;;  %v5786_v30 = vpop.f32.mrf.mxu1  ;;  %v13055_v40 = vsub.s32 2, %v12964_v13  ;;  %v10759_v15 = vld [vmem:[%s13367_s3 + $0x31c] ss:$12 sps:$4 sm:$0xff]  }
 0xbaf   : > { %v5838_v31 = vmul.f32 0.01, %v5826_v12  ;;  %vm5832_vm13 = vcmp.gt.f32.partialorder %v5826_v12, 0.0  ;;  %v5827_v17 = vadd.f32 %v5803_v21, %v5790_v28  ;;  %v5831_v18 = vadd.f32 %v5819_v23, %v5794_v29  ;;  %v10761_v6 = vld [vmem:[%s13367_s3 + $0x128] ss:$12 sps:$4 sm:$0xff]  }
 0xbb0   : > { %v5705_v57 = vpop.f32.mrf.mxu0  ;;  %v5787_v35 = vpop.f32.mrf.mxu1  ;;  %v5807_v51 = vrot.slane %v12969_v54, %v13055_v40  ;;  %v10765_v20 = vld [vmem:[%s13367_s3 + $0x68] ss:$12 sps:$4 sm:$0xff]   ;;  %v10762_v21 = vld [vmem:[%s13367_s3 + $0x300] ss:$12 sps:$4 sm:$0xff]   ;;  %v10766_v59 = vld [vmem:[%s13367_s3 + $0x110] ss:$12 sps:$4 sm:$0xff]  }
 0xbb1   : > { %v5839_v41 = vmul.f32 0.01, %v5827_v17  ;;  %v5843_v7 = vmul.f32 0.01, %v5831_v18  ;;  %v5844_v44 = vsel %vm5832_vm13, %v5826_v12, %v5838_v31  ;;  %vm5833_vm14 = vcmp.gt.f32.partialorder %v5827_v17, 0.0 }
 0xbb2   : > { %vm5837_vm15 = vcmp.gt.f32.partialorder %v5831_v18, 0.0  ;;  %v13057_v63 = vpack.c.bf16 %v5844_v44, %v5844_v44  ;;  %v10769_v23 = vld [vmem:[%s13367_s3 + $0x46c] ss:$12 sps:$4 sm:$0xff]   ;;  %v10770_v12 = vld [vmem:[%s13367_s3 + $0x50] ss:$12 sps:$4 sm:$0xff]   ;;  %vm5836_vm2 = vcmp.gt.f32.partialorder %v13047_v48, 0.0 }
 0xbb3   : > { %v5845_v45 = vsel %vm5833_vm14, %v5827_v17, %v5839_v41  ;;  %v5849_v46 = vsel %vm5837_vm15, %v5831_v18, %v5843_v7  ;;  %v10767_v28 = vld [vmem:[%s13367_s3 + $0x468] ss:$12 sps:$4 sm:$0xff]   ;;  %v10771_v29 = vld [vmem:[%s13367_s3 + $0xf8] ss:$12 sps:$4 sm:$0xff]   ;;  %v10772_v31 = vld [vmem:[%s13367_s3 + $0x450] ss:$12 sps:$4 sm:$0xff]  }
 0xbb4   : > { %v5851_v24 = vpack.c.bf16 %v5845_v45, %v5845_v45  ;;  %v13062_v50 = vpack.c.bf16 %v5849_v46, %v5849_v46  ;;  %v10774_v1 = vld [vmem:[%s13367_s3 + $0x454] ss:$12 sps:$4 sm:$0xff]   ;;  %v10775_v30 = vld [vmem:[%s13367_s3 + $0x38] ss:$12 sps:$4 sm:$0xff]   ;;  %v10779_v18 = vld [vmem:[%s13367_s3 + $0x43c] ss:$12 sps:$4 sm:$0xff]  }
 0xbb5   : > { %v10776_v17 = vld [vmem:[%s13367_s3 + $0xe0] ss:$12 sps:$4 sm:$0xff]   ;;  %v10777_v35 = vld [vmem:[%s13367_s3 + $0x438] ss:$12 sps:$4 sm:$0xff]   ;;  %v10781_v41 = vld [vmem:[%s13367_s3 + $0xc8] ss:$12 sps:$4 sm:$0xff]  }
 0xbb6   : > { %6864 = vmatprep.mubr.bf16.mxu0 %v5851_v24  ;;  %v10780_v57 = vld [vmem:[%s13367_s3 + $0x20] ss:$12 sps:$4 sm:$0xff]   ;;  %v10784_v7 = vld [vmem:[%s13367_s3 + $0x424] ss:$12 sps:$4 sm:$0xff]   ;;  %v10785_v44 = vld [vmem:[%s13367_s3 + $0x8] ss:$12 sps:$4 sm:$0xff]  }
 0xbb7   : > { %6865 = vmatmul.mubr.bf16.vlgmr.msra.gmra.mxu0 %v13057_v63  ;;  %v10782_v45 = vld [vmem:[%s13367_s3 + $0x420] ss:$12 sps:$4 sm:$0xff]   ;;  %v10786_v46 = vld [vmem:[%s13367_s3 + $0x2f0] ss:$12 sps:$4 sm:$0xff]  }
 0xbb8   : > { %6915 = vmatpush1.bf16.msra.mxu0 %v10725_v19  ;;  %6946 = vmatprep.mubr.bf16.mxu0 %v13062_v50  ;;  %v10790_v19 = vld [vmem:[%s13367_s3 + $0x230] ss:$12 sps:$4 sm:$0xff]  }
 0xbb9   : > { %6916 = vmatprep.subr.bf16.mxu0 %v10733_v47  ;;  %v10787_v47 = vld [vmem:[%s13367_s3 + $0x408] ss:$12 sps:$4 sm:$0xff]  }
 0xbba   : > { %v5741_v37 = vpop.f32.mrf.mxu0 }
 0xbbb   : > { %v5791_v13 = vadd.f32 %v5741_v37, %v12799_v26  ;;  %v10792_v37 = vld [vmem:[%s13367_s3 + $0x3f0] ss:$12 sps:$4 sm:$0xff]  }
 0xbbc   : > { %v5743_v5 = vpop.f32.mrf.mxu0  ;;  %6917 = vmatpush1.bf16.msra.mxu0 %v10731_v53  ;;  %v10795_v53 = vld [vmem:[%s13367_s3 + $0x218] ss:$12 sps:$4 sm:$0xff]  }
 0xbbd   : > { %v5828_v32 = vadd.f32 %v5807_v51, %v5791_v13  ;;  %v5792_v36 = vadd.f32 %v5743_v5, %v12802_v11  ;;  %6918 = vmatprep.subr.bf16.mxu0 %v10739_v55  ;;  %v10743_v11 = vld [vmem:[%s13367_s3 + $0x360] ss:$12 sps:$4 sm:$0xff]   ;;  %v10801_v5 = vld [vmem:[%s13367_s3 + $0x2a8] ss:$12 sps:$4 sm:$0xff]  }
 0xbbe   : > { %v5745_v61 = vpop.f32.mrf.mxu0  ;;  %v10794_v51 = vld [vmem:[%s13367_s3 + $0x3f4] ss:$12 sps:$4 sm:$0xff]  }
 0xbbf   : > { %vm5834_vm0 = vcmp.gt.f32.partialorder %v5828_v32, 0.0  ;;  %v5840_v62 = vmul.f32 0.01, %v5828_v32  ;;  %v5829_v26 = vadd.f32 %v5811_v34, %v5792_v36  ;;  %v10796_v55 = vld [vmem:[%s13367_s3 + $0x2c0] ss:$12 sps:$4 sm:$0xff]  }
 0xbc0   : > { %v5746_v49 = vpop.f32.mrf.mxu0  ;;  %6919 = vmatpush1.bf16.msra.mxu0 %v10737_v60  ;;  %v10800_v13 = vld [vmem:[%s13367_s3 + $0x200] ss:$12 sps:$4 sm:$0xff]   ;;  %v10797_v34 = vld [vmem:[%s13367_s3 + $0x3d8] ss:$12 sps:$4 sm:$0xff]   ;;  %v5842_v36 = vmul.f32 0.01, %v13047_v48 }
 0xbc1   : > { %v5841_v54 = vmul.f32 0.01, %v5829_v26  ;;  %vm5835_vm1 = vcmp.gt.f32.partialorder %v5829_v26, 0.0  ;;  %v5846_v33 = vsel %vm5834_vm0, %v5828_v32, %v5840_v62  ;;  %6920 = vmatprep.subr.bf16.mxu0 %v10745_v43  ;;  %v10804_v32 = vld [vmem:[%s13367_s3 + $0x3c4] ss:$12 sps:$4 sm:$0xff]  }
 0xbc2   : > { %v13095_v58 = vpack.c.bf16 %v5846_v33, %v5846_v33  ;;  %v10805_v60 = vld [vmem:[%s13367_s3 + $0x1e8] ss:$12 sps:$4 sm:$0xff]   ;;  %v10802_v61 = vld [vmem:[%s13367_s3 + $0x3c0] ss:$12 sps:$4 sm:$0xff]   ;;  %v10806_v43 = vld [vmem:[%s13367_s3 + $0x290] ss:$12 sps:$4 sm:$0xff]  }
 0xbc3   : > { %v5847_v3 = vsel %vm5835_vm1, %v5829_v26, %v5841_v54  ;;  %v10808_v62 = vld [vmem:[%s13367_s3 + $0x470] ss:$12 sps:$4 sm:$0xff]   ;;  %v5848_v26 = vsel %vm5836_vm2, %v13047_v48, %v5842_v36  ;;  %v10810_v33 = vld [vmem:[%s13367_s3 + $0x278] ss:$12 sps:$4 sm:$0xff]  }
 0xbc4   : > { %v13090_v25 = vpack.c.bf16 %v5847_v3, %v5847_v3  ;;  %6921 = vmatpush1.bf16.msra.mxu0 %v10743_v11  ;;  %v10807_v49 = vld [vmem:[%s13367_s3 + $0x1d0] ss:$12 sps:$4 sm:$0xff]   ;;  %v13251_v11 = vpack.c.bf16 %v5848_v26, %v5848_v26  ;;  %v10812_v48 = vld [vmem:[%s13367_s3 + $0x458] ss:$12 sps:$4 sm:$0xff]  }
 0xbc5   : > { %6922 = vmatprep.subr.bf16.mxu0 %v10749_v2  ;;  %v10809_v54 = vld [vmem:[%s13367_s3 + $0x3b0] ss:$12 sps:$4 sm:$0xff]   ;;  %v10811_v2 = vld [vmem:[%s13367_s3 + $0x1b8] ss:$12 sps:$4 sm:$0xff]  }
 0xbc6   : > { %6905 = vmatprep.mubr.bf16.mxu1 %v13090_v25  ;;  %v10813_v3 = vld [vmem:[%s13367_s3 + $0x398] ss:$12 sps:$4 sm:$0xff]   ;;  %v10888_v26 = vld [vmem:[#allocation2 + $0x1fc] ss:$12 sps:$4 sm:$0xff]  }
 0xbc7   : > { %6906 = vmatmul.mubr.bf16.vlgmr.msra.gmra.mxu1 %v13095_v58  ;;  %v10880_v36 = vld [vmem:[#allocation2 + $0x22c] ss:$12 sps:$4 sm:$0xff]  }
 0xbc8   : > { %9786 = vmatpush3.bf16.msra.mxu1 %v10750_v4  ;;  %6987 = vmatprep.mubr.bf16.mxu1 %v5851_v24  ;;  %v10789_v24 = vld [vmem:[%s13367_s3 + $0x40c] ss:$12 sps:$4 sm:$0xff]  }
 0xbc9   : > { %6923 = vmatpush1.bf16.msra.mxu0 %v10747_v39  ;;  %9787 = vmatprep.subr.bf16.mxu1 %v10751_v8  ;;  %v10816_v4 = vld [vmem:[%s13367_s3 + $0x440] ss:$12 sps:$4 sm:$0xff]   ;;  %v10818_v8 = vld [vmem:[%s13367_s3 + $0x248] ss:$12 sps:$4 sm:$0xff]  }
 0xbca   : > { %6924 = vmatprep.subr.bf16.mxu0 %v10754_v9  ;;  %v10815_v39 = vld [vmem:[%s13367_s3 + $0x1a0] ss:$12 sps:$4 sm:$0xff]   ;;  %v10820_v9 = vld [vmem:[%s13367_s3 + $0x428] ss:$12 sps:$4 sm:$0xff]  }
 0xbcc   : > { %9788 = vmatpush3.bf16.msra.mxu1 %v10755_v42  ;;  %v10819_v42 = vld [vmem:[%s13367_s3 + $0x188] ss:$12 sps:$4 sm:$0xff]  }
 0xbcd   : > { %6925 = vmatpush1.bf16.msra.mxu0 %v10752_v10  ;;  %9789 = vmatprep.subr.bf16.mxu1 %v10756_v14  ;;  %v10821_v10 = vld [vmem:[%s13367_s3 + $0x368] ss:$12 sps:$4 sm:$0xff]   ;;  %v10832_v14 = vld [vmem:[#allocation2 + $0xac] ss:$12 sps:$4 sm:$0xff]  }
 0xbce   : > { %6926 = vmatprep.subr.bf16.mxu0 %v10759_v15  ;;  %v10822_v15 = vld [vmem:[%s13367_s3 + $0x410] ss:$12 sps:$4 sm:$0xff]  }
 0xbd0   : > { %9790 = vmatpush3.bf16.msra.mxu1 %v10760_v52  ;;  %v10830_v52 = vld [vmem:[#allocation2 + $0xa8] ss:$12 sps:$4 sm:$0xff]  }
 0xbd1   : > { %6927 = vmatpush1.bf16.msra.mxu0 %v10757_v16  ;;  %9791 = vmatprep.subr.bf16.mxu1 %v10761_v6  ;;  %v10823_v16 = vld [vmem:[%s13367_s3 + $0x350] ss:$12 sps:$4 sm:$0xff]   ;;  %v10835_v6 = vld [vmem:[#allocation2 + $0x94] ss:$12 sps:$4 sm:$0xff]  }
 0xbd2   : > { %6928 = vmatprep.subr.bf16.mxu0 %v10764_v38  ;;  %v10824_v38 = vld [vmem:[%s13367_s3 + $0x3f8] ss:$12 sps:$4 sm:$0xff]  }
 0xbd4   : > { %9792 = vmatpush3.bf16.msra.mxu1 %v10765_v20  ;;  %v10833_v20 = vld [vmem:[#allocation2 + $0x90] ss:$12 sps:$4 sm:$0xff]  }
 0xbd5   : > { %6929 = vmatpush1.bf16.msra.mxu0 %v10762_v21  ;;  %9793 = vmatprep.subr.bf16.mxu1 %v10766_v59  ;;  %v10825_v21 = vld [vmem:[%s13367_s3 + $0x338] ss:$12 sps:$4 sm:$0xff]   ;;  %v10838_v59 = vld [vmem:[#allocation2 + $0x7c] ss:$12 sps:$4 sm:$0xff]  }
 0xbd6   : > { %6930 = vmatprep.subr.bf16.mxu0 %v10769_v23  ;;  %v10826_v23 = vld [vmem:[%s13367_s3 + $0x3e0] ss:$12 sps:$4 sm:$0xff]  }
 0xbd8   : > { %9794 = vmatpush3.bf16.msra.mxu1 %v10770_v12  ;;  %v10836_v12 = vld [vmem:[#allocation2 + $0x78] ss:$12 sps:$4 sm:$0xff]  }
 0xbd9   : > { %6931 = vmatpush2.bf16.msra.mxu0 %v10767_v28  ;;  %9795 = vmatprep.subr.bf16.mxu1 %v10771_v29  ;;  %v10841_v28 = vld [vmem:[#allocation2 + $0x64] ss:$12 sps:$4 sm:$0xff]   ;;  %v10828_v29 = vld [vmem:[%s13367_s3 + $0x3c8] ss:$12 sps:$4 sm:$0xff]  }
 0xbda   : > { %6932 = vmatprep.subr.bf16.mxu0 %v10774_v1  ;;  %v10839_v1 = vld [vmem:[#allocation2 + $0x60] ss:$12 sps:$4 sm:$0xff]  }
 0xbdc   : > { %9796 = vmatpush3.bf16.msra.mxu1 %v10775_v30  ;;  %v10829_v30 = vld [vmem:[%s13367_s3 + $0x308] ss:$12 sps:$4 sm:$0xff]  }
 0xbdd   : > { %6933 = vmatpush2.bf16.msra.mxu0 %v10772_v31  ;;  %9797 = vmatprep.subr.bf16.mxu1 %v10776_v17  ;;  %v10844_v31 = vld [vmem:[#allocation2 + $0x4c] ss:$12 sps:$4 sm:$0xff]   ;;  %v10842_v17 = vld [vmem:[#allocation2 + $0x48] ss:$12 sps:$4 sm:$0xff]  }
 0xbde   : > { %6934 = vmatprep.subr.bf16.mxu0 %v10779_v18  ;;  %v10847_v18 = vld [vmem:[#allocation2 + $0x34] ss:$12 sps:$4 sm:$0xff]  }
 0xbe0   : > { %9798 = vmatpush3.bf16.msra.mxu1 %v10780_v57  ;;  %v10845_v57 = vld [vmem:[#allocation2 + $0x30] ss:$12 sps:$4 sm:$0xff]  }
 0xbe1   : > { %6935 = vmatpush2.bf16.msra.mxu0 %v10777_v35  ;;  %9799 = vmatprep.subr.bf16.mxu1 %v10781_v41  ;;  %v10850_v35 = vld [vmem:[#allocation2 + $0x1c] ss:$12 sps:$4 sm:$0xff]   ;;  %v10848_v41 = vld [vmem:[#allocation2 + $0x18] ss:$12 sps:$4 sm:$0xff]  }
 0xbe2   : > { %6936 = vmatprep.subr.bf16.mxu0 %v10784_v7  ;;  %v10853_v7 = vld [vmem:[#allocation2 + $0x4] ss:$12 sps:$4 sm:$0xff]  }
 0xbe4   : > { %9800 = vmatpush3.bf16.msra.mxu1 %v10785_v44  ;;  %v10851_v44 = vld [vmem:[#allocation2] ss:$12 sps:$4 sm:$0xff]  }
 0xbe5   : > { %6937 = vmatpush2.bf16.msra.mxu0 %v10782_v45  ;;  %9807 = vmatprep.subr.bf16.mxu1 %v10786_v46  ;;  %v10856_v45 = vld [vmem:[#allocation2 + $0x16c] ss:$12 sps:$4 sm:$0xff]   ;;  %v10854_v46 = vld [vmem:[#allocation2 + $0x168] ss:$12 sps:$4 sm:$0xff]  }
 0xbe6   : > { %6938 = vmatprep.subr.bf16.mxu0 %v10789_v24  ;;  %v10859_v24 = vld [vmem:[#allocation2 + $0x154] ss:$12 sps:$4 sm:$0xff]  }
 0xbe7   : > { %6988 = vmatmul.mubr.bf16.vlgmr.msra.gmra.mxu1 %v13057_v63  ;;  %v10799_v63 = vld [vmem:[%s13367_s3 + $0x3dc] ss:$12 sps:$4 sm:$0xff]  }
 0xbe8   : > { %9808 = vmatpush3.bf16.msra.mxu1 %v10790_v19  ;;  %7027 = vmatprep.mubr.bf16.mxu1 %v13090_v25  ;;  %v10814_v25 = vld [vmem:[%s13367_s3 + $0x260] ss:$12 sps:$4 sm:$0xff]   ;;  %v10857_v19 = vld [vmem:[#allocation2 + $0x150] ss:$12 sps:$4 sm:$0xff]  }
 0xbe9   : > { %6939 = vmatpush2.bf16.msra.mxu0 %v10787_v47  ;;  %9809 = vmatprep.subr.bf16.mxu1 %v10791_v27  ;;  %v10862_v47 = vld [vmem:[#allocation2 + $0x13c] ss:$12 sps:$4 sm:$0xff]   ;;  %v10860_v27 = vld [vmem:[#allocation2 + $0x138] ss:$12 sps:$4 sm:$0xff]  }
 0xbea   : > { %6940 = vmatprep.subr.bf16.mxu0 %v10794_v51  ;;  %v10863_v51 = vld [vmem:[#allocation2 + $0x120] ss:$12 sps:$4 sm:$0xff]  }
 0xbec   : > { %9810 = vmatpush3.bf16.msra.mxu1 %v10795_v53  ;;  %v10868_v53 = vld [vmem:[#allocation2 + $0x10c] ss:$12 sps:$4 sm:$0xff]  }
 0xbed   : > { %6941 = vmatpush2.bf16.msra.mxu0 %v10792_v37  ;;  %9811 = vmatprep.subr.bf16.mxu1 %v10796_v55  ;;  %v10866_v37 = vld [vmem:[#allocation2 + $0x108] ss:$12 sps:$4 sm:$0xff]  }
 0xbee   : > { %6942 = vmatprep.subr.bf16.mxu0 %v10799_v63  ;;  %v10871_v55 = vld [vmem:[#allocation2 + $0xf4] ss:$12 sps:$4 sm:$0xff]   ;;  %v10869_v63 = vld [vmem:[#allocation2 + $0xf0] ss:$12 sps:$4 sm:$0xff]  }
 0xbf0   : > { %9812 = vmatpush3.bf16.msra.mxu1 %v10800_v13  ;;  %v10874_v13 = vld [vmem:[#allocation2 + $0xdc] ss:$12 sps:$4 sm:$0xff]  }
 0xbf1   : > { %6943 = vmatpush2.bf16.msra.mxu0 %v10797_v34  ;;  %9813 = vmatprep.subr.bf16.mxu1 %v10801_v5  ;;  %v10872_v34 = vld [vmem:[#allocation2 + $0xd8] ss:$12 sps:$4 sm:$0xff]  }
 0xbf2   : > { %6944 = vmatprep.subr.bf16.mxu0 %v10804_v32  ;;  %v10877_v5 = vld [vmem:[#allocation2 + $0xc4] ss:$12 sps:$4 sm:$0xff]   ;;  %v10875_v32 = vld [vmem:[#allocation2 + $0xc0] ss:$12 sps:$4 sm:$0xff]  }
 0xbf4   : > { %9814 = vmatpush3.bf16.msra.mxu1 %v10805_v60  ;;  %v10878_v60 = vld [vmem:[#allocation2 + $0x228] ss:$12 sps:$4 sm:$0xff]  }
 0xbf5   : > { %6945 = vmatpush2.bf16.msra.mxu0 %v10802_v61  ;;  %9815 = vmatprep.subr.bf16.mxu1 %v10806_v43  ;;  %v11025_v61 = vmov 0.0   ;;  %v10884_v43 = vld [vmem:[#allocation2 + $0x214] ss:$12 sps:$4 sm:$0xff]  }
 0xbf6   : > { %9829 = vmatprep.subr.bf16.mxu0 %v10808_v62  ;;  %v10882_v62 = vld [vmem:[#allocation2 + $0x210] ss:$12 sps:$4 sm:$0xff]  }
 0xbf8   : > { %6947 = vmatmul.mubr.bf16.vlgmr.msra.gmra.mxu0 %v13251_v11  ;;  %9816 = vmatpush3.bf16.msra.mxu1 %v10807_v49  ;;  %v10886_v49 = vld [vmem:[#allocation2 + $0x1f8] ss:$12 sps:$4 sm:$0xff]  }
 0xbf9   : > { %9830 = vmatpush3.bf16.msra.mxu0 %v10809_v54  ;;  %7067 = vmatprep.mubr.bf16.mxu0 %v13062_v50  ;;  %v10817_v50 = vld [vmem:[%s13367_s3 + $0x380] ss:$12 sps:$4 sm:$0xff]  }
 0xbfa   : > { %9817 = vmatprep.subr.bf16.mxu1 %v10810_v33  ;;  %9831 = vmatprep.subr.bf16.mxu0 %v10812_v48  ;;  %v10890_v54 = vld [vmem:[#allocation2 + $0x1e0] ss:$12 sps:$4 sm:$0xff]   ;;  %v10894_v33 = vld [vmem:[#allocation2 + $0x1c8] ss:$12 sps:$4 sm:$0xff]  }
 0xbfb   : > { %v10896_v48 = vld [vmem:[#allocation2 + $0x1cc] ss:$12 sps:$4 sm:$0xff]  }
 0xbfc   : > { %9818 = vmatpush3.bf16.msra.mxu1 %v10811_v2  ;;  %v10898_v2 = vld [vmem:[#allocation2 + $0x1b0] ss:$12 sps:$4 sm:$0xff]  }
 0xbfd   : > { %9832 = vmatpush3.bf16.msra.mxu0 %v10813_v3  ;;  %9819 = vmatprep.subr.bf16.mxu1 %v10814_v25  ;;  %v10900_v3 = vld [vmem:[#allocation2 + $0x1b4] ss:$12 sps:$4 sm:$0xff]   ;;  %v10904_v25 = vld [vmem:[#allocation2 + $0x19c] ss:$12 sps:$4 sm:$0xff]  }
 0xbfe   : > { %9833 = vmatprep.subr.bf16.mxu0 %v10816_v4  ;;  %v10902_v4 = vld [vmem:[#allocation2 + $0x198] ss:$12 sps:$4 sm:$0xff]  }
 0xc00   : > { %9820 = vmatpush3.bf16.msra.mxu1 %v10815_v39  ;;  %v10908_v39 = vld [vmem:[#allocation2 + $0x184] ss:$12 sps:$4 sm:$0xff]  }
 0xc01   : > { %9834 = vmatpush3.bf16.msra.mxu0 %v10817_v50  ;;  %9821 = vmatprep.subr.bf16.mxu1 %v10818_v8  ;;  %v10906_v50 = vld [vmem:[#allocation2 + $0x180] ss:$12 sps:$4 sm:$0xff]   ;;  %v10910_v8 = vld [vmem:[#allocation2 + $0x170] ss:$12 sps:$4 sm:$0xff]  }
 0xc02   : > { %9835 = vmatprep.subr.bf16.mxu0 %v10820_v9 }
 0xc04   : > { %9822 = vmatpush3.bf16.msra.mxu1 %v10819_v42 }
 0xc05   : > { %9836 = vmatpush3.bf16.msra.mxu0 %v10821_v10  ;;  %7583 = vmatprep.subr.bf16.mxu1 %v10832_v14 }
 0xc06   : > { %9837 = vmatprep.subr.bf16.mxu0 %v10822_v15 }
 0xc07   : > { %7028 = vmatmul.mubr.bf16.vlgmr.msra.gmra.mxu1 %v13095_v58  ;;  %v10827_v58 = vld [vmem:[%s13367_s3 + $0x320] ss:$12 sps:$4 sm:$0xff]  }
 0xc08   : > { %7584 = vmatpush1.bf16.msra.mxu1 %v10830_v52 }
 0xc09   : > { %9838 = vmatpush3.bf16.msra.mxu0 %v10823_v16  ;;  %7585 = vmatprep.subr.bf16.mxu1 %v10835_v6 }
 0xc0a   : > { %9839 = vmatprep.subr.bf16.mxu0 %v10824_v38 }
 0xc0c   : > { %7586 = vmatpush1.bf16.msra.mxu1 %v10833_v20 }
 0xc0d   : > { %9840 = vmatpush3.bf16.msra.mxu0 %v10825_v21  ;;  %7587 = vmatprep.subr.bf16.mxu1 %v10838_v59 }
 0xc0e   : > { %9841 = vmatprep.subr.bf16.mxu0 %v10826_v23  ;;  %v309_v23 = vld [vmem:[%s13370_s6 + $0x6] sm:$0x7] }
 0xc10   : > { %7588 = vmatpush1.bf16.msra.mxu1 %v10836_v12  ;;  %v6052_v12 = vrot.slane %v309_v23, %v13034_v0 }
 0xc11   : > { %9842 = vmatpush3.bf16.msra.mxu0 %v10827_v58  ;;  %7589 = vmatprep.subr.bf16.mxu1 %v10841_v28  ;;  %v6056_v58 = vrot.slane %v309_v23, %v13037_v22 }
 0xc12   : > { %9843 = vmatprep.subr.bf16.mxu0 %v10828_v29 }
 0xc14   : > { %7590 = vmatpush1.bf16.msra.mxu1 %v10839_v1 }
 0xc15   : > { %9844 = vmatpush3.bf16.msra.mxu0 %v10829_v30  ;;  %7591 = vmatprep.subr.bf16.mxu1 %v10844_v31 }
 0xc16   : > { %7624 = vmatprep.subr.bf16.mxu0 %v10880_v36 }
 0xc18   : > { %7068 = vmatmul.mubr.bf16.vlgmr.msra.gmra.mxu0 %v13251_v11  ;;  %7592 = vmatpush1.bf16.msra.mxu1 %v10842_v17  ;;  %v10892_v11 = vld [vmem:[#allocation2 + $0x1e4] ss:$12 sps:$4 sm:$0xff]  }
 0xc19   : > { %7593 = vmatprep.subr.bf16.mxu1 %v10847_v18  ;;  %7656 = vmatprep.mubr.bf16.mxu0 %v11024_v56  ;;  %v10865_v56 = vld [vmem:[#allocation2 + $0x124] ss:$12 sps:$4 sm:$0xff]  }
 0xc1a   : > { %7625 = vmatpush1.bf16.msra.mxu0 %v10878_v60 }
 0xc1b   : > { %7626 = vmatprep.subr.bf16.mxu0 %v10884_v43  ;;  %v10905_v43 = vld [vmem:[#allocation2 + $0x1a0] ss:$12 sps:$4 sm:$0xff]  }
 0xc1c   : > { %7594 = vmatpush1.bf16.msra.mxu1 %v10845_v57 }
 0xc1d   : > { %7595 = vmatprep.subr.bf16.mxu1 %v10850_v35 }
 0xc1e   : > { %7627 = vmatpush1.bf16.msra.mxu0 %v10882_v62 }
 0xc1f   : > { %7628 = vmatprep.subr.bf16.mxu0 %v10888_v26 }
 0xc20   : > { %7596 = vmatpush1.bf16.msra.mxu1 %v10848_v41 }
 0xc21   : > { %7597 = vmatprep.subr.bf16.mxu1 %v10853_v7 }
 0xc22   : > { %7629 = vmatpush1.bf16.msra.mxu0 %v10886_v49 }
 0xc23   : > { %7630 = vmatprep.subr.bf16.mxu0 %v10892_v11 }
 0xc24   : > { %7598 = vmatpush1.bf16.msra.mxu1 %v10851_v44 }
 0xc25   : > { %7599 = vmatprep.subr.bf16.mxu1 %v10856_v45 }
 0xc26   : > { %7631 = vmatpush1.bf16.msra.mxu0 %v10890_v54 }
 0xc27   : > { %7632 = vmatprep.subr.bf16.mxu0 %v10896_v48 }
 0xc28   : > { %7600 = vmatpush2.bf16.msra.mxu1 %v10854_v46 }
 0xc29   : > { %7601 = vmatprep.subr.bf16.mxu1 %v10859_v24 }
 0xc2a   : > { %7633 = vmatpush1.bf16.msra.mxu0 %v10894_v33  ;;  %v10909_v33 = vld [vmem:[#allocation2 + $0x188] ss:$12 sps:$4 sm:$0xff]  }
 0xc2b   : > { %7634 = vmatprep.subr.bf16.mxu0 %v10900_v3 }
 0xc2c   : > { %7602 = vmatpush2.bf16.msra.mxu1 %v10857_v19  ;;  %v10881_v19 = vld [vmem:[#allocation2 + $0x230] ss:$12 sps:$4 sm:$0xff]  }
 0xc2d   : > { %7603 = vmatprep.subr.bf16.mxu1 %v10862_v47 }
 0xc2e   : > { %7635 = vmatpush1.bf16.msra.mxu0 %v10898_v2 }
 0xc2f   : > { %7636 = vmatprep.subr.bf16.mxu0 %v10904_v25 }
 0xc30   : > { %7604 = vmatpush2.bf16.msra.mxu1 %v10860_v27  ;;  %v10885_v27 = vld [vmem:[#allocation2 + $0x218] ss:$12 sps:$4 sm:$0xff]  }
 0xc31   : > { %7605 = vmatprep.subr.bf16.mxu1 %v10865_v56 }
 0xc32   : > { %7637 = vmatpush1.bf16.msra.mxu0 %v10902_v4  ;;  %v10911_v4 = vld [vmem:[#allocation2 + $0xb0] ss:$12 sps:$4 sm:$0xff]  }
 0xc33   : > { %7638 = vmatprep.subr.bf16.mxu0 %v10908_v39 }
 0xc34   : > { %7606 = vmatpush2.bf16.msra.mxu1 %v10863_v51  ;;  %v10889_v51 = vld [vmem:[#allocation2 + $0x200] ss:$12 sps:$4 sm:$0xff]  }
 0xc35   : > { %7607 = vmatprep.subr.bf16.mxu1 %v10868_v53 }
 0xc36   : > { %7639 = vmatpush1.bf16.msra.mxu0 %v10906_v50  ;;  %v10912_v50 = vld [vmem:[#allocation2 + $0x158] ss:$12 sps:$4 sm:$0xff]  }
 0xc37   : > { %9851 = vmatprep.subr.bf16.mxu0 %v10910_v8  ;;  %v10913_v8 = vld [vmem:[#allocation2 + $0x98] ss:$12 sps:$4 sm:$0xff]  }
 0xc38   : > { %7608 = vmatpush2.bf16.msra.mxu1 %v10866_v37 }
 0xc39   : > { %7609 = vmatprep.subr.bf16.mxu1 %v10871_v55  ;;  %v10893_v55 = vld [vmem:[#allocation2 + $0x1e8] ss:$12 sps:$4 sm:$0xff]  }
 0xc3c   : > { %7610 = vmatpush2.bf16.msra.mxu1 %v10869_v63 }
 0xc3d   : > { %7611 = vmatprep.subr.bf16.mxu1 %v10874_v13  ;;  %v10897_v13 = vld [vmem:[#allocation2 + $0x1d0] ss:$12 sps:$4 sm:$0xff]  }
 0xc40   : > { %7612 = vmatpush2.bf16.msra.mxu1 %v10872_v34  ;;  %v10901_v34 = vld [vmem:[#allocation2 + $0x1b8] ss:$12 sps:$4 sm:$0xff]  }
 0xc41   : > { %7613 = vmatprep.subr.bf16.mxu1 %v10877_v5  ;;  %v6060_v5 = vrot.slane %v309_v23, %v13055_v40  ;;  %v10926_v23 = vld [vmem:[#allocation4 + $0x78] sm:$0xff]  }
 0xc44   : > { %7614 = vmatpush2.bf16.msra.mxu1 %v10875_v32 }
 0xc45   : > { %9913 = vmatprep.subr.bf16.mxu1 %v11025_v61 }
 0xc77   : > { %v6866_v9 = vpop.f32.mrf.mxu0 }
 0xc78   : > { %v6867_v28 = vadd.f32 %v6866_v9, %v6052_v12  ;;  %v10914_v9 = vld [vmem:[#allocation2 + $0x140] ss:$12 sps:$4 sm:$0xff]   ;;  %v10927_v12 = vld [vmem:[#allocation4 + $0x38] sm:$0xff]  }
 0xc79   : > { %v6868_v42 = vpop.f32.mrf.mxu0 }
 0xc7a   : > { %v6869_v29 = vadd.f32 %v6868_v42, %v6056_v58  ;;  %v10915_v42 = vld [vmem:[#allocation2 + $0x80] ss:$12 sps:$4 sm:$0xff]   ;;  %v10928_v58 = vld [vmem:[#allocation4 + $0x70] sm:$0xff]  }
 0xc7b   : > { %v6870_v10 = vpop.f32.mrf.mxu0 }
 0xc7c   : > { %v10916_v10 = vld [vmem:[#allocation2 + $0x128] ss:$12 sps:$4 sm:$0xff]  }
 0xc7d   : > { %v6871_v14 = vpop.f32.mrf.mxu0 }
 0xc7e   : > { %v10917_v14 = vld [vmem:[#allocation2 + $0x68] ss:$12 sps:$4 sm:$0xff]  }
 0xc87   : > { %v6907_v15 = vpop.f32.mrf.mxu1 }
 0xc88   : > { %v6908_v1 = vadd.f32 %v6907_v15, %v6867_v28  ;;  %v10918_v15 = vld [vmem:[#allocation2 + $0x110] ss:$12 sps:$4 sm:$0xff]  }
 0xc89   : > { %v6909_v52 = vpop.f32.mrf.mxu1  ;;  %v10929_v28 = vld [vmem:[#allocation4 + $0x30] sm:$0xff]  }
 0xc8a   : > { %v6910_v31 = vadd.f32 %v6909_v52, %v6869_v29  ;;  %v10919_v52 = vld [vmem:[#allocation2 + $0x50] ss:$12 sps:$4 sm:$0xff]   ;;  %v10930_v29 = vld [vmem:[#allocation4 + $0x68] sm:$0xff]  }
 0xc8b   : > { %v6911_v16 = vpop.f32.mrf.mxu1 }
 0xc8c   : > { %v10920_v16 = vld [vmem:[#allocation2 + $0xf8] ss:$12 sps:$4 sm:$0xff]  }
 0xc8d   : > { %v6912_v6 = vpop.f32.mrf.mxu1 }
 0xc8e   : > { %v10921_v6 = vld [vmem:[#allocation2 + $0x38] ss:$12 sps:$4 sm:$0xff]  }
 0xca7   : > { %v9801_v38 = vpop.f32.mrf.mxu1 }
 0xca9   : > { %v9802_v20 = vpop.f32.mrf.mxu1 }
 0xcaa   : > { %v9803_v32 = vadd.f32 %v9802_v20, %v9801_v38  ;;  %v10922_v38 = vld [vmem:[#allocation2 + $0xe0] ss:$12 sps:$4 sm:$0xff]  }
 0xcab   : > { %v9804_v21 = vpop.f32.mrf.mxu1  ;;  %v10923_v20 = vld [vmem:[#allocation2 + $0x20] ss:$12 sps:$4 sm:$0xff]  }
 0xcac   : > { %v6990_v62 = vadd.f32 %v9803_v32, %v6060_v5  ;;  %v10924_v21 = vld [vmem:[#allocation2 + $0xc8] ss:$12 sps:$4 sm:$0xff]  }
 0xcad   : > { %v9805_v59 = vpop.f32.mrf.mxu1 }
 0xcae   : > { %v10925_v59 = vld [vmem:[#allocation2 + $0x8] ss:$12 sps:$4 sm:$0xff]  }
 0xcb8   : > { %v6948_v30 = vpop.f32.mrf.mxu0 }
 0xcb9   : > { %v6949_v17 = vadd.f32 %v6948_v30, %v6908_v1  ;;  %v10931_v1 = vld [vmem:[#allocation4 + $0x28] sm:$0xff]   ;;  %v10932_v30 = vld [vmem:[#allocation4 + $0x60] sm:$0xff]  }
 0xcba   : > { %v6950_v18 = vpop.f32.mrf.mxu0 }
 0xcbb   : > { %vm7075_vm3 = vcmp.gt.f32.partialorder %v6949_v17, 0.0  ;;  %v7078_v57 = vmul.f32 0.01, %v6949_v17  ;;  %v6951_v35 = vadd.f32 %v6950_v18, %v6910_v31  ;;  %v10933_v31 = vld [vmem:[#allocation4 + $0x20] sm:$0xff]   ;;  %v10935_v18 = vld [vmem:[#allocation4 + $0x18] sm:$0xff]  }
 0xcbc   : > { %v6952_v41 = vpop.f32.mrf.mxu0 }
 0xcbd   : > { %vm7076_vm4 = vcmp.gt.f32.partialorder %v6951_v35, 0.0  ;;  %v7079_v7 = vmul.f32 0.01, %v6951_v35  ;;  %v7081_v44 = vsel %vm7075_vm3, %v6949_v17, %v7078_v57  ;;  %v10934_v17 = vld [vmem:[#allocation4 + $0x58] sm:$0xff]   ;;  %v10936_v57 = vld [vmem:[#allocation4 + $0x50] sm:$0xff]   ;;  %v10938_v41 = vld [vmem:[#allocation4 + $0x48] sm:$0xff]  }
 0xcbe   : > { %v6953_v45 = vpop.f32.mrf.mxu0  ;;  %v13324_v47 = vpack.c.bf16 %v7081_v44, %v7081_v44  ;;  %v10940_v44 = vld [vmem:[#allocation4 + $0x40] sm:$0xff]  }
 0xcbf   : > { %v7082_v46 = vsel %vm7076_vm4, %v6951_v35, %v7079_v7  ;;  %v10937_v35 = vld [vmem:[#allocation4 + $0x10] sm:$0xff]   ;;  %v10939_v7 = vld [vmem:[#allocation4 + $0x8] sm:$0xff]   ;;  %v10941_v45 = vld [vmem:[#allocation4] sm:$0xff]  }
 0xcc0   : > { %v7085_v24 = vpack.c.bf16 %v7082_v46, %v7082_v46  ;;  %v10942_v46 = vld [vmem:[#allocation4 + $0xb8] sm:$0xff]  }
 0xcc2   : > { %7615 = vmatprep.mubr.bf16.mxu1 %v7085_v24 }
 0xcc3   : > { %7616 = vmatmul.mubr.bf16.vlgmr.msra.gmra.mxu1 %v13324_v47 }
 0xcc4   : > { %9914 = vmatpush3.bf16.msra.mxu1 %v10881_v19  ;;  %9929 = vmatprep.mubr.msk.bf16.mxu1 %vm11026_vm5, %v11025_v61  ;;  %v10944_v19 = vld [vmem:[#allocation4 + $0xa8] sm:$0xff]  }
 0xcc5   : > { %9915 = vmatprep.subr.bf16.mxu1 %v11025_v61 }
 0xcc7   : > { %v9823_v56 = vpop.f32.mrf.mxu1 }
 0xcc8   : > { %9916 = vmatpush3.bf16.msra.mxu1 %v10885_v27  ;;  %v10946_v27 = vld [vmem:[#allocation4 + $0x98] sm:$0xff]  }
 0xcc9   : > { %v9824_v53 = vpop.f32.mrf.mxu1  ;;  %9917 = vmatprep.subr.bf16.mxu1 %v11025_v61 }
 0xcca   : > { %v9825_v36 = vadd.f32 %v9824_v53, %v9823_v56  ;;  %v10947_v56 = vld [vmem:[#allocation4 + $0x90] sm:$0xff]   ;;  %v10949_v53 = vld [vmem:[#allocation4 + $0x80] sm:$0xff]  }
 0xccb   : > { %v9826_v37 = vpop.f32.mrf.mxu1 }
 0xccc   : > { %9918 = vmatpush3.bf16.msra.mxu1 %v10889_v51  ;;  %v7030_v49 = vadd.f32 %v9825_v36, %v6990_v62  ;;  %v10948_v51 = vld [vmem:[#allocation4 + $0x88] sm:$0xff]  }
 0xccd   : > { %v9827_v63 = vpop.f32.mrf.mxu1  ;;  %9919 = vmatprep.subr.bf16.mxu1 %v11025_v61 }
 0xcd0   : > { %9920 = vmatpush3.bf16.msra.mxu1 %v10893_v55 }
 0xcd1   : > { %9921 = vmatprep.subr.bf16.mxu1 %v11025_v61 }
 0xcd4   : > { %9922 = vmatpush3.bf16.msra.mxu1 %v10897_v13 }
 0xcd5   : > { %9923 = vmatprep.subr.bf16.mxu1 %v11025_v61 }
 0xcd8   : > { %v9845_v60 = vpop.f32.mrf.mxu0  ;;  %9924 = vmatpush3.bf16.msra.mxu1 %v10901_v34  ;;  %v310_v34 = vld [vmem:[%s13370_s6 + $0x9] sm:$0x7] }
 0xcd9   : > { %9925 = vmatprep.subr.bf16.mxu1 %v11025_v61  ;;  %v7187_v5 = vrot.slane %v310_v34, %v13034_v0  ;;  %v7191_v32 = vrot.slane %v310_v34, %v13037_v22 }
 0xcda   : > { %v9846_v26 = vpop.f32.mrf.mxu0 }
 0xcdb   : > { %v9847_v54 = vadd.f32 %v9846_v26, %v9845_v60 }
 0xcdc   : > { %v9848_v11 = vpop.f32.mrf.mxu0  ;;  %9926 = vmatpush3.bf16.msra.mxu1 %v10905_v43 }
 0xcdd   : > { %v7070_v48 = vadd.f32 %v9847_v54, %v7030_v49  ;;  %9927 = vmatprep.subr.bf16.mxu1 %v11025_v61 }
 0xcde   : > { %v9849_v2 = vpop.f32.mrf.mxu0 }
 0xcdf   : > { %vm7077_vm6 = vcmp.gt.f32.partialorder %v7070_v48, 0.0  ;;  %v7080_v3 = vmul.f32 0.01, %v7070_v48 }
 0xce0   : > { %9928 = vmatpush3.bf16.msra.mxu1 %v10909_v33 }
 0xce1   : > { %v7083_v25 = vsel %vm7077_vm6, %v7070_v48, %v7080_v3  ;;  %9933 = vmatprep.subr.bf16.mxu1 %v11025_v61 }
 0xce2   : > { %v7086_v39 = vpack.c.bf16 %v7083_v25, %v7083_v25 }
 0xce4   : > { %7657 = vmatmul.mubr.bf16.vlgmr.msra.gmra.mxu0 %v7086_v39  ;;  %9930 = vmatmul.mubr.bf16.vlgmr.msra.gmra.mxu1 %v7086_v39 }
 0xce5   : > { %9852 = vmatpush3.bf16.msra.mxu0 %v10911_v4  ;;  %7697 = vmatprep.mubr.bf16.mxu0 %v7085_v24  ;;  %v10943_v24 = vld [vmem:[#allocation4 + $0xb0] sm:$0xff]  }
 0xce6   : > { %9853 = vmatprep.subr.bf16.mxu0 %v10912_v50  ;;  %9949 = vmatprep.mubr.msk.bf16.mxu1 %vm11026_vm5, %v11025_v61 }
 0xce7   : > { %9934 = vmatpush3.bf16.msra.mxu1 %v10942_v46 }
 0xce8   : > { %9935 = vmatprep.subr.bf16.mxu1 %v11025_v61 }
 0xce9   : > { %9854 = vmatpush3.bf16.msra.mxu0 %v10913_v8  ;;  %v7195_v8 = vrot.slane %v310_v34, %v13055_v40  ;;  %v9494_v40 = vld [vmem:[%s13370_s6 + $0xc] ss:$0 sm:$0xff] }
 0xcea   : > { %9855 = vmatprep.subr.bf16.mxu0 %v10914_v9 }
 0xceb   : > { %9936 = vmatpush3.bf16.msra.mxu1 %v10943_v24 }
 0xcec   : > { %9937 = vmatprep.subr.bf16.mxu1 %v11025_v61 }
 0xced   : > { %9856 = vmatpush3.bf16.msra.mxu0 %v10915_v42 }
 0xcee   : > { %9857 = vmatprep.subr.bf16.mxu0 %v10916_v10 }
 0xcef   : > { %9938 = vmatpush3.bf16.msra.mxu1 %v10944_v19 }
 0xcf0   : > { %9939 = vmatprep.subr.bf16.mxu1 %v11025_v61 }
 0xcf1   : > { %9858 = vmatpush3.bf16.msra.mxu0 %v10917_v14 }
 0xcf2   : > { %9859 = vmatprep.subr.bf16.mxu0 %v10918_v15 }
 0xcf5   : > { %9860 = vmatpush3.bf16.msra.mxu0 %v10919_v52 }
 0xcf6   : > { %9861 = vmatprep.subr.bf16.mxu0 %v10920_v16 }
 0xcf9   : > { %9862 = vmatpush3.bf16.msra.mxu0 %v10921_v6 }
 0xcfa   : > { %9863 = vmatprep.subr.bf16.mxu0 %v10922_v38 }
 0xcfd   : > { %9864 = vmatpush3.bf16.msra.mxu0 %v10923_v20 }
 0xcfe   : > { %9865 = vmatprep.subr.bf16.mxu0 %v10924_v21 }
 0xd01   : > { %9866 = vmatpush3.bf16.msra.mxu0 %v10925_v59 }
 0xd02   : > { %9882 = vmatprep.subr.bf16.mxu0 %v10926_v23 }
 0xd04   : > { %7698 = vmatmul.mubr.bf16.vlgmr.msra.gmra.mxu0 %v13324_v47  ;;  %v10945_v47 = vld [vmem:[#allocation4 + $0xa0] sm:$0xff]  }
 0xd05   : > { %9883 = vmatpush3.bf16.msra.mxu0 %v10927_v12  ;;  %9940 = vmatpush3.bf16.msra.mxu1 %v10945_v47 }
 0xd06   : > { %9884 = vmatprep.subr.bf16.mxu0 %v10928_v58  ;;  %9941 = vmatprep.subr.bf16.mxu1 %v11025_v61 }
 0xd09   : > { %9885 = vmatpush3.bf16.msra.mxu0 %v10929_v28  ;;  %9942 = vmatpush3.bf16.msra.mxu1 %v10946_v27 }
 0xd0a   : > { %9886 = vmatprep.subr.bf16.mxu0 %v10930_v29  ;;  %9943 = vmatprep.subr.bf16.mxu1 %v11025_v61 }
 0xd0d   : > { %9887 = vmatpush3.bf16.msra.mxu0 %v10931_v1  ;;  %9944 = vmatpush3.bf16.msra.mxu1 %v10947_v56 }
 0xd0e   : > { %9888 = vmatprep.subr.bf16.mxu0 %v10932_v30  ;;  %9945 = vmatprep.subr.bf16.mxu1 %v11025_v61 }
 0xd11   : > { %9889 = vmatpush3.bf16.msra.mxu0 %v10933_v31  ;;  %9946 = vmatpush3.bf16.msra.mxu1 %v10948_v51 }
 0xd12   : > { %9890 = vmatprep.subr.bf16.mxu0 %v10934_v17  ;;  %9947 = vmatprep.subr.bf16.mxu1 %v11025_v61 }
 0xd15   : > { %9891 = vmatpush3.bf16.msra.mxu0 %v10935_v18  ;;  %9948 = vmatpush3.bf16.msra.mxu1 %v10949_v53 }
 0xd16   : > { %9892 = vmatprep.subr.bf16.mxu0 %v10936_v57 }
 0xd19   : > { %9893 = vmatpush3.bf16.msra.mxu0 %v10937_v35 }
 0xd1a   : > { %9894 = vmatprep.subr.bf16.mxu0 %v10938_v41 }
 0xd1d   : > { %9895 = vmatpush3.bf16.msra.mxu0 %v10939_v7 }
 0xd1e   : > { %9896 = vmatprep.subr.bf16.mxu0 %v10940_v44 }
 0xd21   : > { %9897 = vmatpush3.bf16.msra.mxu0 %v10941_v45 }
 0xd83   : > { %v7617_v37 = vpop.f32.mrf.mxu1 }
 0xd84   : > { %v7618_v36 = vadd.f32 %v7617_v37, %v7187_v5 }
 0xd85   : > { %v7619_v55 = vpop.f32.mrf.mxu1 }
 0xd86   : > { %v7620_v62 = vadd.f32 %v7619_v55, %v7191_v32 }
 0xd87   : > { %v7621_v63 = vpop.f32.mrf.mxu1 }
 0xd89   : > { %v7622_v13 = vpop.f32.mrf.mxu1 }
 0xda4   : > { %v7658_v60 = vpop.f32.mrf.mxu0  ;;  %v7739_v43 = vpop.f32.mrf.mxu1 }
 0xda5   : > { %v7659_v26 = vadd.f32 %v7658_v60, %v7618_v36 }
 0xda6   : > { %v7660_v61 = vpop.f32.mrf.mxu0  ;;  %v9931_v49 = vpop.f32.mrf.mxu1 }
 0xda7   : > { %vm7745_vm7 = vcmp.gt.f32.partialorder %v7659_v26, 0.0  ;;  %v7748_v54 = vmul.f32 0.01, %v7659_v26  ;;  %v7661_v11 = vadd.f32 %v7660_v61, %v7620_v62 }
 0xda8   : > { %v7662_v33 = vpop.f32.mrf.mxu0  ;;  %v7742_v48 = vpop.f32.mrf.mxu1 }
 0xda9   : > { %vm7746_vm8 = vcmp.gt.f32.partialorder %v7661_v11, 0.0  ;;  %v7749_v2 = vmul.f32 0.01, %v7661_v11  ;;  %v7751_v3 = vsel %vm7745_vm7, %v7659_v26, %v7748_v54 }
 0xdaa   : > { %v7663_v25 = vpop.f32.mrf.mxu0  ;;  %v9932_v4 = vpop.f32.mrf.mxu1  ;;  %v7754_v22 = vpack.c.bf16 %v7751_v3, %v7751_v3 }
 0xdab   : > { %v7752_v0 = vsel %vm7746_vm8, %v7661_v11, %v7749_v2 }
 0xdac   : > { %v7755_v39 = vpack.c.bf16 %v7752_v0, %v7752_v0 }
 0xdae   : > { %7987 = vmatprep.mubr.bf16.mxu0 %v7755_v39 }
 0xdaf   : > { %7988 = vmatmul.mubr.bf16.vlgmr.msra.gmra.mxu0 %v7754_v22 }
 0xdc4   : > { %v9867_v50 = vpop.f32.mrf.mxu0 }
 0xdc6   : > { %v9868_v9 = vpop.f32.mrf.mxu0 }
 0xdc7   : > { %v9869_v42 = vadd.f32 %v9868_v9, %v9867_v50 }
 0xdc8   : > { %v9870_v10 = vpop.f32.mrf.mxu0 }
 0xdc9   : > { %v7700_v14 = vadd.f32 %v9869_v42, %v7195_v8 }
 0xdca   : > { %v9871_v15 = vpop.f32.mrf.mxu0 }
 0xdcb   : > { %v7740_v52 = vadd.f32 %v7739_v43, %v7700_v14 }
 0xdcd   : > { %vm7747_vm9 = vcmp.gt.f32.partialorder %v7740_v52, 0.0  ;;  %v7750_v16 = vmul.f32 0.01, %v7740_v52 }
 0xdcf   : > { %v7753_v6 = vsel %vm7747_vm9, %v7740_v52, %v7750_v16 }
 0xdd0   : > { %v7756_v38 = vpack.c.bf16 %v7753_v6, %v7753_v6 }
 0xdd2   : > { %9950 = vmatmul.mubr.bf16.vlgmr.msra.gmra.mxu1 %v7756_v38 }
 0xe6f   : > { %v9898_v20 = vpop.f32.mrf.mxu0 }
 0xe71   : > { %v9899_v21 = vpop.f32.mrf.mxu0 }
 0xe72   : > { %v9900_v12 = vadd.f32 %v9899_v21, %v9898_v20 }
 0xe73   : > { %v9901_v59 = vpop.f32.mrf.mxu0 }
 0xe74   : > { %v7990_v58 = vadd.f32 %v9900_v12, %v9494_v40 }
 0xe75   : > { %v9902_v23 = vpop.f32.mrf.mxu0 }
 0xe92   : > { %v8029_v28 = vpop.f32.mrf.mxu1 }
 0xe93   : > { %v8030_v29 = vadd.f32 %v8029_v28, %v7990_v58 }
 0xe94   : > { %v9951_v1 = vpop.f32.mrf.mxu1 }
 0xe95   : > { %8035 = vst [vmem:[%s306_s21] sm:$0xff] %v8030_v29 }
 0xe96   : > { %v8032_v30 = vpop.f32.mrf.mxu1 }
 0xe98   : > { %v9952_v31 = vpop.f32.mrf.mxu1 }
 0xe99 PF: > { %s19_s24 = sadd.s32 1, %s11016_s24  }
 0xe9a   : > { %p16_p3 = scmp.ge.s32.totalorder %s19_s24, 4  }
 0xe9c   :  { %18 = sbr.rel (!%p16_p3) target bundleno = 2 (0x2), region = 109 }
 0xea1   :  { %8055 = vsyncpa [#allocation3], 1 }
 0xea2   :  { %8057 = vsyncpa [#allocation3 + $0x1], 1 }
 0xea3   :  { %8058 = vsyncpa [#allocation5], 1 }

</bundles_post_ra>
